<compile_context>
chip_gen: v7x
topology: tpu7x:2x2x1
jax: 0.10.0
libtpu: 0.0.40
codegen_flags: <defaults>
</compile_context>

<pallas_src>
import jax
import jax.numpy as jnp
from jax.experimental import pallas as pl
from jax.experimental.pallas import tpu as pltpu

# Shapes consistent with the module (hidden_size=32, Discrete(5) action space).
B = 256     # batch = n_rollout_threads * n_agents (rollout batch)
TB = 128    # batch tile (rows per grid step)
OBS = 24    # flat obs dim
H = 32      # args.hidden_size
A = 5       # Discrete action space size
EPS = 1e-5  # nn.LayerNorm default eps

_VEC_ROWS = 16  # packed (1,D) parameter slab rows (padded to a full (8,128)-aligned tile)

assert B % TB == 0
assert 4 * H == 128          # fused GRU gate layout packs exactly into one 128-lane row
assert H + 2 <= 128          # h_new + logp + action fit in one 128-lane output slab
assert 3 * H <= 128 and OBS <= 128 and A <= 128


def _ln(x, g, b):
    mu = jnp.mean(x, axis=-1, keepdims=True)
    var = jnp.mean((x - mu) * (x - mu), axis=-1, keepdims=True)
    return (x - mu) * jax.lax.rsqrt(var + EPS) * g + b


def r_actor_kernel(obs_ref, h_ref, mask_ref, vec_ref,
                   w1_ref, w2_ref, wg_ref, wa_ref, out_ref):
    # ---- unpack the (16,128) parameter slab (static row slices, no DMA) ----
    g0 = vec_ref[0:1, :OBS]
    be0 = vec_ref[1:2, :OBS]
    b1 = vec_ref[2:3, :H]
    g1 = vec_ref[3:4, :H]
    be1 = vec_ref[4:5, :H]
    b2 = vec_ref[5:6, :H]
    g2 = vec_ref[6:7, :H]
    be2 = vec_ref[7:8, :H]
    bg = vec_ref[8:9, :]          # combined GRU gate bias, full 128 lanes
    gr = vec_ref[9:10, :H]
    ber = vec_ref[10:11, :H]
    ba = vec_ref[11:12, :A]

    obs = obs_ref[...]

    # ---- MLPBase: feature_norm + fc1 + fc_h (layer_N = 1) ----
    x = _ln(obs, g0, be0)
    x = jnp.maximum(
        jnp.dot(x, w1_ref[...], preferred_element_type=jnp.float32) + b1, 0.0)
    x = _ln(x, g1, be1)
    x = jnp.maximum(
        jnp.dot(x, w2_ref[...], preferred_element_type=jnp.float32) + b2, 0.0)
    x = _ln(x, g2, be2)

    # ---- RNNLayer: masked hidden state, single fused GRU step, LayerNorm on output ----
    h = h_ref[...] * mask_ref[...]                          # (TB, H) * (TB, 1)
    xh = jnp.concatenate([x, h], axis=-1)                   # (TB, 2H)
    # one MXU push: columns = [r(ih+hh), z(ih+hh), n_ih, n_hh]
    g = jnp.dot(xh, wg_ref[...], preferred_element_type=jnp.float32) + bg  # (TB, 4H=128)
    r = jax.nn.sigmoid(g[:, 0:H])
    z = jax.nn.sigmoid(g[:, H:2 * H])
    n = jnp.tanh(g[:, 2 * H:3 * H] + r * g[:, 3 * H:4 * H])
    h_new = (1.0 - z) * n + z * h
    feats = _ln(h_new, gr, ber)                             # RNNLayer.norm on features only

    # ---- ACTLayer (Categorical head, deterministic=True) ----
    logits = jnp.dot(feats, wa_ref[...], preferred_element_type=jnp.float32) + ba
    maxv = jnp.max(logits, axis=-1, keepdims=True)
    iota = jax.lax.broadcasted_iota(jnp.int32, logits.shape, 1)
    action = jnp.min(jnp.where(logits == maxv, iota, jnp.int32(A)),
                     axis=-1, keepdims=True)                # first-occurrence argmax
    lse = maxv + jnp.log(jnp.sum(jnp.exp(logits - maxv), axis=-1, keepdims=True))
    # deterministic branch: logits[argmax] == maxv, so log_prob = maxv - lse
    logp = maxv - lse

    # ---- single lane-dense (TB, 128) output store: [h_new | logp | action | pad] ----
    pad = jnp.zeros((TB, 128 - (H + 2)), jnp.float32)
    out_ref[...] = jnp.concatenate(
        [h_new, logp, action.astype(jnp.float32), pad], axis=-1)


def make_params(key):
    """Module-style parameters (weights pre-transposed to (in, out), gate order [r, z, n])."""
    ks = jax.random.split(key, 12)

    def w(k, shape, scale=0.1):
        return (scale * jax.random.normal(k, shape)).astype(jnp.float32)

    return dict(
        # feature_norm
        g0=1.0 + w(ks[0], (1, OBS), 0.05), be0=w(ks[1], (1, OBS), 0.05),
        # fc1: Linear(OBS, H)
        w1=w(ks[2], (OBS, H)), b1=w(ks[3], (1, H), 0.01),
        g1=jnp.ones((1, H), jnp.float32), be1=jnp.zeros((1, H), jnp.float32),
        # fc_h: Linear(H, H)
        w2=w(ks[4], (H, H)), b2=w(ks[5], (1, H), 0.01),
        g2=jnp.ones((1, H), jnp.float32), be2=jnp.zeros((1, H), jnp.float32),
        # GRU (transposed to (H, 3H)); gate order [r, z, n]
        wih=w(ks[6], (H, 3 * H)), whh=w(ks[7], (H, 3 * H)),
        bih=w(ks[8], (1, 3 * H), 0.01), bhh=w(ks[9], (1, 3 * H), 0.01),
        # RNNLayer LayerNorm
        gr=jnp.ones((1, H), jnp.float32), ber=jnp.zeros((1, H), jnp.float32),
        # ACTLayer Categorical: Linear(H, A)
        wa=w(ks[10], (H, A)), ba=w(ks[11], (1, A), 0.01),
    )


def pack_params(p):
    """Pack module params into: one (16,128) vector slab + fused GRU weight + small matrices."""
    wih, whh = p["wih"], p["whh"]
    zero = jnp.zeros((H, H), jnp.float32)
    # Fused GRU weight (2H, 4H): [x, h] @ W -> [r(ih+hh), z(ih+hh), n_ih, n_hh]
    w_gru = jnp.concatenate([
        jnp.concatenate([wih[:, :H], wih[:, H:2 * H], wih[:, 2 * H:], zero], axis=1),
        jnp.concatenate([whh[:, :H], whh[:, H:2 * H], zero, whh[:, 2 * H:]], axis=1),
    ], axis=0)
    b_gru = jnp.concatenate([
        p["bih"][:, :H] + p["bhh"][:, :H],
        p["bih"][:, H:2 * H] + p["bhh"][:, H:2 * H],
        p["bih"][:, 2 * H:],
        p["bhh"][:, 2 * H:],
    ], axis=1)  # (1, 4H=128)

    def row(v):
        v = v.reshape(-1).astype(jnp.float32)
        return jnp.pad(v, (0, 128 - v.shape[0]))

    rows = [p["g0"], p["be0"], p["b1"], p["g1"], p["be1"],
            p["b2"], p["g2"], p["be2"], b_gru, p["gr"], p["ber"], p["ba"]]
    vecs = jnp.stack([row(v) for v in rows] +
                     [jnp.zeros((128,), jnp.float32)] * (_VEC_ROWS - len(rows)))
    return vecs, p["w1"], p["w2"], w_gru, p["wa"]


def r_actor_forward(obs, rnn_states, masks, params):
    h0 = rnn_states.reshape(B, H)
    vecs, w1, w2, w_gru, wa = pack_params(params)

    batched = lambda d: pl.BlockSpec((TB, d), lambda i: (i, 0))
    const = lambda s: pl.BlockSpec(s, lambda i: (0, 0))   # VMEM-resident across grid steps

    out = pl.pallas_call(
        r_actor_kernel,
        out_shape=jax.ShapeDtypeStruct((B, 128), jnp.float32),
        grid=(B // TB,),
        in_specs=[batched(OBS), batched(H), batched(1),
                  const((_VEC_ROWS, 128)),
                  const((OBS, H)), const((H, H)),
                  const((2 * H, 4 * H)), const((H, A))],
        out_specs=pl.BlockSpec((TB, 128), lambda i: (i, 0)),
        compiler_params=pltpu.CompilerParams(
            dimension_semantics=("parallel",)),
    )(obs, h0, masks, vecs, w1, w2, w_gru, wa)

    new_rnn_states = out[:, :H].reshape(B, 1, H)
    action_log_probs = out[:, H:H + 1]
    actions = out[:, H + 1:H + 2].astype(jnp.int32)   # small ints are exact in f32
    return actions, action_log_probs, new_rnn_states


def r_actor_reference(obs, rnn_states, masks, p):
    """Pure-JAX reference mirroring the PyTorch module semantics (unfused params)."""
    x = _ln(obs, p["g0"], p["be0"])
    x = _ln(jnp.maximum(x @ p["w1"] + p["b1"], 0.0), p["g1"], p["be1"])
    x = _ln(jnp.maximum(x @ p["w2"] + p["b2"], 0.0), p["g2"], p["be2"])
    h = rnn_states.reshape(B, H) * masks
    gi = x @ p["wih"] + p["bih"]
    gh = h @ p["whh"] + p["bhh"]
    r = jax.nn.sigmoid(gi[:, :H] + gh[:, :H])
    z = jax.nn.sigmoid(gi[:, H:2 * H] + gh[:, H:2 * H])
    n = jnp.tanh(gi[:, 2 * H:] + r * gh[:, 2 * H:])
    h_new = (1.0 - z) * n + z * h
    feats = _ln(h_new, p["gr"], p["ber"])
    logits = feats @ p["wa"] + p["ba"]
    action = jnp.argmax(logits, axis=-1, keepdims=True).astype(jnp.int32)
    logp = jnp.take_along_axis(jax.nn.log_softmax(logits, axis=-1), action, axis=-1)
    return action, logp, h_new.reshape(B, 1, H)


if __name__ == "__main__":
    key = jax.random.PRNGKey(0)
    k_obs, k_h, k_m, k_p = jax.random.split(key, 4)

    obs = jax.random.normal(k_obs, (B, OBS), dtype=jnp.float32)
    rnn_states = jax.random.normal(k_h, (B, 1, H), dtype=jnp.float32)
    masks = (jax.random.uniform(k_m, (B, 1)) > 0.1).astype(jnp.float32)  # some env resets
    params = make_params(k_p)

    actions, action_log_probs, new_rnn_states = jax.block_until_ready(
        r_actor_forward(obs, rnn_states, masks, params))

    a_ref, lp_ref, h_ref = r_actor_reference(obs, rnn_states, masks, params)
    assert actions.shape == (B, 1) and actions.dtype == jnp.int32
    assert action_log_probs.shape == (B, 1)
    assert new_rnn_states.shape == (B, 1, H)
    assert jnp.array_equal(actions, a_ref)
    assert jnp.allclose(action_log_probs, lp_ref, atol=1e-4, rtol=1e-4)
    assert jnp.allclose(new_rnn_states, h_ref, atol=1e-4, rtol=1e-4)

    # TODO(synk): stochastic Categorical sampling (deterministic=False), available_actions
    # masking, the graph-based MGNN / MIXBase / CNNBase branches, the influence-policy MLP,
    # and an in-kernel multi-step rollout loop (T>1, weights held resident) are not implemented.
    print("KERNEL_OK")
</pallas_src>

<mosaic_0001>
module attributes {stable_mosaic.version = 11 : i64} {
  func.func @r_actor_kernel(%arg0: i32, %arg1: memref<128x24xf32, #tpu.memory_space<vmem>>, %arg2: memref<128x32xf32, #tpu.memory_space<vmem>>, %arg3: memref<128x1xf32, #tpu.memory_space<vmem>>, %arg4: memref<16x128xf32, #tpu.memory_space<vmem>>, %arg5: memref<24x32xf32, #tpu.memory_space<vmem>>, %arg6: memref<32x32xf32, #tpu.memory_space<vmem>>, %arg7: memref<64x128xf32, #tpu.memory_space<vmem>>, %arg8: memref<32x5xf32, #tpu.memory_space<vmem>>, %arg9: memref<128x128xf32, #tpu.memory_space<vmem>>) attributes {dimension_semantics = [#tpu.dimension_semantics<parallel>], iteration_bounds = array<i64: 2>, scalar_prefetch = 0 : i64, scratch_operands = 0 : i64, tpu.core_type = #tpu.core_type<tc>, window_params = [{transform_indices = @transform_0, window_bounds = array<i64: 128, 24>}, {transform_indices = @transform_1, window_bounds = array<i64: 128, 32>}, {transform_indices = @transform_2, window_bounds = array<i64: 128, 1>}, {pipeline_mode = #tpu.pipeline_mode<synchronous>, transform_indices = @transform_3, window_bounds = array<i64: 16, 128>}, {pipeline_mode = #tpu.pipeline_mode<synchronous>, transform_indices = @transform_4, window_bounds = array<i64: 24, 32>}, {pipeline_mode = #tpu.pipeline_mode<synchronous>, transform_indices = @transform_5, window_bounds = array<i64: 32, 32>}, {pipeline_mode = #tpu.pipeline_mode<synchronous>, transform_indices = @transform_6, window_bounds = array<i64: 64, 128>}, {pipeline_mode = #tpu.pipeline_mode<synchronous>, transform_indices = @transform_7, window_bounds = array<i64: 32, 5>}, {transform_indices = @transform_8, window_bounds = array<i64: 128, 128>}]} {
    %c0 = arith.constant 0 : index
    %c0_0 = arith.constant 0 : index
    %0 = vector.load %arg4[%c0, %c0_0] : memref<16x128xf32, #tpu.memory_space<vmem>>, vector<1x24xf32>
    %c1 = arith.constant 1 : index
    %c0_1 = arith.constant 0 : index
    %1 = vector.load %arg4[%c1, %c0_1] : memref<16x128xf32, #tpu.memory_space<vmem>>, vector<1x24xf32>
    %c2 = arith.constant 2 : index
    %c0_2 = arith.constant 0 : index
    %2 = vector.load %arg4[%c2, %c0_2] : memref<16x128xf32, #tpu.memory_space<vmem>>, vector<1x32xf32>
    %c3 = arith.constant 3 : index
    %c0_3 = arith.constant 0 : index
    %3 = vector.load %arg4[%c3, %c0_3] : memref<16x128xf32, #tpu.memory_space<vmem>>, vector<1x32xf32>
    %c4 = arith.constant 4 : index
    %c0_4 = arith.constant 0 : index
    %4 = vector.load %arg4[%c4, %c0_4] : memref<16x128xf32, #tpu.memory_space<vmem>>, vector<1x32xf32>
    %c5 = arith.constant 5 : index
    %c0_5 = arith.constant 0 : index
    %5 = vector.load %arg4[%c5, %c0_5] : memref<16x128xf32, #tpu.memory_space<vmem>>, vector<1x32xf32>
    %c6 = arith.constant 6 : index
    %c0_6 = arith.constant 0 : index
    %6 = vector.load %arg4[%c6, %c0_6] : memref<16x128xf32, #tpu.memory_space<vmem>>, vector<1x32xf32>
    %c7 = arith.constant 7 : index
    %c0_7 = arith.constant 0 : index
    %7 = vector.load %arg4[%c7, %c0_7] : memref<16x128xf32, #tpu.memory_space<vmem>>, vector<1x32xf32>
    %c8 = arith.constant 8 : index
    %c0_8 = arith.constant 0 : index
    %8 = vector.load %arg4[%c8, %c0_8] : memref<16x128xf32, #tpu.memory_space<vmem>>, vector<1x128xf32>
    %c9 = arith.constant 9 : index
    %c0_9 = arith.constant 0 : index
    %9 = vector.load %arg4[%c9, %c0_9] : memref<16x128xf32, #tpu.memory_space<vmem>>, vector<1x32xf32>
    %c10 = arith.constant 10 : index
    %c0_10 = arith.constant 0 : index
    %10 = vector.load %arg4[%c10, %c0_10] : memref<16x128xf32, #tpu.memory_space<vmem>>, vector<1x32xf32>
    %c11 = arith.constant 11 : index
    %c0_11 = arith.constant 0 : index
    %11 = vector.load %arg4[%c11, %c0_11] : memref<16x128xf32, #tpu.memory_space<vmem>>, vector<1x5xf32>
    %c0_12 = arith.constant 0 : index
    %c0_13 = arith.constant 0 : index
    %12 = vector.load %arg1[%c0_12, %c0_13] : memref<128x24xf32, #tpu.memory_space<vmem>>, vector<128x24xf32>
    %cst = arith.constant dense<0.000000e+00> : vector<128xf32>
    %13 = vector.multi_reduction <add>, %12, %cst [1] : vector<128x24xf32> to vector<128xf32>
    %14 = vector.shape_cast %13 : vector<128xf32> to vector<128x1xf32>
    %cst_14 = arith.constant 2.400000e+01 : f32
    %15 = vector.broadcast %cst_14 : f32 to vector<128x1xf32>
    %16 = arith.divf %14, %15 : vector<128x1xf32>
    %17 = vector.broadcast %16 : vector<128x1xf32> to vector<128x24xf32>
    %18 = arith.subf %12, %17 : vector<128x24xf32>
    %19 = vector.broadcast %16 : vector<128x1xf32> to vector<128x24xf32>
    %20 = arith.subf %12, %19 : vector<128x24xf32>
    %21 = arith.mulf %18, %20 : vector<128x24xf32>
    %cst_15 = arith.constant dense<0.000000e+00> : vector<128xf32>
    %22 = vector.multi_reduction <add>, %21, %cst_15 [1] : vector<128x24xf32> to vector<128xf32>
    %23 = vector.shape_cast %22 : vector<128xf32> to vector<128x1xf32>
    %cst_16 = arith.constant 2.400000e+01 : f32
    %24 = vector.broadcast %cst_16 : f32 to vector<128x1xf32>
    %25 = arith.divf %23, %24 : vector<128x1xf32>
    %26 = vector.broadcast %16 : vector<128x1xf32> to vector<128x24xf32>
    %27 = arith.subf %12, %26 : vector<128x24xf32>
    %cst_17 = arith.constant 9.99999974E-6 : f32
    %28 = vector.broadcast %cst_17 : f32 to vector<128x1xf32>
    %29 = arith.addf %25, %28 : vector<128x1xf32>
    %30 = math.rsqrt %29 : vector<128x1xf32>
    %31 = vector.broadcast %30 : vector<128x1xf32> to vector<128x24xf32>
    %32 = arith.mulf %27, %31 : vector<128x24xf32>
    %33 = vector.broadcast %0 : vector<1x24xf32> to vector<128x24xf32>
    %34 = arith.mulf %32, %33 : vector<128x24xf32>
    %35 = vector.broadcast %1 : vector<1x24xf32> to vector<128x24xf32>
    %36 = arith.addf %34, %35 : vector<128x24xf32>
    %c0_18 = arith.constant 0 : index
    %c0_19 = arith.constant 0 : index
    %37 = vector.load %arg5[%c0_18, %c0_19] : memref<24x32xf32, #tpu.memory_space<vmem>>, vector<24x32xf32>
    %cst_20 = arith.constant dense<0.000000e+00> : vector<128x32xf32>
    %38 = tpu.matmul %36, %37, %cst_20 {dimension_numbers = #tpu.dot_dimension_numbers<[1], [0], [0], [1], [0, 0, 1, 1], [], []>} : vector<128x24xf32>, vector<24x32xf32>, vector<128x32xf32> -> vector<128x32xf32>
    %39 = vector.broadcast %2 : vector<1x32xf32> to vector<128x32xf32>
    %40 = arith.addf %38, %39 : vector<128x32xf32>
    %cst_21 = arith.constant 0.000000e+00 : f32
    %41 = vector.broadcast %cst_21 : f32 to vector<128x32xf32>
    %42 = arith.maximumf %40, %41 : vector<128x32xf32>
    %cst_22 = arith.constant dense<0.000000e+00> : vector<128xf32>
    %43 = vector.multi_reduction <add>, %42, %cst_22 [1] : vector<128x32xf32> to vector<128xf32>
    %44 = vector.shape_cast %43 : vector<128xf32> to vector<128x1xf32>
    %cst_23 = arith.constant 3.200000e+01 : f32
    %45 = vector.broadcast %cst_23 : f32 to vector<128x1xf32>
    %46 = arith.divf %44, %45 : vector<128x1xf32>
    %47 = vector.broadcast %46 : vector<128x1xf32> to vector<128x32xf32>
    %48 = arith.subf %42, %47 : vector<128x32xf32>
    %49 = vector.broadcast %46 : vector<128x1xf32> to vector<128x32xf32>
    %50 = arith.subf %42, %49 : vector<128x32xf32>
    %51 = arith.mulf %48, %50 : vector<128x32xf32>
    %cst_24 = arith.constant dense<0.000000e+00> : vector<128xf32>
    %52 = vector.multi_reduction <add>, %51, %cst_24 [1] : vector<128x32xf32> to vector<128xf32>
    %53 = vector.shape_cast %52 : vector<128xf32> to vector<128x1xf32>
    %cst_25 = arith.constant 3.200000e+01 : f32
    %54 = vector.broadcast %cst_25 : f32 to vector<128x1xf32>
    %55 = arith.divf %53, %54 : vector<128x1xf32>
    %56 = vector.broadcast %46 : vector<128x1xf32> to vector<128x32xf32>
    %57 = arith.subf %42, %56 : vector<128x32xf32>
    %cst_26 = arith.constant 9.99999974E-6 : f32
    %58 = vector.broadcast %cst_26 : f32 to vector<128x1xf32>
    %59 = arith.addf %55, %58 : vector<128x1xf32>
    %60 = math.rsqrt %59 : vector<128x1xf32>
    %61 = vector.broadcast %60 : vector<128x1xf32> to vector<128x32xf32>
    %62 = arith.mulf %57, %61 : vector<128x32xf32>
    %63 = vector.broadcast %3 : vector<1x32xf32> to vector<128x32xf32>
    %64 = arith.mulf %62, %63 : vector<128x32xf32>
    %65 = vector.broadcast %4 : vector<1x32xf32> to vector<128x32xf32>
    %66 = arith.addf %64, %65 : vector<128x32xf32>
    %c0_27 = arith.constant 0 : index
    %c0_28 = arith.constant 0 : index
    %67 = vector.load %arg6[%c0_27, %c0_28] : memref<32x32xf32, #tpu.memory_space<vmem>>, vector<32x32xf32>
    %cst_29 = arith.constant dense<0.000000e+00> : vector<128x32xf32>
    %68 = tpu.matmul %66, %67, %cst_29 {dimension_numbers = #tpu.dot_dimension_numbers<[1], [0], [0], [1], [0, 0, 1, 1], [], []>} : vector<128x32xf32>, vector<32x32xf32>, vector<128x32xf32> -> vector<128x32xf32>
    %69 = vector.broadcast %5 : vector<1x32xf32> to vector<128x32xf32>
    %70 = arith.addf %68, %69 : vector<128x32xf32>
    %cst_30 = arith.constant 0.000000e+00 : f32
    %71 = vector.broadcast %cst_30 : f32 to vector<128x32xf32>
    %72 = arith.maximumf %70, %71 : vector<128x32xf32>
    %cst_31 = arith.constant dense<0.000000e+00> : vector<128xf32>
    %73 = vector.multi_reduction <add>, %72, %cst_31 [1] : vector<128x32xf32> to vector<128xf32>
    %74 = vector.shape_cast %73 : vector<128xf32> to vector<128x1xf32>
    %cst_32 = arith.constant 3.200000e+01 : f32
    %75 = vector.broadcast %cst_32 : f32 to vector<128x1xf32>
    %76 = arith.divf %74, %75 : vector<128x1xf32>
    %77 = vector.broadcast %76 : vector<128x1xf32> to vector<128x32xf32>
    %78 = arith.subf %72, %77 : vector<128x32xf32>
    %79 = vector.broadcast %76 : vector<128x1xf32> to vector<128x32xf32>
    %80 = arith.subf %72, %79 : vector<128x32xf32>
    %81 = arith.mulf %78, %80 : vector<128x32xf32>
    %cst_33 = arith.constant dense<0.000000e+00> : vector<128xf32>
    %82 = vector.multi_reduction <add>, %81, %cst_33 [1] : vector<128x32xf32> to vector<128xf32>
    %83 = vector.shape_cast %82 : vector<128xf32> to vector<128x1xf32>
    %cst_34 = arith.constant 3.200000e+01 : f32
    %84 = vector.broadcast %cst_34 : f32 to vector<128x1xf32>
    %85 = arith.divf %83, %84 : vector<128x1xf32>
    %86 = vector.broadcast %76 : vector<128x1xf32> to vector<128x32xf32>
    %87 = arith.subf %72, %86 : vector<128x32xf32>
    %cst_35 = arith.constant 9.99999974E-6 : f32
    %88 = vector.broadcast %cst_35 : f32 to vector<128x1xf32>
    %89 = arith.addf %85, %88 : vector<128x1xf32>
    %90 = math.rsqrt %89 : vector<128x1xf32>
    %91 = vector.broadcast %90 : vector<128x1xf32> to vector<128x32xf32>
    %92 = arith.mulf %87, %91 : vector<128x32xf32>
    %93 = vector.broadcast %6 : vector<1x32xf32> to vector<128x32xf32>
    %94 = arith.mulf %92, %93 : vector<128x32xf32>
    %95 = vector.broadcast %7 : vector<1x32xf32> to vector<128x32xf32>
    %96 = arith.addf %94, %95 : vector<128x32xf32>
    %c0_36 = arith.constant 0 : index
    %c0_37 = arith.constant 0 : index
    %97 = vector.load %arg2[%c0_36, %c0_37] : memref<128x32xf32, #tpu.memory_space<vmem>>, vector<128x32xf32>
    %c0_38 = arith.constant 0 : index
    %c0_39 = arith.constant 0 : index
    %98 = vector.load %arg3[%c0_38, %c0_39] : memref<128x1xf32, #tpu.memory_space<vmem>>, vector<128x1xf32>
    %99 = vector.broadcast %98 : vector<128x1xf32> to vector<128x32xf32>
    %100 = arith.mulf %97, %99 : vector<128x32xf32>
    %101 = tpu.concatenate %96, %100 in 1 : vector<128x32xf32>, vector<128x32xf32> -> vector<128x64xf32>
    %c0_40 = arith.constant 0 : index
    %c0_41 = arith.constant 0 : index
    %102 = vector.load %arg7[%c0_40, %c0_41] : memref<64x128xf32, #tpu.memory_space<vmem>>, vector<64x128xf32>
    %cst_42 = arith.constant dense<0.000000e+00> : vector<128x128xf32>
    %103 = tpu.matmul %101, %102, %cst_42 {dimension_numbers = #tpu.dot_dimension_numbers<[1], [0], [0], [1], [0, 0, 1, 1], [], []>} : vector<128x64xf32>, vector<64x128xf32>, vector<128x128xf32> -> vector<128x128xf32>
    %104 = vector.broadcast %8 : vector<1x128xf32> to vector<128x128xf32>
    %105 = arith.addf %103, %104 : vector<128x128xf32>
    %106 = vector.extract_strided_slice %105 {offsets = [0, 0], sizes = [128, 32], strides = [1, 1]} : vector<128x128xf32> to vector<128x32xf32>
    %107 = arith.negf %106 : vector<128x32xf32>
    %108 = math.exp %107 : vector<128x32xf32>
    %cst_43 = arith.constant 1.000000e+00 : f32
    %109 = vector.broadcast %cst_43 : f32 to vector<128x32xf32>
    %110 = arith.addf %109, %108 : vector<128x32xf32>
    %111 = arith.divf %109, %110 : vector<128x32xf32>
    %112 = vector.extract_strided_slice %105 {offsets = [0, 32], sizes = [128, 32], strides = [1, 1]} : vector<128x128xf32> to vector<128x32xf32>
    %113 = arith.negf %112 : vector<128x32xf32>
    %114 = math.exp %113 : vector<128x32xf32>
    %cst_44 = arith.constant 1.000000e+00 : f32
    %115 = vector.broadcast %cst_44 : f32 to vector<128x32xf32>
    %116 = arith.addf %115, %114 : vector<128x32xf32>
    %117 = arith.divf %115, %116 : vector<128x32xf32>
    %118 = vector.extract_strided_slice %105 {offsets = [0, 64], sizes = [128, 32], strides = [1, 1]} : vector<128x128xf32> to vector<128x32xf32>
    %119 = vector.extract_strided_slice %105 {offsets = [0, 96], sizes = [128, 32], strides = [1, 1]} : vector<128x128xf32> to vector<128x32xf32>
    %120 = arith.mulf %111, %119 : vector<128x32xf32>
    %121 = arith.addf %118, %120 : vector<128x32xf32>
    %122 = math.tanh %121 : vector<128x32xf32>
    %cst_45 = arith.constant 1.000000e+00 : f32
    %123 = vector.broadcast %cst_45 : f32 to vector<128x32xf32>
    %124 = arith.subf %123, %117 : vector<128x32xf32>
    %125 = arith.mulf %124, %122 : vector<128x32xf32>
    %126 = arith.mulf %117, %100 : vector<128x32xf32>
    %127 = arith.addf %125, %126 : vector<128x32xf32>
    %cst_46 = arith.constant dense<0.000000e+00> : vector<128xf32>
    %128 = vector.multi_reduction <add>, %127, %cst_46 [1] : vector<128x32xf32> to vector<128xf32>
    %129 = vector.shape_cast %128 : vector<128xf32> to vector<128x1xf32>
    %cst_47 = arith.constant 3.200000e+01 : f32
    %130 = vector.broadcast %cst_47 : f32 to vector<128x1xf32>
    %131 = arith.divf %129, %130 : vector<128x1xf32>
    %132 = vector.broadcast %131 : vector<128x1xf32> to vector<128x32xf32>
    %133 = arith.subf %127, %132 : vector<128x32xf32>
    %134 = vector.broadcast %131 : vector<128x1xf32> to vector<128x32xf32>
    %135 = arith.subf %127, %134 : vector<128x32xf32>
    %136 = arith.mulf %133, %135 : vector<128x32xf32>
    %cst_48 = arith.constant dense<0.000000e+00> : vector<128xf32>
    %137 = vector.multi_reduction <add>, %136, %cst_48 [1] : vector<128x32xf32> to vector<128xf32>
    %138 = vector.shape_cast %137 : vector<128xf32> to vector<128x1xf32>
    %cst_49 = arith.constant 3.200000e+01 : f32
    %139 = vector.broadcast %cst_49 : f32 to vector<128x1xf32>
    %140 = arith.divf %138, %139 : vector<128x1xf32>
    %141 = vector.broadcast %131 : vector<128x1xf32> to vector<128x32xf32>
    %142 = arith.subf %127, %141 : vector<128x32xf32>
    %cst_50 = arith.constant 9.99999974E-6 : f32
    %143 = vector.broadcast %cst_50 : f32 to vector<128x1xf32>
    %144 = arith.addf %140, %143 : vector<128x1xf32>
    %145 = math.rsqrt %144 : vector<128x1xf32>
    %146 = vector.broadcast %145 : vector<128x1xf32> to vector<128x32xf32>
    %147 = arith.mulf %142, %146 : vector<128x32xf32>
    %148 = vector.broadcast %9 : vector<1x32xf32> to vector<128x32xf32>
    %149 = arith.mulf %147, %148 : vector<128x32xf32>
    %150 = vector.broadcast %10 : vector<1x32xf32> to vector<128x32xf32>
    %151 = arith.addf %149, %150 : vector<128x32xf32>
    %c0_51 = arith.constant 0 : index
    %c0_52 = arith.constant 0 : index
    %152 = vector.load %arg8[%c0_51, %c0_52] : memref<32x5xf32, #tpu.memory_space<vmem>>, vector<32x5xf32>
    %cst_53 = arith.constant dense<0.000000e+00> : vector<128x5xf32>
    %153 = tpu.matmul %151, %152, %cst_53 {dimension_numbers = #tpu.dot_dimension_numbers<[1], [0], [0], [1], [0, 0, 1, 1], [], []>} : vector<128x32xf32>, vector<32x5xf32>, vector<128x5xf32> -> vector<128x5xf32>
    %154 = vector.broadcast %11 : vector<1x5xf32> to vector<128x5xf32>
    %155 = arith.addf %153, %154 : vector<128x5xf32>
    %cst_54 = arith.constant dense<0xFF800000> : vector<128xf32>
    %156 = vector.multi_reduction <maximumf>, %155, %cst_54 [1] : vector<128x5xf32> to vector<128xf32>
    %157 = vector.shape_cast %156 : vector<128xf32> to vector<128x1xf32>
    %158 = tpu.iota {dimensions = array<i32: 1>} : vector<128x5xi32>
    %159 = vector.broadcast %157 : vector<128x1xf32> to vector<128x5xf32>
    %160 = arith.cmpf oeq, %155, %159 : vector<128x5xf32>
    %c5_i32 = arith.constant 5 : i32
    %161 = vector.broadcast %c5_i32 : i32 to vector<128x5xi32>
    %162 = arith.select %160, %158, %161 : vector<128x5xi1>, vector<128x5xi32>
    %cst_55 = arith.constant dense<2147483647> : vector<128xi32>
    %163 = vector.multi_reduction <minsi>, %162, %cst_55 [1] : vector<128x5xi32> to vector<128xi32>
    %164 = vector.shape_cast %163 : vector<128xi32> to vector<128x1xi32>
    %165 = vector.broadcast %157 : vector<128x1xf32> to vector<128x5xf32>
    %166 = arith.subf %155, %165 : vector<128x5xf32>
    %167 = math.exp %166 : vector<128x5xf32>
    %cst_56 = arith.constant dense<0.000000e+00> : vector<128xf32>
    %168 = vector.multi_reduction <add>, %167, %cst_56 [1] : vector<128x5xf32> to vector<128xf32>
    %169 = vector.shape_cast %168 : vector<128xf32> to vector<128x1xf32>
    %170 = math.log %169 : vector<128x1xf32>
    %171 = arith.addf %157, %170 : vector<128x1xf32>
    %172 = arith.subf %157, %171 : vector<128x1xf32>
    %cst_57 = arith.constant 0.000000e+00 : f32
    %173 = vector.broadcast %cst_57 : f32 to vector<128x94xf32>
    %174 = arith.sitofp %164 : vector<128x1xi32> to vector<128x1xf32>
    %175 = tpu.concatenate %127, %172, %174, %173 in 1 : vector<128x32xf32>, vector<128x1xf32>, vector<128x1xf32>, vector<128x94xf32> -> vector<128x128xf32>
    %c0_58 = arith.constant 0 : index
    %c0_59 = arith.constant 0 : index
    %176 = vector.load %arg9[%c0_58, %c0_59] : memref<128x128xf32, #tpu.memory_space<vmem>>, vector<128x128xf32>
    tpu.vector_store %arg9[%c0_58, %c0_59], %175 {strides = array<i32>} : memref<128x128xf32, #tpu.memory_space<vmem>>, vector<128x128xf32>,
    return
  }
  func.func @transform_0(%arg0: i32) -> (i32, i32) {
    %c0_i32 = arith.constant 0 : i32
    %c0_i32_0 = arith.constant 0 : i32
    return %arg0, %c0_i32 : i32, i32
  }
  func.func @transform_1(%arg0: i32) -> (i32, i32) {
    %c0_i32 = arith.constant 0 : i32
    %c0_i32_0 = arith.constant 0 : i32
    return %arg0, %c0_i32 : i32, i32
  }
  func.func @transform_2(%arg0: i32) -> (i32, i32) {
    %c0_i32 = arith.constant 0 : i32
    %c0_i32_0 = arith.constant 0 : i32
    return %arg0, %c0_i32 : i32, i32
  }
  func.func @transform_3(%arg0: i32) -> (i32, i32) {
    %c0_i32 = arith.constant 0 : i32
    %c0_i32_0 = arith.constant 0 : i32
    %c0_i32_1 = arith.constant 0 : i32
    return %c0_i32, %c0_i32_0 : i32, i32
  }
  func.func @transform_4(%arg0: i32) -> (i32, i32) {
    %c0_i32 = arith.constant 0 : i32
    %c0_i32_0 = arith.constant 0 : i32
    %c0_i32_1 = arith.constant 0 : i32
    return %c0_i32, %c0_i32_0 : i32, i32
  }
  func.func @transform_5(%arg0: i32) -> (i32, i32) {
    %c0_i32 = arith.constant 0 : i32
    %c0_i32_0 = arith.constant 0 : i32
    %c0_i32_1 = arith.constant 0 : i32
    return %c0_i32, %c0_i32_0 : i32, i32
  }
  func.func @transform_6(%arg0: i32) -> (i32, i32) {
    %c0_i32 = arith.constant 0 : i32
    %c0_i32_0 = arith.constant 0 : i32
    %c0_i32_1 = arith.constant 0 : i32
    return %c0_i32, %c0_i32_0 : i32, i32
  }
  func.func @transform_7(%arg0: i32) -> (i32, i32) {
    %c0_i32 = arith.constant 0 : i32
    %c0_i32_0 = arith.constant 0 : i32
    %c0_i32_1 = arith.constant 0 : i32
    return %c0_i32, %c0_i32_0 : i32, i32
  }
  func.func @transform_8(%arg0: i32) -> (i32, i32) {
    %c0_i32 = arith.constant 0 : i32
    %c0_i32_0 = arith.constant 0 : i32
    return %arg0, %c0_i32 : i32, i32
  }
}

</mosaic_0001>

<bundles_post_ra>
// kernel: tpu_custom_call.1
= control target key start
LH: loop header
LB: loop body
LE: loop exit
PB: predicated region body
PF: predicated region fallthrough
CT: control target
= control target key end

     0   :  { %13 = vsyncpa [#allocation3], 0  ;;  %s6745_s0 = inlined_call_operand.vmem [shape: f32[256,24], index: 0, kind: input, shape index: {}]   ;;  %s6746_s1 = inlined_call_operand.vmem [shape: f32[256,32], index: 1, kind: input, shape index: {}]   ;;  %s6747_s2 = inlined_call_operand.vmem [shape: f32[256,1], index: 2, kind: input, shape index: {}]   ;;  %s6748_s3 = inlined_call_operand.vmem [shape: f32[16,128], index: 3, kind: input, shape index: {}]   ;;  %s6749_s4 = inlined_call_operand.vmem [shape: f32[24,32], index: 4, kind: input, shape index: {}]   ;;  %s6750_s5 = inlined_call_operand.vmem [shape: f32[32,32], index: 5, kind: input, shape index: {}]   ;;  %s6751_s6 = inlined_call_operand.vmem [shape: f32[64,128], index: 6, kind: input, shape index: {}]   ;;  %s6752_s7 = inlined_call_operand.vmem [shape: f32[32,5], index: 7, kind: input, shape index: {}]   ;;  %s6753_s8 = inlined_call_operand.hbm [shape: f32[256,128], index: 8, kind: output, shape index: {}]  }
   0x1   :  { %15 = vsyncpa [#allocation3 + $0x1], 0  ;;  %s4469_s27 = smov 0   ;;  %s4471_s28 = smov 0  }
   0x2   :  { %s4473_s29 = smov 0   ;;  %s4475_s30 = smov 0  }
   0x3 LB: > { %s4490_s9 = sadd.s32 4294967295, %s4415_s30   ;;  %s3656_s10 = sadd.s32 4294967294, %s4415_s30   ;;  %s4415_s30 = sphi %s4475_s30, %s6827_s30   ;;  %s4411_s29 = sphi %s4473_s29, %s6826_s29   ;;  %s4407_s28 = sphi %s4471_s28, %s6825_s28   ;;  %s4403_s27 = sphi %s4469_s27, %s6824_s27  }
   0x4   : > { %s4494_s11 = sadd.s32 1, %s4415_s30   ;;  %s211_s12 = sadd.s32 1, %s4411_s29 }
   0x5   : > { %s208_s13 = ssub.s32 %s4415_s30, %s4494_s11  ;;  %p221_p0 = scmp.ne.s32.totalorder %s4411_s29, %s4407_s28 }
   0x6   : > { %p209_p1 = scmp.eq.s32.totalorder %s208_s13, 0  ;;  %p222_p2 = scmp.eq.s32.totalorder %s4490_s9, 1 }
   0x7   : > { %p227_p3 = scmp.ne.s32.totalorder %s4407_s28, %s4403_s27  ;;  %p228_p4 = scmp.eq.s32.totalorder %s3656_s10, 1 }
   0x8   : > { %s4505_s14 = scalar_select %p209_p1, %s4411_s29, %s211_s12  }
   0x9   : > { %p4507_p5 = por %p222_p2, %p221_p0  ;;  %p4511_p6 = por %p228_p4, %p227_p3 }
   0xa   : > { %p3659_p7 = scmp.ge.s32.totalorder %s4415_s30, 1  ;;  %p288_p8 = scmp.lt.s32.totalorder %s4415_s30, 3 }
   0xc   : > { %p289_p9 = pnand %p3659_p7, %p288_p8 }
   0xe   : > { %292 = sbr.rel (%p289_p9) target bundleno = 3365 (0xd25), region = 52 }
  0x15   : > { %s3661_s17 = sshll.u32 %s4490_s9, 4  ;;  %vm379_vm0 = vcmask 195584   ;;  %vm845_vm1 = vcmask 261120   ;;  %vm1780_vm2 = vcmask 523264   ;;  %s4419_s13 = smov 64   ;;  %vm2991_vm3 = vcmask 39936  }
  0x16   : > { %p333_p10 = scmp.lt.s32.totalorder %s3661_s17, 31 }
  0x18   : > { %s6829_s17 = smov (!%p333_p10, %s3661_s17), 31 }
  0x19   : > { %s4518_s18 = sshll.u32 %s6829_s17, 3  ;;  %s4420_s17 = smov 96  }
  0x1a   : > { %s4524_s21 = scalar_lea.vmem %s6745_s0, %s4518_s18  ;;  %s5006_s20 = scalar_lea.vmem %s6747_s2, %s4518_s18 }
  0x1b   : > { %v363_v0 = vld [vmem:[%s4524_s21] sm:$0xff]  ;;  %v365_v1 = vld [vmem:[%s4524_s21 + $0x10] sm:$0xff]  ;;  %v364_v2 = vld [vmem:[%s4524_s21 + $0x8] sm:$0xff]  ;;  %s5057_s10 = scalar_lea.vmem %s6746_s1, %s4518_s18  ;;  %s4418_s18 = smov 32  }
  0x1c   : > { %v380_v3 = vsel %vm379_vm0, %v363_v0, 0.0  ;;  %v386_v4 = vsel %vm379_vm0, %v365_v1, 0.0  ;;  %v366_v5 = vld [vmem:[%s4524_s21 + $0x18] sm:$0xff]  ;;  %v383_v6 = vsel %vm379_vm0, %v364_v2, 0.0  ;;  %v367_v8 = vld [vmem:[%s4524_s21 + $0x20] sm:$0xff]  ;;  %v368_v9 = vld [vmem:[%s4524_s21 + $0x28] sm:$0xff] }
  0x1d   : > { %381 = vadd.xlane.f32.xlu0 %v380_v3  ;;  %387 = vadd.xlane.f32.xlu1 %v386_v4  ;;  %v389_v7 = vsel %vm379_vm0, %v366_v5, 0.0  ;;  %v392_v10 = vsel %vm379_vm0, %v367_v8, 0.0  ;;  %v395_v11 = vsel %vm379_vm0, %v368_v9, 0.0  ;;  %v4539_v12 = vld [vmem:[%s4524_s21 + $0x30] sm:$0xff]  ;;  %v4542_v13 = vld [vmem:[%s4524_s21 + $0x38] sm:$0xff]  ;;  %v4549_v16 = vld [vmem:[%s4524_s21 + $0x40] sm:$0xff] }
  0x1e   : > { %v398_v14 = vsel %vm379_vm0, %v4539_v12, 0.0  ;;  %v401_v15 = vsel %vm379_vm0, %v4542_v13, 0.0  ;;  %v4552_v17 = vld [vmem:[%s4524_s21 + $0x48] sm:$0xff]  ;;  %v404_v18 = vsel %vm379_vm0, %v4549_v16, 0.0  ;;  %v4559_v20 = vld [vmem:[%s4524_s21 + $0x50] sm:$0xff]  ;;  %v4562_v21 = vld [vmem:[%s4524_s21 + $0x58] sm:$0xff] }
  0x1f   : > { %v407_v19 = vsel %vm379_vm0, %v4552_v17, 0.0  ;;  %v410_v22 = vsel %vm379_vm0, %v4559_v20, 0.0  ;;  %v413_v23 = vsel %vm379_vm0, %v4562_v21, 0.0  ;;  %v4569_v24 = vld [vmem:[%s4524_s21 + $0x60] sm:$0xff]  ;;  %v4572_v25 = vld [vmem:[%s4524_s21 + $0x68] sm:$0xff]  ;;  %v4579_v28 = vld [vmem:[%s4524_s21 + $0x70] sm:$0xff] }
  0x20   : > { %v416_v26 = vsel %vm379_vm0, %v4569_v24, 0.0  ;;  %v419_v27 = vsel %vm379_vm0, %v4572_v25, 0.0  ;;  %v4582_v29 = vld [vmem:[%s4524_s21 + $0x78] sm:$0xff]  ;;  %v422_v30 = vsel %vm379_vm0, %v4579_v28, 0.0 }
  0x21   : > { %384 = vadd.xlane.f32.xlu0 %v383_v6  ;;  %390 = vadd.xlane.f32.xlu1 %v389_v7  ;;  %v425_v31 = vsel %vm379_vm0, %v4582_v29, 0.0 }
  0x25   : > { %393 = vadd.xlane.f32.xlu0 %v392_v10  ;;  %396 = vadd.xlane.f32.xlu1 %v395_v11 }
  0x29   : > { %399 = vadd.xlane.f32.xlu0 %v398_v14  ;;  %402 = vadd.xlane.f32.xlu1 %v401_v15 }
  0x2d   : > { %405 = vadd.xlane.f32.xlu0 %v404_v18  ;;  %408 = vadd.xlane.f32.xlu1 %v407_v19 }
  0x31   : > { %411 = vadd.xlane.f32.xlu0 %v410_v22  ;;  %414 = vadd.xlane.f32.xlu1 %v413_v23 }
  0x35   : > { %417 = vadd.xlane.f32.xlu0 %v416_v26  ;;  %420 = vadd.xlane.f32.xlu1 %v419_v27 }
  0x39   : > { %423 = vadd.xlane.f32.xlu0 %v422_v30  ;;  %426 = vadd.xlane.f32.xlu1 %v425_v31 }
  0xaa   : > { %v382_v32 = vpop.xlane.xlu0 %381  ;;  %v388_v33 = vpop.xlane.xlu1 %387 }
  0xab   : > { %v429_v34 = vmul.f32 0.041666668, %v382_v32  ;;  %v431_v35 = vmul.f32 0.041666668, %v388_v33 }
  0xad   : > { %v4588_v36 = vsub.f32 %v363_v0, %v429_v34  ;;  %v4590_v37 = vsub.f32 %v365_v1, %v431_v35 }
  0xae   : > { %v385_v38 = vpop.xlane.xlu0 %384  ;;  %v391_v39 = vpop.xlane.xlu1 %390 }
  0xaf   : > { %v430_v40 = vmul.f32 0.041666668, %v385_v38  ;;  %v432_v41 = vmul.f32 0.041666668, %v391_v39  ;;  %v461_v42 = vmul.f32 %v4588_v36, %v4588_v36  ;;  %v463_v43 = vmul.f32 %v4590_v37, %v4590_v37 }
  0xb1   : > { %v4596_v44 = vsub.f32 %v364_v2, %v430_v40  ;;  %v4598_v45 = vsub.f32 %v366_v5, %v432_v41  ;;  %v477_v46 = vsel %vm379_vm0, %v461_v42, 0.0  ;;  %v483_v49 = vsel %vm379_vm0, %v463_v43, 0.0 }
  0xb2   : > { %478 = vadd.xlane.f32.xlu0 %v477_v46  ;;  %v394_v47 = vpop.xlane.xlu0 %393  ;;  %v397_v48 = vpop.xlane.xlu1 %396 }
  0xb3   : > { %v433_v50 = vmul.f32 0.041666668, %v394_v47  ;;  %v434_v51 = vmul.f32 0.041666668, %v397_v48  ;;  %v462_v52 = vmul.f32 %v4596_v44, %v4596_v44  ;;  %v464_v53 = vmul.f32 %v4598_v45, %v4598_v45 }
  0xb5   : > { %v4606_v54 = vsub.f32 %v367_v8, %v433_v50  ;;  %v4608_v55 = vsub.f32 %v368_v9, %v434_v51  ;;  %v480_v56 = vsel %vm379_vm0, %v462_v52, 0.0  ;;  %v486_v59 = vsel %vm379_vm0, %v464_v53, 0.0  ;;  %v630_v53 = vld [vmem:[%s6749_s4 + $0x8] sm:$0xff] }
  0xb6   : > { %484 = vadd.xlane.f32.xlu0 %v483_v49  ;;  %481 = vadd.xlane.f32.xlu1 %v480_v56  ;;  %v400_v57 = vpop.xlane.xlu0 %399  ;;  %v403_v58 = vpop.xlane.xlu1 %402 }
  0xb7   : > { %v435_v60 = vmul.f32 0.041666668, %v400_v57  ;;  %v436_v61 = vmul.f32 0.041666668, %v403_v58  ;;  %v465_v62 = vmul.f32 %v4606_v54, %v4606_v54  ;;  %v466_v63 = vmul.f32 %v4608_v55, %v4608_v55  ;;  %v631_v57 = vld [vmem:[%s6749_s4 + $0x10] sm:$0xff] }
  0xb9   : > { %v4617_v0 = vsub.f32 %v4539_v12, %v435_v60  ;;  %v4620_v1 = vsub.f32 %v4542_v13, %v436_v61  ;;  %v489_v2 = vsel %vm379_vm0, %v465_v62, 0.0  ;;  %v492_v5 = vsel %vm379_vm0, %v466_v63, 0.0 }
  0xba   : > { %487 = vadd.xlane.f32.xlu1 %v486_v59  ;;  %490 = vadd.xlane.f32.xlu0 %v489_v2  ;;  %v406_v3 = vpop.xlane.xlu0 %405  ;;  %v409_v4 = vpop.xlane.xlu1 %408 }
  0xbb   : > { %v437_v6 = vmul.f32 0.041666668, %v406_v3  ;;  %v438_v7 = vmul.f32 0.041666668, %v409_v4  ;;  %v467_v8 = vmul.f32 %v4617_v0, %v4617_v0  ;;  %v468_v9 = vmul.f32 %v4620_v1, %v4620_v1 }
  0xbd   : > { %v4629_v10 = vsub.f32 %v4549_v16, %v437_v6  ;;  %v4632_v11 = vsub.f32 %v4552_v17, %v438_v7  ;;  %v495_v12 = vsel %vm379_vm0, %v467_v8, 0.0  ;;  %v498_v15 = vsel %vm379_vm0, %v468_v9, 0.0 }
  0xbe   : > { %493 = vadd.xlane.f32.xlu1 %v492_v5  ;;  %496 = vadd.xlane.f32.xlu0 %v495_v12  ;;  %v412_v13 = vpop.xlane.xlu0 %411  ;;  %v415_v14 = vpop.xlane.xlu1 %414 }
  0xbf   : > { %v439_v18 = vmul.f32 0.041666668, %v412_v13  ;;  %v440_v19 = vmul.f32 0.041666668, %v415_v14  ;;  %v469_v22 = vmul.f32 %v4629_v10, %v4629_v10  ;;  %v470_v16 = vmul.f32 %v4632_v11, %v4632_v11 }
  0xc1   : > { %v4641_v23 = vsub.f32 %v4559_v20, %v439_v18  ;;  %v4644_v17 = vsub.f32 %v4562_v21, %v440_v19  ;;  %v501_v26 = vsel %vm379_vm0, %v469_v22, 0.0  ;;  %v504_v31 = vsel %vm379_vm0, %v470_v16, 0.0 }
  0xc2   : > { %499 = vadd.xlane.f32.xlu1 %v498_v15  ;;  %502 = vadd.xlane.f32.xlu0 %v501_v26  ;;  %v418_v27 = vpop.xlane.xlu0 %417  ;;  %v421_v30 = vpop.xlane.xlu1 %420  ;;  %v4690_v26 = vld [vmem:[%s6748_s3] ss:$0 sm:$0xff] }
  0xc3   : > { %v441_v32 = vmul.f32 0.041666668, %v418_v27  ;;  %v442_v33 = vmul.f32 0.041666668, %v421_v30  ;;  %v471_v34 = vmul.f32 %v4641_v23, %v4641_v23  ;;  %v472_v20 = vmul.f32 %v4644_v17, %v4644_v17 }
  0xc5   : > { %v4653_v35 = vsub.f32 %v4569_v24, %v441_v32  ;;  %v4656_v21 = vsub.f32 %v4572_v25, %v442_v33  ;;  %v507_v38 = vsel %vm379_vm0, %v471_v34, 0.0  ;;  %v510_v41 = vsel %vm379_vm0, %v472_v20, 0.0  ;;  %v4696_v34 = vld [vmem:[%s6748_s3 + $0x1] ss:$0 sm:$0xff] }
  0xc6   : > { %505 = vadd.xlane.f32.xlu1 %v504_v31  ;;  %508 = vadd.xlane.f32.xlu0 %v507_v38  ;;  %v424_v39 = vpop.xlane.xlu0 %423  ;;  %v427_v40 = vpop.xlane.xlu1 %426 }
  0xc7   : > { %v443_v42 = vmul.f32 0.041666668, %v424_v39  ;;  %v444_v43 = vmul.f32 0.041666668, %v427_v40  ;;  %v473_v46 = vmul.f32 %v4653_v35, %v4653_v35  ;;  %v474_v24 = vmul.f32 %v4656_v21, %v4656_v21 }
  0xc9   : > { %v4665_v47 = vsub.f32 %v4579_v28, %v443_v42  ;;  %v4668_v25 = vsub.f32 %v4582_v29, %v444_v43  ;;  %v513_v48 = vsel %vm379_vm0, %v473_v46, 0.0  ;;  %v516_v49 = vsel %vm379_vm0, %v474_v24, 0.0  ;;  %v629_v29 = vld [vmem:[%s6749_s4] sm:$0xff] }
  0xca   : > { %511 = vadd.xlane.f32.xlu1 %v510_v41  ;;  %514 = vadd.xlane.f32.xlu0 %v513_v48  ;;  %v3982_v56 = vpack.c.bf16 %v630_v53, %v629_v29 }
  0xcb   : > { %v475_v50 = vmul.f32 %v4665_v47, %v4665_v47  ;;  %v476_v51 = vmul.f32 %v4668_v25, %v4668_v25 }
  0xcc   : > { %3983 = vmatprep.subr.bf16.mxu0 %v3982_v56 }
  0xcd   : > { %v519_v52 = vsel %vm379_vm0, %v475_v50, 0.0  ;;  %v522_v28 = vsel %vm379_vm0, %v476_v51, 0.0  ;;  %3985 = vmatpush3.bf16.msra.mxu0 %v3982_v56 }
  0xce   : > { %517 = vadd.xlane.f32.xlu1 %v516_v49  ;;  %520 = vadd.xlane.f32.xlu0 %v519_v52 }
  0xcf   : > { %3852 = vmatprep.subr.mxu0 %v631_v57 }
  0xd1   : > { %3853 = vmatpush3.msra.mxu0 %v631_v57 }
  0xd2   : > { %523 = vadd.xlane.f32.xlu1 %v522_v28 }
 0x13f   : > { %v479_v58 = vpop.xlane.xlu0 %478 }
 0x140   : > { %v525_v59 = vmul.f32 0.041666668, %v479_v58 }
 0x142   : > { %v541_v60 = vadd.f32 1e-05, %v525_v59 }
 0x143   : > { %v482_v61 = vpop.xlane.xlu1 %481  ;;  %v485_v62 = vpop.xlane.xlu0 %484 }
 0x144   : > { %4065 = vrsqrt.f32 %v541_v60  ;;  %v526_v63 = vmul.f32 0.041666668, %v482_v61  ;;  %v527_v2 = vmul.f32 0.041666668, %v485_v62 }
 0x146   : > { %v542_v3 = vadd.f32 1e-05, %v526_v63  ;;  %v543_v4 = vadd.f32 1e-05, %v527_v2 }
 0x147   : > { %v488_v5 = vpop.xlane.xlu1 %487  ;;  %v491_v6 = vpop.xlane.xlu0 %490 }
 0x148   : > { %4067 = vrsqrt.f32 %v542_v3  ;;  %v528_v7 = vmul.f32 0.041666668, %v488_v5  ;;  %v529_v8 = vmul.f32 0.041666668, %v491_v6 }
 0x149   : > { %4069 = vrsqrt.f32 %v543_v4 }
 0x14a   : > { %v544_v9 = vadd.f32 1e-05, %v528_v7  ;;  %v545_v12 = vadd.f32 1e-05, %v529_v8 }
 0x14b   : > { %v494_v13 = vpop.xlane.xlu1 %493  ;;  %v497_v14 = vpop.xlane.xlu0 %496 }
 0x14c   : > { %4071 = vrsqrt.f32 %v544_v9  ;;  %v530_v15 = vmul.f32 0.041666668, %v494_v13  ;;  %v531_v18 = vmul.f32 0.041666668, %v497_v14 }
 0x14d   : > { %4073 = vrsqrt.f32 %v545_v12 }
 0x14e   : > { %v4066_v19 = vpop.eup %4065  ;;  %v546_v22 = vadd.f32 1e-05, %v530_v15  ;;  %v547_v16 = vadd.f32 1e-05, %v531_v18 }
 0x14f   : > { %v500_v27 = vpop.xlane.xlu1 %499  ;;  %v503_v30 = vpop.xlane.xlu0 %502  ;;  %v573_v31 = vmul.f32 %v4066_v19, %v4588_v36 }
 0x150   : > { %4075 = vrsqrt.f32 %v546_v22  ;;  %v532_v32 = vmul.f32 0.041666668, %v500_v27  ;;  %v533_v33 = vmul.f32 0.041666668, %v503_v30 }
 0x151   : > { %4077 = vrsqrt.f32 %v547_v16  ;;  %v593_v20 = vmul.f32 %v4690_v26, %v573_v31 }
 0x152   : > { %v4068_v38 = vpop.eup %4067  ;;  %v548_v39 = vadd.f32 1e-05, %v532_v32  ;;  %v549_v40 = vadd.f32 1e-05, %v533_v33 }
 0x153   : > { %v4070_v41 = vpop.eup %4069  ;;  %v506_v42 = vpop.xlane.xlu1 %505  ;;  %v613_v46 = vadd.f32 %v4696_v34, %v593_v20  ;;  %v574_v36 = vmul.f32 %v4068_v38, %v4596_v44 }
 0x154   : > { %v509_v43 = vpop.xlane.xlu0 %508  ;;  %4079 = vrsqrt.f32 %v548_v39  ;;  %v534_v24 = vmul.f32 0.041666668, %v506_v42  ;;  %v575_v49 = vmul.f32 %v4070_v41, %v4590_v37 }
 0x155   : > { %v535_v48 = vmul.f32 0.041666668, %v509_v43  ;;  %4081 = vrsqrt.f32 %v549_v40  ;;  %3854 = vmatprep.mubr.msk.f32.mxu0 %vm379_vm0, %v613_v46  ;;  %v594_v50 = vmul.f32 %v4690_v26, %v574_v36 }
 0x156   : > { %v4072_v51 = vpop.eup %4071  ;;  %v550_v52 = vadd.f32 1e-05, %v534_v24  ;;  %v595_v29 = vmul.f32 %v4690_v26, %v575_v49 }
 0x157   : > { %v551_v28 = vadd.f32 1e-05, %v535_v48  ;;  %v4074_v53 = vpop.eup %4073  ;;  %v512_v56 = vpop.xlane.xlu1 %511  ;;  %v614_v44 = vadd.f32 %v4696_v34, %v594_v50  ;;  %v576_v58 = vmul.f32 %v4072_v51, %v4598_v45 }
 0x158   : > { %v515_v57 = vpop.xlane.xlu0 %514  ;;  %4083 = vrsqrt.f32 %v550_v52  ;;  %v536_v59 = vmul.f32 0.041666668, %v512_v56  ;;  %v615_v60 = vadd.f32 %v4696_v34, %v595_v29  ;;  %v577_v62 = vmul.f32 %v4074_v53, %v4606_v54 }
 0x159   : > { %v537_v37 = vmul.f32 0.041666668, %v515_v57  ;;  %4085 = vrsqrt.f32 %v551_v28  ;;  %3855 = vmatmul.mubr.msk.f32.vlgmr.msra.gmra.mrb[0].mxu0 %vm379_vm0, %v614_v44  ;;  %v596_v61 = vmul.f32 %v4690_v26, %v576_v58 }
 0x15a   : > { %v4076_v63 = vpop.eup %4075  ;;  %v552_v2 = vadd.f32 1e-05, %v536_v59  ;;  %3857 = vmatprep.mubr.msk.f32.mxu0 %vm379_vm0, %v615_v60  ;;  %v597_v7 = vmul.f32 %v4690_v26, %v577_v62  ;;  %v4764_v60 = vld [vmem:[%s6748_s3 + $0x2] ss:$0 sm:$0xff] }
 0x15b   : > { %v553_v3 = vadd.f32 1e-05, %v537_v37  ;;  %v4078_v4 = vpop.eup %4077  ;;  %v518_v5 = vpop.xlane.xlu1 %517  ;;  %v616_v6 = vadd.f32 %v4696_v34, %v596_v61  ;;  %v578_v8 = vmul.f32 %v4076_v63, %v4608_v55 }
 0x15c   : > { %v521_v45 = vpop.xlane.xlu0 %520  ;;  %4087 = vrsqrt.f32 %v552_v2  ;;  %v538_v9 = vmul.f32 0.041666668, %v518_v5  ;;  %v579_v13 = vmul.f32 %v4078_v4, %v4617_v0  ;;  %v617_v54 = vadd.f32 %v4696_v34, %v597_v7 }
 0x15d   : > { %v539_v12 = vmul.f32 0.041666668, %v521_v45  ;;  %4089 = vrsqrt.f32 %v553_v3  ;;  %3858 = vmatmul.mubr.msk.f32.gmra.mrb[2].mxu0 %vm379_vm0, %v616_v6  ;;  %v598_v14 = vmul.f32 %v4690_v26, %v578_v8 }
 0x15e   : > { %v4080_v15 = vpop.eup %4079  ;;  %v554_v18 = vadd.f32 1e-05, %v538_v9  ;;  %v599_v22 = vmul.f32 %v4690_v26, %v579_v13  ;;  %3860 = vmatprep.mubr.msk.f32.mxu0 %vm379_vm0, %v617_v54 }
 0x15f   : > { %v555_v19 = vadd.f32 1e-05, %v539_v12  ;;  %v4082_v16 = vpop.eup %4081  ;;  %v524_v55 = vpop.xlane.xlu1 %523  ;;  %v618_v27 = vadd.f32 %v4696_v34, %v598_v14  ;;  %v580_v0 = vmul.f32 %v4080_v15, %v4620_v1 }
 0x160   : > { %4091 = vrsqrt.f32 %v554_v18  ;;  %v540_v30 = vmul.f32 0.041666668, %v524_v55  ;;  %v619_v31 = vadd.f32 %v4696_v34, %v599_v22  ;;  %v581_v32 = vmul.f32 %v4082_v16, %v4629_v10 }
 0x161   : > { %4093 = vrsqrt.f32 %v555_v19  ;;  %3861 = vmatmul.mubr.msk.f32.gmra.mrb[4].mxu0 %vm379_vm0, %v618_v27  ;;  %v600_v33 = vmul.f32 %v4690_v26, %v580_v0 }
 0x162   : > { %v4084_v20 = vpop.eup %4083  ;;  %v556_v38 = vadd.f32 1e-05, %v540_v30  ;;  %3863 = vmatprep.mubr.msk.f32.mxu0 %vm379_vm0, %v619_v31  ;;  %v601_v39 = vmul.f32 %v4690_v26, %v581_v32 }
 0x163   : > { %v4086_v40 = vpop.eup %4085  ;;  %v620_v1 = vadd.f32 %v4696_v34, %v600_v33  ;;  %v582_v41 = vmul.f32 %v4084_v20, %v4632_v11 }
 0x164   : > { %4095 = vrsqrt.f32 %v556_v38  ;;  %v621_v42 = vadd.f32 %v4696_v34, %v601_v39  ;;  %v583_v10 = vmul.f32 %v4086_v40, %v4641_v23 }
 0x165   : > { %3864 = vmatmul.mubr.msk.f32.gmra.mrb[6].mxu0 %vm379_vm0, %v620_v1  ;;  %v602_v43 = vmul.f32 %v4690_v26, %v582_v41 }
 0x166   : > { %v4088_v46 = vpop.eup %4087  ;;  %3866 = vmatprep.mubr.msk.f32.mxu0 %vm379_vm0, %v621_v42  ;;  %v603_v36 = vmul.f32 %v4690_v26, %v583_v10 }
 0x167   : > { %v4090_v24 = vpop.eup %4089  ;;  %v622_v48 = vadd.f32 %v4696_v34, %v602_v43  ;;  %v584_v49 = vmul.f32 %v4088_v46, %v4644_v17 }
 0x168   : > { %v623_v11 = vadd.f32 %v4696_v34, %v603_v36  ;;  %v585_v50 = vmul.f32 %v4090_v24, %v4653_v35 }
 0x169   : > { %3867 = vmatmul.mubr.msk.f32.gmra.mrb[8].mxu0 %vm379_vm0, %v622_v48  ;;  %v604_v23 = vmul.f32 %v4690_v26, %v584_v49 }
 0x16a   : > { %v4092_v51 = vpop.eup %4091  ;;  %3869 = vmatprep.mubr.msk.f32.mxu0 %vm379_vm0, %v623_v11  ;;  %v605_v52 = vmul.f32 %v4690_v26, %v585_v50 }
 0x16b   : > { %v4094_v28 = vpop.eup %4093  ;;  %v624_v29 = vadd.f32 %v4696_v34, %v604_v23  ;;  %v586_v53 = vmul.f32 %v4092_v51, %v4656_v21 }
 0x16c   : > { %v625_v17 = vadd.f32 %v4696_v34, %v605_v52  ;;  %v587_v56 = vmul.f32 %v4094_v28, %v4665_v47 }
 0x16d   : > { %3870 = vmatmul.mubr.msk.f32.gmra.mrb[10].mxu0 %vm379_vm0, %v624_v29  ;;  %v606_v35 = vmul.f32 %v4690_v26, %v586_v53 }
 0x16e   : > { %v4096_v57 = vpop.eup %4095  ;;  %3872 = vmatprep.mubr.msk.f32.mxu0 %vm379_vm0, %v625_v17  ;;  %v607_v44 = vmul.f32 %v4690_v26, %v587_v56 }
 0x16f   : > { %v626_v58 = vadd.f32 %v4696_v34, %v606_v35  ;;  %v588_v59 = vmul.f32 %v4096_v57, %v4668_v25 }
 0x170   : > { %v627_v37 = vadd.f32 %v4696_v34, %v607_v44 }
 0x171   : > { %3873 = vmatmul.mubr.msk.f32.gmra.mrb[12].mxu0 %vm379_vm0, %v626_v58  ;;  %v608_v21 = vmul.f32 %v4690_v26, %v588_v59 }
 0x172   : > { %3875 = vmatprep.mubr.msk.f32.mxu0 %vm379_vm0, %v627_v37 }
 0x173   : > { %v628_v47 = vadd.f32 %v4696_v34, %v608_v21 }
 0x175   : > { %3876 = vmatmul.mubr.msk.f32.gmra.mrb[14].mxu0 %vm379_vm0, %v628_v47 }
 0x22c   : > { %v3856_v61 = vpop.f32.mrb[0].mxu0 }
 0x22d   : > { %v4767_v25 = vadd.f32 %v3856_v61, %v4764_v60  ;;  %v750_v62 = vpop.f32.mrb[1].mxu0 }
 0x22e   : > { %v4770_v63 = vadd.f32 %v4764_v60, %v750_v62 }
 0x22f   : > { %v830_v26 = vmax.f32 %v4767_v25, 0.0 }
 0x230   : > { %v829_v34 = vmax.f32 %v4770_v63, 0.0  ;;  %v3859_v2 = vpop.f32.mrb[2].mxu0 }
 0x231   : > { %v4775_v3 = vadd.f32 %v3859_v2, %v4764_v60  ;;  %v760_v4 = vpop.f32.mrb[3].mxu0  ;;  %v849_v5 = vsel %vm845_vm1, %v830_v26, 0.0 }
 0x232   : > { %v4781_v45 = vadd.f32 %v4764_v60, %v760_v4  ;;  %850 = vadd.xlane.f32.xlu1 %v849_v5  ;;  %v846_v6 = vsel %vm845_vm1, %v829_v34, 0.0 }
 0x233   : > { %v832_v7 = vmax.f32 %v4775_v3, 0.0  ;;  %847 = vadd.xlane.f32.xlu0 %v846_v6 }
 0x234   : > { %v831_v8 = vmax.f32 %v4781_v45, 0.0  ;;  %v3862_v9 = vpop.f32.mrb[4].mxu0 }
 0x235   : > { %v4789_v12 = vadd.f32 %v3862_v9, %v4764_v60  ;;  %v770_v13 = vpop.f32.mrb[5].mxu0  ;;  %v855_v54 = vsel %vm845_vm1, %v832_v7, 0.0 }
 0x236   : > { %v4795_v14 = vadd.f32 %v4764_v60, %v770_v13  ;;  %856 = vadd.xlane.f32.xlu1 %v855_v54  ;;  %v852_v15 = vsel %vm845_vm1, %v831_v8, 0.0 }
 0x237   : > { %v834_v18 = vmax.f32 %v4789_v12, 0.0  ;;  %853 = vadd.xlane.f32.xlu0 %v852_v15 }
 0x238   : > { %v833_v19 = vmax.f32 %v4795_v14, 0.0  ;;  %v3865_v22 = vpop.f32.mrb[6].mxu0 }
 0x239   : > { %v4803_v16 = vadd.f32 %v3865_v22, %v4764_v60  ;;  %v780_v55 = vpop.f32.mrb[7].mxu0  ;;  %v861_v27 = vsel %vm845_vm1, %v834_v18, 0.0 }
 0x23a   : > { %v4809_v0 = vadd.f32 %v4764_v60, %v780_v55  ;;  %862 = vadd.xlane.f32.xlu1 %v861_v27  ;;  %v858_v30 = vsel %vm845_vm1, %v833_v19, 0.0 }
 0x23b   : > { %v836_v31 = vmax.f32 %v4803_v16, 0.0  ;;  %859 = vadd.xlane.f32.xlu0 %v858_v30 }
 0x23c   : > { %v835_v32 = vmax.f32 %v4809_v0, 0.0  ;;  %v3868_v33 = vpop.f32.mrb[8].mxu0 }
 0x23d   : > { %v4817_v20 = vadd.f32 %v3868_v33, %v4764_v60  ;;  %v790_v38 = vpop.f32.mrb[9].mxu0  ;;  %v867_v39 = vsel %vm845_vm1, %v836_v31, 0.0 }
 0x23e   : > { %v4823_v40 = vadd.f32 %v4764_v60, %v790_v38  ;;  %868 = vadd.xlane.f32.xlu1 %v867_v39  ;;  %v864_v1 = vsel %vm845_vm1, %v835_v32, 0.0 }
 0x23f   : > { %v838_v41 = vmax.f32 %v4817_v20, 0.0  ;;  %865 = vadd.xlane.f32.xlu0 %v864_v1 }
 0x240   : > { %v837_v42 = vmax.f32 %v4823_v40, 0.0  ;;  %v3871_v10 = vpop.f32.mrb[10].mxu0 }
 0x241   : > { %v4831_v43 = vadd.f32 %v3871_v10, %v4764_v60  ;;  %v800_v46 = vpop.f32.mrb[11].mxu0  ;;  %v873_v36 = vsel %vm845_vm1, %v838_v41, 0.0 }
 0x242   : > { %v4837_v24 = vadd.f32 %v4764_v60, %v800_v46  ;;  %874 = vadd.xlane.f32.xlu1 %v873_v36  ;;  %v870_v48 = vsel %vm845_vm1, %v837_v42, 0.0 }
 0x243   : > { %v840_v49 = vmax.f32 %v4831_v43, 0.0  ;;  %871 = vadd.xlane.f32.xlu0 %v870_v48 }
 0x244   : > { %v839_v11 = vmax.f32 %v4837_v24, 0.0  ;;  %v3874_v50 = vpop.f32.mrb[12].mxu0 }
 0x245   : > { %v4845_v23 = vadd.f32 %v3874_v50, %v4764_v60  ;;  %v810_v51 = vpop.f32.mrb[13].mxu0  ;;  %v879_v52 = vsel %vm845_vm1, %v840_v49, 0.0 }
 0x246   : > { %v4851_v28 = vadd.f32 %v4764_v60, %v810_v51  ;;  %880 = vadd.xlane.f32.xlu1 %v879_v52  ;;  %v876_v29 = vsel %vm845_vm1, %v839_v11, 0.0 }
 0x247   : > { %v842_v53 = vmax.f32 %v4845_v23, 0.0  ;;  %877 = vadd.xlane.f32.xlu0 %v876_v29 }
 0x248   : > { %v841_v17 = vmax.f32 %v4851_v28, 0.0  ;;  %v3877_v56 = vpop.f32.mrb[14].mxu0 }
 0x249   : > { %v4859_v35 = vadd.f32 %v3877_v56, %v4764_v60  ;;  %v820_v57 = vpop.f32.mrb[15].mxu0  ;;  %v885_v44 = vsel %vm845_vm1, %v842_v53, 0.0 }
 0x24a   : > { %v4865_v58 = vadd.f32 %v4764_v60, %v820_v57  ;;  %886 = vadd.xlane.f32.xlu1 %v885_v44  ;;  %v882_v59 = vsel %vm845_vm1, %v841_v17, 0.0 }
 0x24b   : > { %v844_v37 = vmax.f32 %v4859_v35, 0.0  ;;  %883 = vadd.xlane.f32.xlu0 %v882_v59 }
 0x24c   : > { %v843_v21 = vmax.f32 %v4865_v58, 0.0  ;;  %v1095_v58 = vld [vmem:[%s6750_s5] sm:$0xff] }
 0x24d   : > { %v891_v47 = vsel %vm845_vm1, %v844_v37, 0.0 }
 0x24e   : > { %892 = vadd.xlane.f32.xlu1 %v891_v47  ;;  %v888_v60 = vsel %vm845_vm1, %v843_v21, 0.0 }
 0x24f   : > { %889 = vadd.xlane.f32.xlu0 %v888_v60 }
 0x2bf   : > { %v851_v61 = vpop.xlane.xlu1 %850 }
 0x2c0   : > { %v896_v62 = vmul.f32 0.03125, %v851_v61  ;;  %v848_v2 = vpop.xlane.xlu0 %847 }
 0x2c1   : > { %v895_v4 = vmul.f32 0.03125, %v848_v2 }
 0x2c2   : > { %v4880_v5 = vsub.f32 %v830_v26, %v896_v62 }
 0x2c3   : > { %v4884_v6 = vsub.f32 %v829_v34, %v895_v4  ;;  %v857_v9 = vpop.xlane.xlu1 %856 }
 0x2c4   : > { %v898_v13 = vmul.f32 0.03125, %v857_v9  ;;  %v854_v54 = vpop.xlane.xlu0 %853  ;;  %v928_v15 = vmul.f32 %v4880_v5, %v4880_v5 }
 0x2c5   : > { %v897_v22 = vmul.f32 0.03125, %v854_v54  ;;  %v927_v55 = vmul.f32 %v4884_v6, %v4884_v6 }
 0x2c6   : > { %v4892_v27 = vsub.f32 %v832_v7, %v898_v13  ;;  %v946_v25 = vsel %vm845_vm1, %v928_v15, 0.0 }
 0x2c7   : > { %v4897_v63 = vsub.f32 %v831_v8, %v897_v22  ;;  %v863_v26 = vpop.xlane.xlu1 %862  ;;  %947 = vadd.xlane.f32.xlu1 %v946_v25  ;;  %v943_v34 = vsel %vm845_vm1, %v927_v55, 0.0 }
 0x2c8   : > { %v900_v30 = vmul.f32 0.03125, %v863_v26  ;;  %944 = vadd.xlane.f32.xlu0 %v943_v34  ;;  %v860_v33 = vpop.xlane.xlu0 %859  ;;  %v930_v38 = vmul.f32 %v4892_v27, %v4892_v27 }
 0x2c9   : > { %v899_v39 = vmul.f32 0.03125, %v860_v33  ;;  %v929_v3 = vmul.f32 %v4897_v63, %v4897_v63 }
 0x2ca   : > { %v4906_v7 = vsub.f32 %v834_v18, %v900_v30  ;;  %v952_v45 = vsel %vm845_vm1, %v930_v38, 0.0 }
 0x2cb   : > { %v4911_v8 = vsub.f32 %v833_v19, %v899_v39  ;;  %v869_v1 = vpop.xlane.xlu1 %868  ;;  %953 = vadd.xlane.f32.xlu1 %v952_v45  ;;  %v949_v10 = vsel %vm845_vm1, %v929_v3, 0.0 }
 0x2cc   : > { %v902_v46 = vmul.f32 0.03125, %v869_v1  ;;  %950 = vadd.xlane.f32.xlu0 %v949_v10  ;;  %v866_v36 = vpop.xlane.xlu0 %865  ;;  %v932_v48 = vmul.f32 %v4906_v7, %v4906_v7  ;;  %v1097_v10 = vld [vmem:[%s6750_s5 + $0x10] sm:$0xff] }
 0x2cd   : > { %v901_v50 = vmul.f32 0.03125, %v866_v36  ;;  %v931_v12 = vmul.f32 %v4911_v8, %v4911_v8 }
 0x2ce   : > { %v4920_v18 = vsub.f32 %v836_v31, %v902_v46  ;;  %v958_v14 = vsel %vm845_vm1, %v932_v48, 0.0  ;;  %v1098_v46 = vld [vmem:[%s6750_s5 + $0x18] sm:$0xff]  ;;  %v1577_v48 = vld [vmem:[%s5006_s20 + $0x8] sm:$0xff] }
 0x2cf   : > { %v4925_v19 = vsub.f32 %v835_v32, %v901_v50  ;;  %v875_v51 = vpop.xlane.xlu1 %874  ;;  %959 = vadd.xlane.f32.xlu1 %v958_v14  ;;  %v955_v52 = vsel %vm845_vm1, %v931_v12, 0.0  ;;  %v3990_v36 = vpack.c.bf16 %v1098_v46, %v1097_v10  ;;  %v1578_v50 = vld [vmem:[%s5006_s20 + $0x10] sm:$0xff]  ;;  %v1576_v12 = vld [vmem:[%s5006_s20] sm:$0xff]  ;;  %v1579_v14 = vld [vmem:[%s5006_s20 + $0x18] sm:$0xff] }
 0x2d0   : > { %v904_v29 = vmul.f32 0.03125, %v875_v51  ;;  %956 = vadd.xlane.f32.xlu0 %v955_v52  ;;  %v872_v56 = vpop.xlane.xlu0 %871  ;;  %v934_v57 = vmul.f32 %v4920_v18, %v4920_v18  ;;  %v1580_v51 = vld [vmem:[%s5006_s20 + $0x20] sm:$0xff]  ;;  %v1581_v52 = vld [vmem:[%s5006_s20 + $0x28] sm:$0xff] }
 0x2d1   : > { %v903_v44 = vmul.f32 0.03125, %v872_v56  ;;  %v933_v16 = vmul.f32 %v4925_v19, %v4925_v19  ;;  %v1585_v56 = vld [vmem:[%s5006_s20 + $0x48] sm:$0xff] }
 0x2d2   : > { %v4934_v31 = vsub.f32 %v838_v41, %v904_v29  ;;  %v964_v0 = vsel %vm845_vm1, %v934_v57, 0.0  ;;  %v1582_v29 = vld [vmem:[%s5006_s20 + $0x30] sm:$0xff]  ;;  %v1583_v57 = vld [vmem:[%s5006_s20 + $0x38] sm:$0xff] }
 0x2d3   : > { %v4939_v32 = vsub.f32 %v837_v42, %v903_v44  ;;  %v881_v59 = vpop.xlane.xlu1 %880  ;;  %965 = vadd.xlane.f32.xlu1 %v964_v0  ;;  %v961_v47 = vsel %vm845_vm1, %v933_v16, 0.0  ;;  %v1587_v44 = vld [vmem:[%s5006_s20 + $0x58] sm:$0xff]  ;;  %v1584_v16 = vld [vmem:[%s5006_s20 + $0x40] sm:$0xff]  ;;  %v1589_v0 = vld [vmem:[%s5006_s20 + $0x68] sm:$0xff] }
 0x2d4   : > { %v906_v60 = vmul.f32 0.03125, %v881_v59  ;;  %962 = vadd.xlane.f32.xlu0 %v961_v47  ;;  %v878_v61 = vpop.xlane.xlu0 %877  ;;  %v936_v62 = vmul.f32 %v4934_v31, %v4934_v31  ;;  %v1586_v59 = vld [vmem:[%s5006_s20 + $0x50] sm:$0xff]  ;;  %v1591_v47 = vld [vmem:[%s5006_s20 + $0x78] sm:$0xff] }
 0x2d5   : > { %v905_v2 = vmul.f32 0.03125, %v878_v61  ;;  %v935_v20 = vmul.f32 %v4939_v32, %v4939_v32  ;;  %v1590_v61 = vld [vmem:[%s5006_s20 + $0x70] sm:$0xff] }
 0x2d6   : > { %v4948_v41 = vsub.f32 %v840_v49, %v906_v60  ;;  %v970_v40 = vsel %vm845_vm1, %v936_v62, 0.0  ;;  %v1588_v60 = vld [vmem:[%s5006_s20 + $0x60] sm:$0xff]  ;;  %s329_s20 = sand.u32 1, %s4407_s28  }
 0x2d7   : > { %v4953_v42 = vsub.f32 %v839_v11, %v905_v2  ;;  %v887_v4 = vpop.xlane.xlu1 %886  ;;  %971 = vadd.xlane.f32.xlu1 %v970_v40  ;;  %v967_v9 = vsel %vm845_vm1, %v935_v20, 0.0  ;;  %s3660_s21 = sshll.u32 %s329_s20, 7  ;;  %s6704_s26 = scalar_lea.sflag [#allocation3], %s329_s20 }
 0x2d8   : > { %v908_v13 = vmul.f32 0.03125, %v887_v4  ;;  %968 = vadd.xlane.f32.xlu0 %v967_v9  ;;  %v884_v54 = vpop.xlane.xlu0 %883  ;;  %v938_v15 = vmul.f32 %v4948_v41, %v4948_v41  ;;  %s6583_s22 = scalar_lea.vmem [#allocation2], %s3660_s21 }
 0x2d9   : > { %v907_v22 = vmul.f32 0.03125, %v884_v54  ;;  %v937_v43 = vmul.f32 %v4953_v42, %v4953_v42  ;;  %s3570_s23 = sshll.u32 %s6583_s22, 4  ;;  %s6695_s23 = int_to_ptr.vmem [resolvable:$true] %s3570_s23 }
 0x2da   : > { %v4962_v49 = vsub.f32 %v842_v53, %v908_v13  ;;  %v976_v24 = vsel %vm845_vm1, %v938_v15, 0.0  ;;  %v4417_v53 = vmov 0   ;;  %s4353_s12 = scalar_lea.vmem %s6695_s23, 2048 }
 0x2db   : > { %v4967_v11 = vsub.f32 %v841_v17, %v907_v22  ;;  %977 = vadd.xlane.f32.xlu1 %v976_v24  ;;  %v893_v55 = vpop.xlane.xlu1 %892  ;;  %v973_v25 = vsel %vm845_vm1, %v937_v43, 0.0  ;;  %4063 = vset.pattern.permute.xlu0 %v4417_v53  ;;  %p4354_p11 = scmp.ne.s32.totalorder %s6695_s23, %s4353_s12 }
 0x2dc   : > { %v910_v26 = vmul.f32 0.03125, %v893_v55  ;;  %974 = vadd.xlane.f32.xlu0 %v973_v25  ;;  %v890_v34 = vpop.xlane.xlu0 %889  ;;  %v940_v30 = vmul.f32 %v4962_v49, %v4962_v49  ;;  %4064 = vset.pattern.permute.xlu1 %v4417_v53 }
 0x2dd   : > { %v909_v33 = vmul.f32 0.03125, %v890_v34  ;;  %v939_v23 = vmul.f32 %v4967_v11, %v4967_v11  ;;  %p4355_p12 = pnand %p4354_p11, %p4507_p5 }
 0x2de   : > { %v4976_v28 = vsub.f32 %v844_v37, %v910_v26  ;;  %v982_v17 = vsel %vm845_vm1, %v940_v30, 0.0 }
 0x2df   : > { %v4981_v38 = vsub.f32 %v843_v21, %v909_v33  ;;  %983 = vadd.xlane.f32.xlu1 %v982_v17  ;;  %v979_v39 = vsel %vm845_vm1, %v939_v23, 0.0  ;;  %v1096_v21 = vld [vmem:[%s6750_s5 + $0x8] sm:$0xff]  ;;  %p4356_p13 = pneg %p4355_p12 }
 0x2e0   : > { %980 = vadd.xlane.f32.xlu0 %v979_v39  ;;  %v942_v3 = vmul.f32 %v4976_v28, %v4976_v28  ;;  %v3986_v1 = vpack.c.bf16 %v1096_v21, %v1095_v58 }
 0x2e1   : > { %v941_v45 = vmul.f32 %v4981_v38, %v4981_v38 }
 0x2e2   : > { %v988_v35 = vsel %vm845_vm1, %v942_v3, 0.0  ;;  %3987 = vmatprep.subr.bf16.mxu1 %v3986_v1 }
 0x2e3   : > { %989 = vadd.xlane.f32.xlu1 %v988_v35  ;;  %v985_v37 = vsel %vm845_vm1, %v941_v45, 0.0  ;;  %3989 = vmatpush3.bf16.msra.mxu1 %v3986_v1  ;;  %v5027_v35 = vld [vmem:[%s6748_s3 + $0x3] ss:$0 sm:$0xff] }
 0x2e4   : > { %986 = vadd.xlane.f32.xlu0 %v985_v37  ;;  %3991 = vmatprep.subr.bf16.mxu1 %v3990_v36 }
 0x2e7   : > { %3993 = vmatpush3.bf16.msra.mxu1 %v3990_v36 }
 0x2f4   : > { %1599 = vperm.xlu1 %4064, %v1577_v48  }
 0x2f8   : > { %1604 = vperm.xlu1 %4064, %v1578_v50   ;;  %v5034_v50 = vld [vmem:[%s6748_s3 + $0x4] ss:$0 sm:$0xff] }
 0x2fa   : > { %1594 = vperm.xlu0 %4063, %v1576_v12  }
 0x2fc   : > { %1609 = vperm.xlu1 %4064, %v1579_v14  }
 0x2fe   : > { %1639 = vperm.xlu0 %4063, %v1585_v56  }
 0x300   : > { %1614 = vperm.xlu1 %4064, %v1580_v51  }
 0x302   : > { %1649 = vperm.xlu0 %4063, %v1587_v44  }
 0x304   : > { %1619 = vperm.xlu1 %4064, %v1581_v52  }
 0x306   : > { %1659 = vperm.xlu0 %4063, %v1589_v0  }
 0x308   : > { %1624 = vperm.xlu1 %4064, %v1582_v29  }
 0x30a   : > { %1669 = vperm.xlu0 %4063, %v1591_v47  }
 0x30c   : > { %1629 = vperm.xlu1 %4064, %v1583_v57  }
 0x310   : > { %1634 = vperm.xlu1 %4064, %v1584_v16  }
 0x314   : > { %1644 = vperm.xlu1 %4064, %v1586_v59  }
 0x318   : > { %1654 = vperm.xlu1 %4064, %v1588_v60  }
 0x31c   : > { %1664 = vperm.xlu1 %4064, %v1590_v61  }
 0x354   : > { %v948_v62 = vpop.xlane.xlu1 %947 }
 0x355   : > { %v992_v2 = vmul.f32 0.03125, %v948_v62  ;;  %v945_v20 = vpop.xlane.xlu0 %944 }
 0x356   : > { %v991_v40 = vmul.f32 0.03125, %v945_v20 }
 0x357   : > { %v1008_v4 = vadd.f32 1e-05, %v992_v2 }
 0x358   : > { %v1007_v9 = vadd.f32 1e-05, %v991_v40  ;;  %v954_v13 = vpop.xlane.xlu1 %953 }
 0x359   : > { %4097 = vrsqrt.f32 %v1008_v4  ;;  %v994_v54 = vmul.f32 0.03125, %v954_v13  ;;  %v951_v15 = vpop.xlane.xlu0 %950 }
 0x35a   : > { %4099 = vrsqrt.f32 %v1007_v9  ;;  %v993_v22 = vmul.f32 0.03125, %v951_v15 }
 0x35b   : > { %v1010_v43 = vadd.f32 1e-05, %v994_v54 }
 0x35c   : > { %v1009_v24 = vadd.f32 1e-05, %v993_v22  ;;  %v960_v55 = vpop.xlane.xlu1 %959 }
 0x35d   : > { %4101 = vrsqrt.f32 %v1010_v43  ;;  %v996_v25 = vmul.f32 0.03125, %v960_v55  ;;  %v957_v26 = vpop.xlane.xlu0 %956 }
 0x35e   : > { %4103 = vrsqrt.f32 %v1009_v24  ;;  %v995_v34 = vmul.f32 0.03125, %v957_v26 }
 0x35f   : > { %v1012_v30 = vadd.f32 1e-05, %v996_v25 }
 0x360   : > { %v1011_v33 = vadd.f32 1e-05, %v995_v34  ;;  %v966_v23 = vpop.xlane.xlu1 %965 }
 0x361   : > { %4105 = vrsqrt.f32 %v1012_v30  ;;  %v998_v53 = vmul.f32 0.03125, %v966_v23  ;;  %v963_v17 = vpop.xlane.xlu0 %962 }
 0x362   : > { %4107 = vrsqrt.f32 %v1011_v33  ;;  %v997_v39 = vmul.f32 0.03125, %v963_v17 }
 0x363   : > { %v4098_v3 = vpop.eup %4097  ;;  %v1014_v45 = vadd.f32 1e-05, %v998_v53 }
 0x364   : > { %v4100_v37 = vpop.eup %4099  ;;  %v1013_v58 = vadd.f32 1e-05, %v997_v39  ;;  %v972_v21 = vpop.xlane.xlu1 %971  ;;  %v1040_v1 = vmul.f32 %v4098_v3, %v4880_v5 }
 0x365   : > { %4109 = vrsqrt.f32 %v1014_v45  ;;  %v1000_v10 = vmul.f32 0.03125, %v972_v21  ;;  %v969_v46 = vpop.xlane.xlu0 %968  ;;  %v1039_v36 = vmul.f32 %v4100_v37, %v4884_v6  ;;  %v1561_v45 = vld [vmem:[%s5057_s10 + $0x8] sm:$0xff] }
 0x366   : > { %4111 = vrsqrt.f32 %v1013_v58  ;;  %v999_v48 = vmul.f32 0.03125, %v969_v46  ;;  %v1060_v12 = vmul.f32 %v5027_v35, %v1040_v1 }
 0x367   : > { %v4102_v14 = vpop.eup %4101  ;;  %v1016_v51 = vadd.f32 1e-05, %v1000_v10  ;;  %v1059_v52 = vmul.f32 %v5027_v35, %v1039_v36 }
 0x368   : > { %v4104_v29 = vpop.eup %4103  ;;  %v1015_v5 = vadd.f32 1e-05, %v999_v48  ;;  %v978_v56 = vpop.xlane.xlu1 %977  ;;  %v1042_v57 = vmul.f32 %v4102_v14, %v4892_v27  ;;  %v1080_v47 = vadd.f32 %v5034_v50, %v1060_v12 }
 0x369   : > { %4113 = vrsqrt.f32 %v1016_v51  ;;  %v1002_v6 = vmul.f32 0.03125, %v978_v56  ;;  %v975_v44 = vpop.xlane.xlu0 %974  ;;  %v1079_v16 = vadd.f32 %v5034_v50, %v1059_v52  ;;  %v1041_v0 = vmul.f32 %v4104_v29, %v4897_v63  ;;  %v1562_v51 = vld [vmem:[%s5057_s10 + $0x10] sm:$0xff] }
 0x36a   : > { %4115 = vrsqrt.f32 %v1015_v5  ;;  %v1001_v59 = vmul.f32 0.03125, %v975_v44  ;;  %v1062_v60 = vmul.f32 %v5027_v35, %v1042_v57 }
 0x36b   : > { %v4106_v61 = vpop.eup %4105  ;;  %v1018_v62 = vadd.f32 1e-05, %v1002_v6  ;;  %3886 = vmatprep.mubr.msk.f32.mxu1 %vm845_vm1, %v1079_v16  ;;  %v1061_v2 = vmul.f32 %v5027_v35, %v1041_v0 }
 0x36c   : > { %v4108_v27 = vpop.eup %4107  ;;  %v1017_v20 = vadd.f32 1e-05, %v1001_v59  ;;  %v984_v40 = vpop.xlane.xlu1 %983  ;;  %3887 = vmatmul.mubr.msk.f32.vlgmr.msra.gmra.mrb[0].mxu1 %vm845_vm1, %v1080_v47  ;;  %v1044_v63 = vmul.f32 %v4106_v61, %v4906_v7  ;;  %v1082_v22 = vadd.f32 %v5034_v50, %v1062_v60  ;;  %v1563_v47 = vld [vmem:[%s5057_s10 + $0x18] sm:$0xff] }
 0x36d   : > { %4117 = vrsqrt.f32 %v1018_v62  ;;  %v1004_v4 = vmul.f32 0.03125, %v984_v40  ;;  %v981_v9 = vpop.xlane.xlu0 %980  ;;  %v1081_v13 = vadd.f32 %v5034_v50, %v1061_v2  ;;  %v1043_v54 = vmul.f32 %v4108_v27, %v4911_v8 }
 0x36e   : > { %4119 = vrsqrt.f32 %v1017_v20  ;;  %v1003_v15 = vmul.f32 0.03125, %v981_v9  ;;  %v1064_v43 = vmul.f32 %v5027_v35, %v1044_v63  ;;  %v1564_v9 = vld [vmem:[%s5057_s10 + $0x20] sm:$0xff] }
 0x36f   : > { %v4110_v24 = vpop.eup %4109  ;;  %v1020_v55 = vadd.f32 1e-05, %v1004_v4  ;;  %3889 = vmatprep.mubr.msk.f32.mxu1 %vm845_vm1, %v1081_v13  ;;  %v1063_v25 = vmul.f32 %v5027_v35, %v1043_v54 }
 0x370   : > { %v4112_v7 = vpop.eup %4111  ;;  %v1019_v8 = vadd.f32 1e-05, %v1003_v15  ;;  %v990_v26 = vpop.xlane.xlu1 %989  ;;  %3890 = vmatmul.mubr.msk.f32.gmra.mrb[2].mxu1 %vm845_vm1, %v1082_v22  ;;  %v1046_v34 = vmul.f32 %v4110_v24, %v4920_v18  ;;  %v1084_v39 = vadd.f32 %v5034_v50, %v1064_v43 }
 0x371   : > { %4121 = vrsqrt.f32 %v1020_v55  ;;  %v1006_v30 = vmul.f32 0.03125, %v990_v26  ;;  %v987_v33 = vpop.xlane.xlu0 %986  ;;  %v1083_v23 = vadd.f32 %v5034_v50, %v1063_v25  ;;  %v1045_v53 = vmul.f32 %v4112_v7, %v4925_v19  ;;  %v1565_v7 = vld [vmem:[%s5057_s10 + $0x28] sm:$0xff] }
 0x372   : > { %4123 = vrsqrt.f32 %v1019_v8  ;;  %v1005_v17 = vmul.f32 0.03125, %v987_v33  ;;  %v1066_v3 = vmul.f32 %v5027_v35, %v1046_v34 }
 0x373   : > { %v4114_v37 = vpop.eup %4113  ;;  %v1022_v58 = vadd.f32 1e-05, %v1006_v30  ;;  %3892 = vmatprep.mubr.msk.f32.mxu1 %vm845_vm1, %v1083_v23  ;;  %v1065_v18 = vmul.f32 %v5027_v35, %v1045_v53  ;;  %v1566_v30 = vld [vmem:[%s5057_s10 + $0x30] sm:$0xff]  ;;  %v1567_v23 = vld [vmem:[%s5057_s10 + $0x38] sm:$0xff] }
 0x374   : > { %v4116_v21 = vpop.eup %4115  ;;  %v1021_v1 = vadd.f32 1e-05, %v1005_v17  ;;  %3893 = vmatmul.mubr.msk.f32.gmra.mrb[4].mxu1 %vm845_vm1, %v1084_v39  ;;  %v1048_v19 = vmul.f32 %v4114_v37, %v4934_v31  ;;  %v1600_v10 = vpop.permute.xlu1 %1599  ;;  %v1086_v12 = vadd.f32 %v5034_v50, %v1066_v3  ;;  %v1560_v31 = vld [vmem:[%s5057_s10] sm:$0xff] }
 0x375   : > { %4125 = vrsqrt.f32 %v1022_v58  ;;  %v1085_v46 = vadd.f32 %v5034_v50, %v1065_v18  ;;  %v1047_v36 = vmul.f32 %v4116_v21, %v4939_v32  ;;  %v1673_v48 = vmul.f32 %v1600_v10, %v1561_v45  ;;  %v1568_v39 = vld [vmem:[%s5057_s10 + $0x40] sm:$0xff] }
 0x376   : > { %4127 = vrsqrt.f32 %v1021_v1  ;;  %v1068_v14 = vmul.f32 %v5027_v35, %v1048_v19 }
 0x377   : > { %v4118_v52 = vpop.eup %4117  ;;  %3895 = vmatprep.mubr.msk.f32.mxu1 %vm845_vm1, %v1085_v46  ;;  %v1067_v29 = vmul.f32 %v5027_v35, %v1047_v36  ;;  %1706 = vrot.lane.b32.xlu1 %v1673_v48, %s4418_s18 }
 0x378   : > { %v4120_v5 = vpop.eup %4119  ;;  %3896 = vmatmul.mubr.msk.f32.gmra.mrb[6].mxu1 %vm845_vm1, %v1086_v12  ;;  %v1050_v32 = vmul.f32 %v4118_v52, %v4948_v41  ;;  %v1605_v56 = vpop.permute.xlu1 %1604  ;;  %v1088_v0 = vadd.f32 %v5034_v50, %v1068_v14 }
 0x379   : > { %v1087_v57 = vadd.f32 %v5034_v50, %v1067_v29  ;;  %v1049_v6 = vmul.f32 %v4120_v5, %v4953_v42  ;;  %v1674_v44 = vmul.f32 %v1605_v56, %v1562_v51  ;;  %v1595_v16 = vpop.permute.xlu0 %1594 }
 0x37a   : > { %v1070_v59 = vmul.f32 %v5027_v35, %v1050_v32  ;;  %v1672_v60 = vmul.f32 %v1595_v16, %v1560_v31 }
 0x37b   : > { %v4122_v61 = vpop.eup %4121  ;;  %3898 = vmatprep.mubr.msk.f32.mxu1 %vm845_vm1, %v1087_v57  ;;  %v1069_v62 = vmul.f32 %v5027_v35, %v1049_v6  ;;  %1708 = vrot.lane.b32.xlu1 %v1674_v44, %s4418_s18 }
 0x37c   : > { %v4124_v41 = vpop.eup %4123  ;;  %3899 = vmatmul.mubr.msk.f32.gmra.mrb[8].mxu1 %vm845_vm1, %v1088_v0  ;;  %v1052_v42 = vmul.f32 %v4122_v61, %v4962_v49  ;;  %v1610_v2 = vpop.permute.xlu1 %1609  ;;  %1704 = vrot.lane.b32.xlu0 %v1672_v60, %s4418_s18  ;;  %v1090_v63 = vadd.f32 %v5034_v50, %v1070_v59 }
 0x37d   : > { %v1089_v27 = vadd.f32 %v5034_v50, %v1069_v62  ;;  %v1051_v20 = vmul.f32 %v4124_v41, %v4967_v11  ;;  %v1675_v40 = vmul.f32 %v1610_v2, %v1563_v47 }
 0x37e   : > { %v1072_v4 = vmul.f32 %v5027_v35, %v1052_v42 }
 0x37f   : > { %v4126_v13 = vpop.eup %4125  ;;  %3901 = vmatprep.mubr.msk.f32.mxu1 %vm845_vm1, %v1089_v27  ;;  %v1071_v54 = vmul.f32 %v5027_v35, %v1051_v20 }
 0x380   : > { %v4128_v49 = vpop.eup %4127  ;;  %3902 = vmatmul.mubr.msk.f32.gmra.mrb[10].mxu1 %vm845_vm1, %v1090_v63  ;;  %v1054_v15 = vmul.f32 %v4126_v13, %v4976_v28  ;;  %v1615_v22 = vpop.permute.xlu1 %1614  ;;  %1710 = vrot.lane.b32.xlu0 %v1675_v40, %s4418_s18  ;;  %v1092_v55 = vadd.f32 %v5034_v50, %v1072_v4 }
 0x381   : > { %v1091_v11 = vadd.f32 %v5034_v50, %v1071_v54  ;;  %v1053_v43 = vmul.f32 %v4128_v49, %v4981_v38  ;;  %v1676_v24 = vmul.f32 %v1615_v22, %v1564_v9 }
 0x382   : > { %v1074_v25 = vmul.f32 %v5027_v35, %v1054_v15 }
 0x383   : > { %3904 = vmatprep.mubr.msk.f32.mxu1 %vm845_vm1, %v1091_v11  ;;  %v1073_v8 = vmul.f32 %v5027_v35, %v1053_v43  ;;  %1712 = vrot.lane.b32.xlu1 %v1676_v24, %s4418_s18 }
 0x384   : > { %3905 = vmatmul.mubr.msk.f32.gmra.mrb[12].mxu1 %vm845_vm1, %v1092_v55  ;;  %v1620_v28 = vpop.permute.xlu1 %1619  ;;  %v1094_v34 = vadd.f32 %v5034_v50, %v1074_v25 }
 0x385   : > { %v1093_v26 = vadd.f32 %v5034_v50, %v1073_v8  ;;  %v1677_v38 = vmul.f32 %v1620_v28, %v1565_v7  ;;  %v5125_v50 = vld [vmem:[%s6748_s3 + $0x5] ss:$0 sm:$0xff] }
 0x387   : > { %3907 = vmatprep.mubr.msk.f32.mxu1 %vm845_vm1, %v1093_v26  ;;  %1714 = vrot.lane.b32.xlu0 %v1677_v38, %s4418_s18 }
 0x388   : > { %3908 = vmatmul.mubr.msk.f32.gmra.mrb[14].mxu1 %vm845_vm1, %v1094_v34  ;;  %v1625_v33 = vpop.permute.xlu1 %1624 }
 0x389   : > { %v1678_v35 = vmul.f32 %v1625_v33, %v1566_v30 }
 0x38b   : > { %1716 = vrot.lane.b32.xlu1 %v1678_v35, %s4418_s18 }
 0x38c   : > { %v1630_v53 = vpop.permute.xlu1 %1629 }
 0x38d   : > { %v1679_v17 = vmul.f32 %v1630_v53, %v1567_v23 }
 0x38f   : > { %1718 = vrot.lane.b32.xlu0 %v1679_v17, %s4418_s18 }
 0x390   : > { %v1635_v3 = vpop.permute.xlu1 %1634 }
 0x391   : > { %v1680_v45 = vmul.f32 %v1635_v3, %v1568_v39 }
 0x393   : > { %1720 = vrot.lane.b32.xlu1 %v1680_v45, %s4418_s18 }
 0x43f   : > { %v3888_v37 = vpop.f32.mrb[0].mxu1 }
 0x440   : > { %v5128_v58 = vadd.f32 %v3888_v37, %v5125_v50  ;;  %v1217_v18 = vpop.f32.mrb[1].mxu1  ;;  %v1570_v37 = vld [vmem:[%s5057_s10 + $0x50] sm:$0xff] }
 0x441   : > { %v5131_v21 = vadd.f32 %v5125_v50, %v1217_v18  ;;  %v1645_v18 = vpop.permute.xlu1 %1644 }
 0x442   : > { %v1297_v1 = vmax.f32 %v5128_v58, 0.0 }
 0x443   : > { %v1296_v19 = vmax.f32 %v5131_v21, 0.0  ;;  %v3891_v10 = vpop.f32.mrb[2].mxu1 }
 0x444   : > { %v5136_v46 = vadd.f32 %v3891_v10, %v5125_v50  ;;  %v1227_v36 = vpop.f32.mrb[3].mxu1  ;;  %v1315_v48 = vsel %vm845_vm1, %v1297_v1, 0.0  ;;  %v1682_v10 = vmul.f32 %v1645_v18, %v1570_v37 }
 0x445   : > { %v5142_v12 = vadd.f32 %v5125_v50, %v1227_v36  ;;  %1316 = vadd.xlane.f32.xlu1 %v1315_v48  ;;  %v1312_v14 = vsel %vm845_vm1, %v1296_v19, 0.0  ;;  %v1569_v36 = vld [vmem:[%s5057_s10 + $0x48] sm:$0xff]  ;;  %v1640_v48 = vpop.permute.xlu0 %1639 }
 0x446   : > { %v1299_v51 = vmax.f32 %v5136_v46, 0.0  ;;  %1313 = vadd.xlane.f32.xlu0 %v1312_v14  ;;  %v1681_v14 = vmul.f32 %v1640_v48, %v1569_v36 }
 0x447   : > { %v1298_v52 = vmax.f32 %v5142_v12, 0.0  ;;  %v3894_v29 = vpop.f32.mrb[4].mxu1 }
 0x448   : > { %v5150_v31 = vadd.f32 %v3894_v29, %v5125_v50  ;;  %v1237_v5 = vpop.f32.mrb[5].mxu1  ;;  %v1321_v32 = vsel %vm845_vm1, %v1299_v51, 0.0  ;;  %v1768_v29 = vld [vmem:[%s6751_s6] sm:$0xff] }
 0x449   : > { %v5156_v56 = vadd.f32 %v5125_v50, %v1237_v5  ;;  %1322 = vadd.xlane.f32.xlu1 %v1321_v32  ;;  %v1318_v57 = vsel %vm845_vm1, %v1298_v52, 0.0  ;;  %v1769_v5 = vld [vmem:[%s6751_s6 + $0x8] sm:$0xff]  ;;  %v1770_v32 = vld [vmem:[%s6751_s6 + $0x10] sm:$0xff] }
 0x44a   : > { %v1301_v6 = vmax.f32 %v5150_v31, 0.0  ;;  %1319 = vadd.xlane.f32.xlu0 %v1318_v57  ;;  %v3994_v57 = vpack.c.bf16 %v1769_v5, %v1768_v29 }
 0x44b   : > { %v1300_v44 = vmax.f32 %v5156_v56, 0.0  ;;  %v3897_v16 = vpop.f32.mrb[6].mxu1 }
 0x44c   : > { %v5164_v0 = vadd.f32 %v3897_v16, %v5125_v50  ;;  %v1247_v59 = vpop.f32.mrb[7].mxu1  ;;  %v1327_v47 = vsel %vm845_vm1, %v1301_v6, 0.0  ;;  %v1771_v16 = vld [vmem:[%s6751_s6 + $0x18] sm:$0xff]  ;;  %3995 = vmatprep.subr.bf16.mxu0 %v3994_v57 }
 0x44d   : > { %v5170_v60 = vadd.f32 %v5125_v50, %v1247_v59  ;;  %1328 = vadd.xlane.f32.xlu1 %v1327_v47  ;;  %v1324_v61 = vsel %vm845_vm1, %v1300_v44, 0.0  ;;  %v3998_v59 = vpack.c.bf16 %v1771_v16, %v1770_v32  ;;  %3997 = vmatpush3.bf16.msra.mxu0 %v3994_v57  ;;  %v5255_v47 = vpop.permute.xlu1 %1654 }
 0x44e   : > { %v1303_v62 = vmax.f32 %v5164_v0, 0.0  ;;  %1325 = vadd.xlane.f32.xlu0 %v1324_v61  ;;  %v5257_v61 = vpop.permute.xlu0 %1649 }
 0x44f   : > { %v1302_v41 = vmax.f32 %v5170_v60, 0.0  ;;  %v3900_v42 = vpop.f32.mrb[8].mxu1  ;;  %3999 = vmatprep.subr.bf16.mxu0 %v3998_v59 }
 0x450   : > { %v5178_v2 = vadd.f32 %v3900_v42, %v5125_v50  ;;  %v1257_v27 = vpop.f32.mrb[9].mxu1  ;;  %v1333_v20 = vsel %vm845_vm1, %v1303_v62, 0.0 }
 0x451   : > { %v5184_v40 = vadd.f32 %v5125_v50, %v1257_v27  ;;  %1334 = vadd.xlane.f32.xlu1 %v1333_v20  ;;  %v1330_v63 = vsel %vm845_vm1, %v1302_v41, 0.0  ;;  %4001 = vmatpush3.bf16.msra.mxu0 %v3998_v59  ;;  %v5259_v42 = vpop.permute.xlu1 %1664 }
 0x452   : > { %v1305_v4 = vmax.f32 %v5178_v2, 0.0  ;;  %1331 = vadd.xlane.f32.xlu0 %v1330_v63  ;;  %v5261_v27 = vpop.permute.xlu0 %1659 }
 0x453   : > { %v1304_v9 = vmax.f32 %v5184_v40, 0.0  ;;  %v3903_v13 = vpop.f32.mrb[10].mxu1 }
 0x454   : > { %v5192_v54 = vadd.f32 %v3903_v13, %v5125_v50  ;;  %v1267_v49 = vpop.f32.mrb[11].mxu1  ;;  %v1339_v15 = vsel %vm845_vm1, %v1305_v4, 0.0 }
 0x455   : > { %v5198_v22 = vadd.f32 %v5125_v50, %v1267_v49  ;;  %1340 = vadd.xlane.f32.xlu1 %v1339_v15  ;;  %v1336_v11 = vsel %vm845_vm1, %v1304_v9, 0.0  ;;  %v5263_v20 = vpop.permute.xlu1 %1706 }
 0x456   : > { %v1307_v43 = vmax.f32 %v5192_v54, 0.0  ;;  %1337 = vadd.xlane.f32.xlu0 %v1336_v11  ;;  %v5265_v63 = vpop.permute.xlu0 %1669 }
 0x457   : > { %v1306_v24 = vmax.f32 %v5198_v22, 0.0  ;;  %v3906_v55 = vpop.f32.mrb[12].mxu1 }
 0x458   : > { %v5206_v25 = vadd.f32 %v3906_v55, %v5125_v50  ;;  %v1277_v7 = vpop.f32.mrb[13].mxu1  ;;  %v1345_v8 = vsel %vm845_vm1, %v1307_v43, 0.0 }
 0x459   : > { %v5212_v28 = vadd.f32 %v5125_v50, %v1277_v7  ;;  %1346 = vadd.xlane.f32.xlu1 %v1345_v8  ;;  %v1342_v26 = vsel %vm845_vm1, %v1306_v24, 0.0  ;;  %v5267_v13 = vpop.permute.xlu1 %1708 }
 0x45a   : > { %v1309_v38 = vmax.f32 %v5206_v25, 0.0  ;;  %1343 = vadd.xlane.f32.xlu0 %v1342_v26  ;;  %v5269_v49 = vpop.permute.xlu0 %1704 }
 0x45b   : > { %v1308_v34 = vmax.f32 %v5212_v28, 0.0  ;;  %v3909_v30 = vpop.f32.mrb[14].mxu1 }
 0x45c   : > { %v5220_v33 = vadd.f32 %v3909_v30, %v5125_v50  ;;  %v1287_v35 = vpop.f32.mrb[15].mxu1  ;;  %v1351_v23 = vsel %vm845_vm1, %v1309_v38, 0.0 }
 0x45d   : > { %v5226_v53 = vadd.f32 %v5125_v50, %v1287_v35  ;;  %1352 = vadd.xlane.f32.xlu1 %v1351_v23  ;;  %v1348_v17 = vsel %vm845_vm1, %v1308_v34, 0.0  ;;  %v5271_v15 = vpop.permute.xlu1 %1712 }
 0x45e   : > { %v1311_v39 = vmax.f32 %v5220_v33, 0.0  ;;  %1349 = vadd.xlane.f32.xlu0 %v1348_v17  ;;  %v5273_v11 = vpop.permute.xlu0 %1710 }
 0x45f   : > { %v1310_v3 = vmax.f32 %v5226_v53, 0.0  ;;  %v1772_v53 = vld [vmem:[%s6751_s6 + $0x20] sm:$0xff] }
 0x460   : > { %v1357_v45 = vsel %vm845_vm1, %v1311_v39, 0.0 }
 0x461   : > { %1358 = vadd.xlane.f32.xlu1 %v1357_v45  ;;  %v1354_v50 = vsel %vm845_vm1, %v1310_v3, 0.0  ;;  %v5275_v55 = vpop.permute.xlu1 %1716 }
 0x462   : > { %1355 = vadd.xlane.f32.xlu0 %v1354_v50  ;;  %v5277_v7 = vpop.permute.xlu0 %1714 }
 0x465   : > { %v5279_v8 = vpop.permute.xlu1 %1720 }
 0x466   : > { %v5281_v26 = vpop.permute.xlu0 %1718 }
 0x472   : > { %1724 = vrot.lane.b32.xlu1 %v1682_v10, %s4418_s18 }
 0x478   : > { %1722 = vrot.lane.b32.xlu0 %v1681_v14, %s4418_s18 }
 0x4d2   : > { %v1317_v30 = vpop.xlane.xlu1 %1316 }
 0x4d3   : > { %v1361_v35 = vmul.f32 0.03125, %v1317_v30  ;;  %v1314_v23 = vpop.xlane.xlu0 %1313 }
 0x4d4   : > { %v1360_v17 = vmul.f32 0.03125, %v1314_v23 }
 0x4d5   : > { %v5285_v45 = vsub.f32 %v1297_v1, %v1361_v35 }
 0x4d6   : > { %v5289_v50 = vsub.f32 %v1296_v19, %v1360_v17  ;;  %v1323_v37 = vpop.xlane.xlu1 %1322 }
 0x4d7   : > { %v1363_v18 = vmul.f32 0.03125, %v1323_v37  ;;  %v1320_v10 = vpop.xlane.xlu0 %1319  ;;  %v1393_v36 = vmul.f32 %v5285_v45, %v5285_v45 }
 0x4d8   : > { %v1362_v48 = vmul.f32 0.03125, %v1320_v10  ;;  %v1392_v14 = vmul.f32 %v5289_v50, %v5289_v50 }
 0x4d9   : > { %v5297_v29 = vsub.f32 %v1299_v51, %v1363_v18  ;;  %v1411_v58 = vsel %vm845_vm1, %v1393_v36, 0.0 }
 0x4da   : > { %v5302_v21 = vsub.f32 %v1298_v52, %v1362_v48  ;;  %v1329_v1 = vpop.xlane.xlu1 %1328  ;;  %1412 = vadd.xlane.f32.xlu0 %v1411_v58  ;;  %v1408_v19 = vsel %vm845_vm1, %v1392_v14, 0.0 }
 0x4db   : > { %v1365_v5 = vmul.f32 0.03125, %v1329_v1  ;;  %1409 = vadd.xlane.f32.xlu1 %v1408_v19  ;;  %v1326_v32 = vpop.xlane.xlu0 %1325  ;;  %v1395_v57 = vmul.f32 %v5297_v29, %v5297_v29 }
 0x4dc   : > { %v1364_v16 = vmul.f32 0.03125, %v1326_v32  ;;  %v1394_v46 = vmul.f32 %v5302_v21, %v5302_v21 }
 0x4dd   : > { %v5311_v51 = vsub.f32 %v1301_v6, %v1365_v5  ;;  %v1417_v12 = vsel %vm845_vm1, %v1395_v57, 0.0 }
 0x4de   : > { %v5316_v52 = vsub.f32 %v1300_v44, %v1364_v16  ;;  %v1335_v59 = vpop.xlane.xlu1 %1334  ;;  %v1414_v30 = vsel %vm845_vm1, %v1394_v46, 0.0 }
 0x4df   : > { %v1367_v35 = vmul.f32 0.03125, %v1335_v59  ;;  %1418 = vadd.xlane.f32.xlu1 %v1417_v12  ;;  %1415 = vadd.xlane.f32.xlu0 %v1414_v30  ;;  %v1332_v23 = vpop.xlane.xlu0 %1331  ;;  %v1397_v17 = vmul.f32 %v5311_v51, %v5311_v51 }
 0x4e0   : > { %v1366_v37 = vmul.f32 0.03125, %v1332_v23  ;;  %v1396_v31 = vmul.f32 %v5316_v52, %v5316_v52 }
 0x4e1   : > { %v5325_v6 = vsub.f32 %v1303_v62, %v1367_v35  ;;  %v1423_v56 = vsel %vm845_vm1, %v1397_v17, 0.0 }
 0x4e2   : > { %v5330_v44 = vsub.f32 %v1302_v41, %v1366_v37  ;;  %v1341_v18 = vpop.xlane.xlu1 %1340  ;;  %v1420_v10 = vsel %vm845_vm1, %v1396_v31, 0.0 }
 0x4e3   : > { %v1369_v36 = vmul.f32 0.03125, %v1341_v18  ;;  %1424 = vadd.xlane.f32.xlu1 %v1423_v56  ;;  %1421 = vadd.xlane.f32.xlu0 %v1420_v10  ;;  %v1338_v48 = vpop.xlane.xlu0 %1337  ;;  %v1399_v14 = vmul.f32 %v5325_v6, %v5325_v6 }
 0x4e4   : > { %v1368_v58 = vmul.f32 0.03125, %v1338_v48  ;;  %v1398_v0 = vmul.f32 %v5330_v44, %v5330_v44 }
 0x4e5   : > { %v5339_v62 = vsub.f32 %v1305_v4, %v1369_v36  ;;  %v1429_v60 = vsel %vm845_vm1, %v1399_v14, 0.0 }
 0x4e6   : > { %v5344_v41 = vsub.f32 %v1304_v9, %v1368_v58  ;;  %v1347_v1 = vpop.xlane.xlu1 %1346  ;;  %v1426_v19 = vsel %vm845_vm1, %v1398_v0, 0.0  ;;  %v1774_v0 = vld [vmem:[%s6751_s6 + $0x30] sm:$0xff] }
 0x4e7   : > { %v1371_v5 = vmul.f32 0.03125, %v1347_v1  ;;  %1430 = vadd.xlane.f32.xlu1 %v1429_v60  ;;  %1427 = vadd.xlane.f32.xlu0 %v1426_v19  ;;  %v1344_v32 = vpop.xlane.xlu0 %1343  ;;  %v1401_v57 = vmul.f32 %v5339_v62, %v5339_v62  ;;  %v1775_v60 = vld [vmem:[%s6751_s6 + $0x38] sm:$0xff]  ;;  %v1572_v19 = vld [vmem:[%s5057_s10 + $0x60] sm:$0xff] }
 0x4e8   : > { %v1370_v16 = vmul.f32 0.03125, %v1344_v32  ;;  %v1400_v2 = vmul.f32 %v5344_v41, %v5344_v41  ;;  %v4006_v1 = vpack.c.bf16 %v1775_v60, %v1774_v0  ;;  %v1574_v32 = vld [vmem:[%s5057_s10 + $0x70] sm:$0xff] }
 0x4e9   : > { %v5353_v4 = vsub.f32 %v1307_v43, %v1371_v5  ;;  %v1435_v40 = vsel %vm845_vm1, %v1401_v57, 0.0  ;;  %v1684_v5 = vmul.f32 %v5255_v47, %v1572_v19  ;;  %v1571_v57 = vld [vmem:[%s5057_s10 + $0x58] sm:$0xff] }
 0x4ea   : > { %v5358_v9 = vsub.f32 %v1306_v24, %v1370_v16  ;;  %v1353_v46 = vpop.xlane.xlu1 %1352  ;;  %v1432_v12 = vsel %vm845_vm1, %v1400_v2, 0.0  ;;  %v1686_v16 = vmul.f32 %v5259_v42, %v1574_v32  ;;  %v1683_v2 = vmul.f32 %v5257_v61, %v1571_v57  ;;  %v5435_v57 = vld [vmem:[%s6748_s3 + $0x7] ss:$0 sm:$0xff] }
 0x4eb   : > { %v1373_v59 = vmul.f32 0.03125, %v1353_v46  ;;  %1436 = vadd.xlane.f32.xlu1 %v1435_v40  ;;  %1433 = vadd.xlane.f32.xlu0 %v1432_v12  ;;  %v1350_v30 = vpop.xlane.xlu0 %1349  ;;  %v1403_v35 = vmul.f32 %v5353_v4, %v5353_v4  ;;  %v1573_v40 = vld [vmem:[%s5057_s10 + $0x68] sm:$0xff]  ;;  %v1575_v12 = vld [vmem:[%s5057_s10 + $0x78] sm:$0xff]  ;;  %s3764_s10 = sshll.u32 %s4490_s9, 11 }
 0x4ec   : > { %v1372_v23 = vmul.f32 0.03125, %v1350_v30  ;;  %v1402_v54 = vmul.f32 %v5358_v9, %v5358_v9  ;;  %v1685_v46 = vmul.f32 %v5261_v27, %v1573_v40  ;;  %v1687_v47 = vmul.f32 %v5265_v63, %v1575_v12  ;;  %s6693_s25 = scalar_lea.hbm %s6753_s8, %s3764_s10 }
 0x4ed   : > { %v5367_v43 = vsub.f32 %v1309_v38, %v1373_v59  ;;  %v1441_v22 = vsel %vm845_vm1, %v1403_v35, 0.0 }
 0x4ee   : > { %v5372_v24 = vsub.f32 %v1308_v34, %v1372_v23  ;;  %v1359_v17 = vpop.xlane.xlu1 %1358  ;;  %v1438_v37 = vsel %vm845_vm1, %v1402_v54, 0.0 }
 0x4ef   : > { %v1375_v31 = vmul.f32 0.03125, %v1359_v17  ;;  %1442 = vadd.xlane.f32.xlu1 %v1441_v22  ;;  %1439 = vadd.xlane.f32.xlu0 %v1438_v37  ;;  %v1356_v56 = vpop.xlane.xlu0 %1355  ;;  %v1405_v18 = vmul.f32 %v5367_v43, %v5367_v43 }
 0x4f0   : > { %v1374_v10 = vmul.f32 0.03125, %v1356_v56  ;;  %v1404_v25 = vmul.f32 %v5372_v24, %v5372_v24 }
 0x4f1   : > { %v5381_v38 = vsub.f32 %v1311_v39, %v1375_v31  ;;  %v1447_v28 = vsel %vm845_vm1, %v1405_v18, 0.0 }
 0x4f2   : > { %v5386_v34 = vsub.f32 %v1310_v3, %v1374_v10  ;;  %v1444_v36 = vsel %vm845_vm1, %v1404_v25, 0.0  ;;  %v1773_v3 = vld [vmem:[%s6751_s6 + $0x28] sm:$0xff]  ;;  %v5424_v30 = vpop.permute.xlu1 %1724 }
 0x4f3   : > { %1448 = vadd.xlane.f32.xlu1 %v1447_v28  ;;  %1445 = vadd.xlane.f32.xlu0 %v1444_v36  ;;  %v1407_v48 = vmul.f32 %v5381_v38, %v5381_v38  ;;  %v4002_v58 = vpack.c.bf16 %v1773_v3, %v1772_v53  ;;  %v5422_v59 = vpop.permute.xlu0 %1722 }
 0x4f4   : > { %v1406_v14 = vmul.f32 %v5386_v34, %v5386_v34 }
 0x4f5   : > { %v1453_v33 = vsel %vm845_vm1, %v1407_v48, 0.0  ;;  %4003 = vmatprep.subr.bf16.mxu0 %v4002_v58 }
 0x4f6   : > { %v1450_v39 = vsel %vm845_vm1, %v1406_v14, 0.0  ;;  %4005 = vmatpush3.bf16.msra.mxu0 %v4002_v58  ;;  %v5429_v58 = vld [vmem:[%s6748_s3 + $0x6] ss:$0 sm:$0xff] }
 0x4f7   : > { %1454 = vadd.xlane.f32.xlu1 %v1453_v33  ;;  %1451 = vadd.xlane.f32.xlu0 %v1450_v39 }
 0x4f8   : > { %4007 = vmatprep.subr.bf16.mxu0 %v4006_v1 }
 0x4fa   : > { %4009 = vmatpush3.bf16.msra.mxu0 %v4006_v1 }
 0x508   : > { %1728 = vrot.lane.b32.xlu1 %v1684_v5, %s4418_s18 }
 0x50c   : > { %1732 = vrot.lane.b32.xlu1 %v1686_v16, %s4418_s18 }
 0x50d   : > { %1726 = vrot.lane.b32.xlu0 %v1683_v2, %s4418_s18 }
 0x511   : > { %1730 = vrot.lane.b32.xlu0 %v1685_v46, %s4418_s18 }
 0x515   : > { %1734 = vrot.lane.b32.xlu0 %v1687_v47, %s4418_s18 }
 0x567   : > { %v1413_v42 = vpop.xlane.xlu0 %1412 }
 0x568   : > { %v1457_v61 = vmul.f32 0.03125, %v1413_v42  ;;  %v1410_v35 = vpop.xlane.xlu1 %1409 }
 0x569   : > { %v1456_v23 = vmul.f32 0.03125, %v1410_v35 }
 0x56a   : > { %v1473_v54 = vadd.f32 1e-05, %v1457_v61 }
 0x56b   : > { %v1472_v22 = vadd.f32 1e-05, %v1456_v23 }
 0x56c   : > { %4129 = vrsqrt.f32 %v1473_v54  ;;  %v1419_v17 = vpop.xlane.xlu1 %1418  ;;  %v1416_v27 = vpop.xlane.xlu0 %1415 }
 0x56d   : > { %4131 = vrsqrt.f32 %v1472_v22  ;;  %v1459_v37 = vmul.f32 0.03125, %v1419_v17  ;;  %v1458_v31 = vmul.f32 0.03125, %v1416_v27 }
 0x56f   : > { %v1475_v56 = vadd.f32 1e-05, %v1459_v37  ;;  %v1474_v63 = vadd.f32 1e-05, %v1458_v31 }
 0x570   : > { %v1425_v18 = vpop.xlane.xlu1 %1424  ;;  %v1422_v10 = vpop.xlane.xlu0 %1421 }
 0x571   : > { %4133 = vrsqrt.f32 %v1475_v56  ;;  %v1461_v25 = vmul.f32 0.03125, %v1425_v18  ;;  %v1460_v28 = vmul.f32 0.03125, %v1422_v10 }
 0x572   : > { %4135 = vrsqrt.f32 %v1474_v63 }
 0x573   : > { %v1477_v36 = vadd.f32 1e-05, %v1461_v25  ;;  %v1476_v48 = vadd.f32 1e-05, %v1460_v28 }
 0x574   : > { %v1431_v14 = vpop.xlane.xlu1 %1430  ;;  %v1428_v33 = vpop.xlane.xlu0 %1427 }
 0x575   : > { %4137 = vrsqrt.f32 %v1477_v36  ;;  %v1463_v39 = vmul.f32 0.03125, %v1431_v14  ;;  %v1462_v53 = vmul.f32 0.03125, %v1428_v33 }
 0x576   : > { %v4130_v3 = vpop.eup %4129  ;;  %4139 = vrsqrt.f32 %v1476_v48 }
 0x577   : > { %v4132_v0 = vpop.eup %4131  ;;  %v1505_v60 = vmul.f32 %v4130_v3, %v5285_v45  ;;  %v1479_v1 = vadd.f32 1e-05, %v1463_v39  ;;  %v1478_v19 = vadd.f32 1e-05, %v1462_v53 }
 0x578   : > { %v1437_v5 = vpop.xlane.xlu1 %1436  ;;  %v1434_v32 = vpop.xlane.xlu0 %1433  ;;  %v1504_v16 = vmul.f32 %v4132_v0, %v5289_v50 }
 0x579   : > { %4141 = vrsqrt.f32 %v1479_v1  ;;  %v1465_v2 = vmul.f32 0.03125, %v1437_v5  ;;  %v1464_v40 = vmul.f32 0.03125, %v1434_v32  ;;  %v1525_v46 = vmul.f32 %v5429_v58, %v1505_v60 }
 0x57a   : > { %4143 = vrsqrt.f32 %v1478_v19  ;;  %v1524_v12 = vmul.f32 %v5429_v58, %v1504_v16 }
 0x57b   : > { %v4134_v45 = vpop.eup %4133  ;;  %v1481_v47 = vadd.f32 1e-05, %v1465_v2  ;;  %v1480_v42 = vadd.f32 1e-05, %v1464_v40  ;;  %v1545_v61 = vadd.f32 %v5435_v57, %v1525_v46 }
 0x57c   : > { %v4136_v35 = vpop.eup %4135  ;;  %v1443_v23 = vpop.xlane.xlu1 %1442  ;;  %v1544_v22 = vadd.f32 %v5435_v57, %v1524_v12  ;;  %v1507_v50 = vmul.f32 %v4134_v45, %v5297_v29 }
 0x57d   : > { %v1440_v54 = vpop.xlane.xlu0 %1439  ;;  %4145 = vrsqrt.f32 %v1481_v47  ;;  %v1467_v17 = vmul.f32 0.03125, %v1443_v23  ;;  %v1506_v31 = vmul.f32 %v4136_v35, %v5302_v21  ;;  %v1753_v25 = vsel %vm845_vm1, %v1545_v61, %v5263_v20 }
 0x57e   : > { %v1466_v27 = vmul.f32 0.03125, %v1440_v54  ;;  %4147 = vrsqrt.f32 %v1480_v42  ;;  %v1752_v37 = vsel %vm845_vm1, %v1544_v22, %v5269_v49  ;;  %v1527_v56 = vmul.f32 %v5429_v58, %v1507_v50 }
 0x57f   : > { %v4138_v63 = vpop.eup %4137  ;;  %v1483_v18 = vadd.f32 1e-05, %v1467_v17  ;;  %3926 = vmatprep.mubr.msk.f32.mxu0 %vm1780_vm2, %v1752_v37  ;;  %v1526_v48 = vmul.f32 %v5429_v58, %v1506_v31 }
 0x580   : > { %v1482_v10 = vadd.f32 1e-05, %v1466_v27  ;;  %v4140_v29 = vpop.eup %4139  ;;  %v1449_v28 = vpop.xlane.xlu1 %1448  ;;  %3927 = vmatmul.mubr.msk.f32.vlgmr.msra.gmra.mrb[16].mxu0 %vm1780_vm2, %v1753_v25  ;;  %v1547_v14 = vadd.f32 %v5435_v57, %v1527_v56  ;;  %v1509_v21 = vmul.f32 %v4138_v63, %v5311_v51 }
 0x581   : > { %v1446_v36 = vpop.xlane.xlu0 %1445  ;;  %4149 = vrsqrt.f32 %v1483_v18  ;;  %v1469_v33 = vmul.f32 0.03125, %v1449_v28  ;;  %v1508_v53 = vmul.f32 %v4140_v29, %v5316_v52  ;;  %v1546_v3 = vadd.f32 %v5435_v57, %v1526_v48 }
 0x582   : > { %v1468_v39 = vmul.f32 0.03125, %v1446_v36  ;;  %4151 = vrsqrt.f32 %v1482_v10  ;;  %v1529_v0 = vmul.f32 %v5429_v58, %v1509_v21  ;;  %v1755_v5 = vsel %vm845_vm1, %v1547_v14, %v5273_v11 }
 0x583   : > { %v4142_v60 = vpop.eup %4141  ;;  %v1485_v1 = vadd.f32 1e-05, %v1469_v33  ;;  %v1528_v32 = vmul.f32 %v5429_v58, %v1508_v53  ;;  %v1754_v51 = vsel %vm845_vm1, %v1546_v3, %v5267_v13 }
 0x584   : > { %v1484_v19 = vadd.f32 1e-05, %v1468_v39  ;;  %v4144_v16 = vpop.eup %4143  ;;  %v1455_v2 = vpop.xlane.xlu1 %1454  ;;  %v1549_v52 = vadd.f32 %v5435_v57, %v1529_v0  ;;  %v1511_v46 = vmul.f32 %v4142_v60, %v5325_v6  ;;  %3929 = vmatprep.mubr.msk.f32.mxu0 %vm1780_vm2, %v1754_v51 }
 0x585   : > { %v1452_v40 = vpop.xlane.xlu0 %1451  ;;  %4153 = vrsqrt.f32 %v1485_v1  ;;  %v1471_v12 = vmul.f32 0.03125, %v1455_v2  ;;  %v1548_v47 = vadd.f32 %v5435_v57, %v1528_v32  ;;  %3930 = vmatmul.mubr.msk.f32.gmra.mrb[18].mxu0 %vm1780_vm2, %v1755_v5  ;;  %v1510_v42 = vmul.f32 %v4144_v16, %v5330_v44 }
 0x586   : > { %v1470_v45 = vmul.f32 0.03125, %v1452_v40  ;;  %4155 = vrsqrt.f32 %v1484_v19  ;;  %v1531_v61 = vmul.f32 %v5429_v58, %v1511_v46  ;;  %v1757_v22 = vsel %vm845_vm1, %v1549_v52, %v5277_v7 }
 0x587   : > { %v4146_v35 = vpop.eup %4145  ;;  %v1487_v23 = vadd.f32 1e-05, %v1471_v12  ;;  %v1756_v6 = vsel %vm845_vm1, %v1548_v47, %v5271_v15  ;;  %v1530_v17 = vmul.f32 %v5429_v58, %v1510_v42 }
 0x588   : > { %v1486_v54 = vadd.f32 1e-05, %v1470_v45  ;;  %v4148_v50 = vpop.eup %4147  ;;  %3932 = vmatprep.mubr.msk.f32.mxu0 %vm1780_vm2, %v1756_v6  ;;  %v1551_v27 = vadd.f32 %v5435_v57, %v1531_v61  ;;  %v1513_v44 = vmul.f32 %v4146_v35, %v5339_v62  ;;  %v5512_v2 = vpop.permute.xlu1 %1728 }
 0x589   : > { %4157 = vrsqrt.f32 %v1487_v23  ;;  %v1512_v37 = vmul.f32 %v4148_v50, %v5344_v41  ;;  %3933 = vmatmul.mubr.msk.f32.gmra.mrb[20].mxu0 %vm1780_vm2, %v1757_v22  ;;  %v1550_v31 = vadd.f32 %v5435_v57, %v1530_v17  ;;  %v5491_v48 = vpop.permute.xlu0 %1726 }
 0x58a   : > { %4159 = vrsqrt.f32 %v1486_v54  ;;  %v1533_v56 = vmul.f32 %v5429_v58, %v1513_v44  ;;  %v1759_v18 = vsel %vm845_vm1, %v1551_v27, %v5281_v26 }
 0x58b   : > { %v4150_v63 = vpop.eup %4149  ;;  %v1532_v10 = vmul.f32 %v5429_v58, %v1512_v37  ;;  %v1758_v62 = vsel %vm845_vm1, %v1550_v31, %v5275_v55 }
 0x58c   : > { %v4152_v25 = vpop.eup %4151  ;;  %v1553_v29 = vadd.f32 %v5435_v57, %v1533_v56  ;;  %v1515_v41 = vmul.f32 %v4150_v63, %v5353_v4  ;;  %3935 = vmatprep.mubr.msk.f32.mxu0 %vm1780_vm2, %v1758_v62  ;;  %v5531_v35 = vpop.permute.xlu1 %1732 }
 0x58d   : > { %v1552_v28 = vadd.f32 %v5435_v57, %v1532_v10  ;;  %v1514_v36 = vmul.f32 %v4152_v25, %v5358_v9  ;;  %3936 = vmatmul.mubr.msk.f32.gmra.mrb[22].mxu0 %vm1780_vm2, %v1759_v18 }
 0x58e   : > { %v1535_v14 = vmul.f32 %v5429_v58, %v1515_v41  ;;  %v1761_v39 = vsel %vm845_vm1, %v1553_v29, %v5422_v59 }
 0x58f   : > { %v4154_v21 = vpop.eup %4153  ;;  %v1760_v33 = vsel %vm845_vm1, %v1552_v28, %v5279_v8  ;;  %v1534_v4 = vmul.f32 %v5429_v58, %v1514_v36 }
 0x590   : > { %v4156_v53 = vpop.eup %4155  ;;  %3938 = vmatprep.mubr.msk.f32.mxu0 %vm1780_vm2, %v1760_v33  ;;  %v1555_v9 = vadd.f32 %v5435_v57, %v1535_v14  ;;  %v1517_v3 = vmul.f32 %v4154_v21, %v5367_v43  ;;  %v5514_v43 = vpop.permute.xlu0 %1730 }
 0x591   : > { %v1554_v0 = vadd.f32 %v5435_v57, %v1534_v4  ;;  %v1516_v60 = vmul.f32 %v4156_v53, %v5372_v24  ;;  %3939 = vmatmul.mubr.msk.f32.gmra.mrb[24].mxu0 %vm1780_vm2, %v1761_v39 }
 0x592   : > { %v1537_v1 = vmul.f32 %v5429_v58, %v1517_v3  ;;  %v1763_v32 = vsel %vm845_vm1, %v1555_v9, %v5491_v48 }
 0x593   : > { %v4158_v19 = vpop.eup %4157  ;;  %v1762_v5 = vsel %vm845_vm1, %v1554_v0, %v5424_v30  ;;  %v1536_v16 = vmul.f32 %v5429_v58, %v1516_v60 }
 0x594   : > { %v4160_v51 = vpop.eup %4159  ;;  %3941 = vmatprep.mubr.msk.f32.mxu0 %vm1780_vm2, %v1762_v5  ;;  %v1557_v24 = vadd.f32 %v5435_v57, %v1537_v1  ;;  %v1519_v40 = vmul.f32 %v4158_v19, %v5381_v38 }
 0x595   : > { %v1556_v52 = vadd.f32 %v5435_v57, %v1536_v16  ;;  %v1518_v46 = vmul.f32 %v4160_v51, %v5386_v34  ;;  %3942 = vmatmul.mubr.msk.f32.gmra.mrb[26].mxu0 %vm1780_vm2, %v1763_v32  ;;  %v5533_v34 = vpop.permute.xlu0 %1734 }
 0x596   : > { %v1539_v12 = vmul.f32 %v5429_v58, %v1519_v40  ;;  %v1765_v47 = vsel %vm845_vm1, %v1557_v24, %v5514_v43 }
 0x597   : > { %v1764_v45 = vsel %vm845_vm1, %v1556_v52, %v5512_v2  ;;  %v1538_v42 = vmul.f32 %v5429_v58, %v1518_v46  ;;  %v3707_v58 = vld [vmem:[%s6748_s3 + $0x8] ss:$0 sm:$0xff] }
 0x598   : > { %3944 = vmatprep.mubr.msk.f32.mxu0 %vm1780_vm2, %v1764_v45  ;;  %v1559_v38 = vadd.f32 %v5435_v57, %v1539_v12 }
 0x599   : > { %v1558_v61 = vadd.f32 %v5435_v57, %v1538_v42  ;;  %3945 = vmatmul.mubr.msk.f32.gmra.mrb[28].mxu0 %vm1780_vm2, %v1765_v47 }
 0x59a   : > { %v1767_v54 = vsel %vm845_vm1, %v1559_v38, %v5533_v34 }
 0x59b   : > { %v1766_v23 = vsel %vm845_vm1, %v1558_v61, %v5531_v35 }
 0x59c   : > { %3947 = vmatprep.mubr.msk.f32.mxu0 %vm1780_vm2, %v1766_v23 }
 0x59d   : > { %3948 = vmatmul.mubr.msk.f32.gmra.mrb[30].mxu0 %vm1780_vm2, %v1767_v54 }
 0x653   : > { %v3928_v57 = vpop.f32.mrb[16].mxu0 }
 0x654   : > { %v5545_v6 = vadd.f32 %v3928_v57, %v3707_v58  ;;  %v1895_v22 = vpop.f32.mrb[17].mxu0 }
 0x655   : > { %v5547_v50 = vadd.f32 %v3707_v58, %v1895_v22 }
 0x656   : > { %2088 = vrot.lane.b32.xlu0 %v5545_v6, %s4418_s18  ;;  %v3725_v32 = vmul.f32 -1.442695, %v5545_v6 }
 0x657   : > { %2086 = vrot.lane.b32.xlu1 %v5547_v50, %s4418_s18  ;;  %v3724_v16 = vmul.f32 -1.442695, %v5547_v50 }
 0x658   : > { %v3931_v17 = vpop.f32.mrb[18].mxu0  ;;  %4161 = vpow2.f32 %v3725_v32 }
 0x659   : > { %v5553_v27 = vadd.f32 %v3931_v17, %v3707_v58  ;;  %v1905_v44 = vpop.f32.mrb[19].mxu0  ;;  %4163 = vpow2.f32 %v3724_v16 }
 0x65a   : > { %v5555_v37 = vadd.f32 %v3707_v58, %v1905_v44 }
 0x65b   : > { %2092 = vrot.lane.b32.xlu0 %v5553_v27, %s4418_s18  ;;  %v3727_v51 = vmul.f32 -1.442695, %v5553_v27 }
 0x65c   : > { %2090 = vrot.lane.b32.xlu1 %v5555_v37, %s4418_s18  ;;  %v3934_v31 = vpop.f32.mrb[20].mxu0  ;;  %v3726_v24 = vmul.f32 -1.442695, %v5555_v37 }
 0x65d   : > { %v5561_v56 = vadd.f32 %v3934_v31, %v3707_v58  ;;  %v1915_v63 = vpop.f32.mrb[21].mxu0  ;;  %4165 = vpow2.f32 %v3727_v51 }
 0x65e   : > { %v5563_v18 = vadd.f32 %v3707_v58, %v1915_v63  ;;  %4167 = vpow2.f32 %v3726_v24 }
 0x65f   : > { %2096 = vrot.lane.b32.xlu0 %v5561_v56, %s4418_s18  ;;  %v3729_v40 = vmul.f32 -1.442695, %v5561_v56 }
 0x660   : > { %2094 = vrot.lane.b32.xlu1 %v5563_v18, %s4418_s18  ;;  %v3937_v10 = vpop.f32.mrb[22].mxu0  ;;  %v3728_v52 = vmul.f32 -1.442695, %v5563_v18 }
 0x661   : > { %v5569_v25 = vadd.f32 %v3937_v10, %v3707_v58  ;;  %v1925_v62 = vpop.f32.mrb[23].mxu0  ;;  %4169 = vpow2.f32 %v3729_v40 }
 0x662   : > { %v5571_v29 = vadd.f32 %v3707_v58, %v1925_v62  ;;  %v4162_v12 = vpop.eup %4161  ;;  %4171 = vpow2.f32 %v3728_v52 }
 0x663   : > { %2100 = vrot.lane.b32.xlu0 %v5569_v25, %s4418_s18  ;;  %v3731_v46 = vmul.f32 -1.442695, %v5569_v25  ;;  %v4164_v45 = vpop.eup %4163  ;;  %v2023_v42 = vadd.f32 1.0, %v4162_v12 }
 0x664   : > { %2098 = vrot.lane.b32.xlu1 %v5571_v29, %s4418_s18  ;;  %v3940_v41 = vpop.f32.mrb[24].mxu0  ;;  %v3730_v47 = vmul.f32 -1.442695, %v5571_v29  ;;  %v2022_v38 = vadd.f32 1.0, %v4164_v45 }
 0x665   : > { %v5577_v28 = vadd.f32 %v3940_v41, %v3707_v58  ;;  %v1935_v36 = vpop.f32.mrb[25].mxu0  ;;  %4173 = vpow2.f32 %v3731_v46 }
 0x666   : > { %v5579_v14 = vadd.f32 %v3707_v58, %v1935_v36  ;;  %4175 = vpow2.f32 %v3730_v47 }
 0x667   : > { %2104 = vrot.lane.b32.xlu0 %v5577_v28, %s4418_s18  ;;  %v4166_v61 = vpop.eup %4165  ;;  %v3733_v23 = vmul.f32 -1.442695, %v5577_v28  ;;  %4177 = vrcp.f32 %v2023_v42 }
 0x668   : > { %2102 = vrot.lane.b32.xlu1 %v5579_v14, %s4418_s18  ;;  %v3943_v21 = vpop.f32.mrb[26].mxu0  ;;  %v3732_v54 = vmul.f32 -1.442695, %v5579_v14  ;;  %4179 = vrcp.f32 %v2022_v38  ;;  %v2025_v57 = vadd.f32 1.0, %v4166_v61 }
 0x669   : > { %v5585_v33 = vadd.f32 %v3943_v21, %v3707_v58  ;;  %v1945_v39 = vpop.f32.mrb[27].mxu0  ;;  %4181 = vpow2.f32 %v3733_v23 }
 0x66a   : > { %v5587_v4 = vadd.f32 %v3707_v58, %v1945_v39  ;;  %4183 = vpow2.f32 %v3732_v54 }
 0x66b   : > { %2108 = vrot.lane.b32.xlu0 %v5585_v33, %s4418_s18  ;;  %v3735_v17 = vmul.f32 -1.442695, %v5585_v33  ;;  %4185 = vrcp.f32 %v2025_v57 }
 0x66c   : > { %2106 = vrot.lane.b32.xlu1 %v5587_v4, %s4418_s18  ;;  %v3946_v53 = vpop.f32.mrb[28].mxu0  ;;  %v3734_v44 = vmul.f32 -1.442695, %v5587_v4 }
 0x66d   : > { %v5593_v9 = vadd.f32 %v3946_v53, %v3707_v58  ;;  %v1955_v3 = vpop.f32.mrb[29].mxu0  ;;  %4187 = vpow2.f32 %v3735_v17 }
 0x66e   : > { %v5595_v0 = vadd.f32 %v3707_v58, %v1955_v3  ;;  %4189 = vpow2.f32 %v3734_v44 }
 0x66f   : > { %2112 = vrot.lane.b32.xlu0 %v5593_v9, %s4418_s18  ;;  %v3737_v41 = vmul.f32 -1.442695, %v5593_v9 }
 0x670   : > { %2110 = vrot.lane.b32.xlu1 %v5595_v0, %s4418_s18  ;;  %v3949_v60 = vpop.f32.mrb[30].mxu0  ;;  %v3736_v36 = vmul.f32 -1.442695, %v5595_v0 }
 0x671   : > { %v5601_v1 = vadd.f32 %v3949_v60, %v3707_v58  ;;  %v1965_v19 = vpop.f32.mrb[31].mxu0 }
 0x672   : > { %v5603_v5 = vadd.f32 %v3707_v58, %v1965_v19  ;;  %v4168_v58 = vpop.eup %4167 }
 0x673   : > { %2116 = vrot.lane.b32.xlu0 %v5601_v1, %s4418_s18  ;;  %v4170_v22 = vpop.eup %4169  ;;  %v2024_v31 = vadd.f32 1.0, %v4168_v58  ;;  %v3739_v60 = vmul.f32 -1.442695, %v5601_v1 }
 0x674   : > { %2114 = vrot.lane.b32.xlu1 %v5603_v5, %s4418_s18  ;;  %v4172_v63 = vpop.eup %4171  ;;  %v2027_v10 = vadd.f32 1.0, %v4170_v22  ;;  %v3738_v32 = vmul.f32 -1.442695, %v5603_v5 }
 0x675   : > { %v4174_v62 = vpop.eup %4173  ;;  %4191 = vrcp.f32 %v2024_v31  ;;  %v2026_v21 = vadd.f32 1.0, %v4172_v63 }
 0x676   : > { %v4176_v39 = vpop.eup %4175  ;;  %4193 = vrcp.f32 %v2027_v10  ;;  %v2029_v53 = vadd.f32 1.0, %v4174_v62 }
 0x677   : > { %v5623_v3 = vpop.eup %4177  ;;  %4195 = vpow2.f32 %v3737_v41  ;;  %v2028_v24 = vadd.f32 1.0, %v4176_v39 }
 0x678   : > { %v5626_v19 = vpop.eup %4179  ;;  %4197 = vpow2.f32 %v3736_v36 }
 0x679   : > { %v4182_v51 = vpop.eup %4181  ;;  %4199 = vrcp.f32 %v2026_v21 }
 0x67a   : > { %v4184_v46 = vpop.eup %4183  ;;  %4201 = vrcp.f32 %v2029_v53  ;;  %v2031_v47 = vadd.f32 1.0, %v4182_v51 }
 0x67b   : > { %4203 = vpow2.f32 %v3739_v60  ;;  %v5632_v45 = vpop.eup %4185  ;;  %v2030_v38 = vadd.f32 1.0, %v4184_v46 }
 0x67c   : > { %4205 = vpow2.f32 %v3738_v32  ;;  %v4188_v42 = vpop.eup %4187 }
 0x67d   : > { %4207 = vrcp.f32 %v2028_v24  ;;  %v4190_v61 = vpop.eup %4189  ;;  %v2033_v17 = vadd.f32 1.0, %v4188_v42 }
 0x67e   : > { %4209 = vrcp.f32 %v2031_v47  ;;  %v2032_v63 = vadd.f32 1.0, %v4190_v61 }
 0x67f   : > { %v5635_v54 = vpop.eup %4191  ;;  %4211 = vrcp.f32 %v2030_v38 }
 0x680   : > { %v5638_v22 = vpop.eup %4193  ;;  %4213 = vrcp.f32 %v2033_v17 }
 0x681   : > { %v4196_v31 = vpop.eup %4195  ;;  %4215 = vrcp.f32 %v2032_v63 }
 0x682   : > { %v4198_v10 = vpop.eup %4197  ;;  %v2035_v53 = vadd.f32 1.0, %v4196_v31 }
 0x683   : > { %v5643_v41 = vpop.eup %4199 }
 0x684   : > { %v5646_v39 = vpop.eup %4201  ;;  %4217 = vrcp.f32 %v2035_v53 }
 0x685   : > { %v4204_v32 = vpop.eup %4203 }
 0x686   : > { %v4206_v51 = vpop.eup %4205 }
 0x687   : > { %v2036_v42 = vadd.f32 1.0, %v4206_v51 }
 0x6c8   : > { %v2089_v16 = vpop.permute.xlu0 %2088 }
 0x6c9   : > { %v2135_v40 = vmul.f32 %v5623_v3, %v2089_v16  ;;  %v2087_v52 = vpop.permute.xlu1 %2086  ;;  %v2034_v16 = vadd.f32 1.0, %v4198_v10 }
 0x6ca   : > { %v2134_v12 = vmul.f32 %v5626_v19, %v2087_v52 }
 0x6cb   : > { %2168 = vrot.lane.b32.xlu0 %v2135_v40, %s4419_s13  ;;  %v5651_v40 = vpop.eup %4207  ;;  %4219 = vrcp.f32 %v2034_v16 }
 0x6cc   : > { %2166 = vrot.lane.b32.xlu1 %v2134_v12, %s4419_s13  ;;  %v2037_v12 = vadd.f32 1.0, %v4204_v32  ;;  %v5656_v38 = vpop.eup %4209 }
 0x6cd   : > { %v2093_v23 = vpop.permute.xlu0 %2092 }
 0x6ce   : > { %v2137_v58 = vmul.f32 %v5632_v45, %v2093_v23  ;;  %v2091_v57 = vpop.permute.xlu1 %2090  ;;  %v5659_v23 = vpop.eup %4211  ;;  %4221 = vrcp.f32 %v2037_v12 }
 0x6cf   : > { %v2136_v44 = vmul.f32 %v5635_v54, %v2091_v57  ;;  %4223 = vrcp.f32 %v2036_v42 }
 0x6d0   : > { %2172 = vrot.lane.b32.xlu0 %v2137_v58, %s4419_s13 }
 0x6d1   : > { %2170 = vrot.lane.b32.xlu1 %v2136_v44, %s4419_s13  ;;  %v2097_v62 = vpop.permute.xlu0 %2096  ;;  %v5664_v44 = vpop.eup %4213 }
 0x6d2   : > { %v2139_v36 = vmul.f32 %v5638_v22, %v2097_v62  ;;  %v2095_v21 = vpop.permute.xlu1 %2094  ;;  %v5667_v63 = vpop.eup %4215 }
 0x6d3   : > { %v2138_v60 = vmul.f32 %v5643_v41, %v2095_v21  ;;  %v5672_v21 = vpop.eup %4217 }
 0x6d4   : > { %2176 = vrot.lane.b32.xlu0 %v2139_v36, %s4419_s13 }
 0x6d5   : > { %2174 = vrot.lane.b32.xlu1 %v2138_v60, %s4419_s13  ;;  %v2101_v24 = vpop.permute.xlu0 %2100  ;;  %v5675_v60 = vpop.eup %4219 }
 0x6d6   : > { %v2141_v52 = vmul.f32 %v5646_v39, %v2101_v24  ;;  %v2099_v46 = vpop.permute.xlu1 %2098 }
 0x6d7   : > { %v2140_v47 = vmul.f32 %v5651_v40, %v2099_v46 }
 0x6d8   : > { %2180 = vrot.lane.b32.xlu0 %v2141_v52, %s4419_s13  ;;  %v5680_v24 = vpop.eup %4221 }
 0x6d9   : > { %2178 = vrot.lane.b32.xlu1 %v2140_v47, %s4419_s13  ;;  %v2105_v61 = vpop.permute.xlu0 %2104  ;;  %v5683_v46 = vpop.eup %4223 }
 0x6da   : > { %v2143_v58 = vmul.f32 %v5656_v38, %v2105_v61  ;;  %v2103_v57 = vpop.permute.xlu1 %2102 }
 0x6db   : > { %v2142_v17 = vmul.f32 %v5659_v23, %v2103_v57 }
 0x6dc   : > { %2184 = vrot.lane.b32.xlu0 %v2143_v58, %s4419_s13 }
 0x6dd   : > { %2182 = vrot.lane.b32.xlu1 %v2142_v17, %s4419_s13  ;;  %v2109_v31 = vpop.permute.xlu0 %2108 }
 0x6de   : > { %v2145_v10 = vmul.f32 %v5664_v44, %v2109_v31  ;;  %v2107_v62 = vpop.permute.xlu1 %2106 }
 0x6df   : > { %v2144_v36 = vmul.f32 %v5667_v63, %v2107_v62 }
 0x6e0   : > { %2188 = vrot.lane.b32.xlu0 %v2145_v10, %s4419_s13 }
 0x6e1   : > { %2186 = vrot.lane.b32.xlu1 %v2144_v36, %s4419_s13  ;;  %v2113_v53 = vpop.permute.xlu0 %2112 }
 0x6e2   : > { %v2147_v32 = vmul.f32 %v5672_v21, %v2113_v53  ;;  %v2111_v16 = vpop.permute.xlu1 %2110 }
 0x6e3   : > { %v2146_v51 = vmul.f32 %v5675_v60, %v2111_v16 }
 0x6e4   : > { %2192 = vrot.lane.b32.xlu0 %v2147_v32, %s4419_s13 }
 0x6e5   : > { %2190 = vrot.lane.b32.xlu1 %v2146_v51, %s4419_s13  ;;  %v2117_v52 = vpop.permute.xlu0 %2116 }
 0x6e6   : > { %v2149_v12 = vmul.f32 %v5680_v24, %v2117_v52  ;;  %v2115_v47 = vpop.permute.xlu1 %2114 }
 0x6e7   : > { %v2148_v42 = vmul.f32 %v5683_v46, %v2115_v47 }
 0x6e8   : > { %2196 = vrot.lane.b32.xlu0 %v2149_v12, %s4419_s13 }
 0x6e9   : > { %2194 = vrot.lane.b32.xlu1 %v2148_v42, %s4419_s13  ;;  %s4421_s13 = smov [#allocation2]  }
 0x6ea   : > { %s4357_s19 = sshll.u32 %s4421_s13, 4  ;;  %s4358_s19 = int_to_ptr.vmem [resolvable:$false] %s4357_s19 }
 0x6eb   : > { %p4360_p0 = scmp.lt.s32.totalorder %s6695_s23, %s4358_s19 }
 0x73d   : > { %v2169_v61 = vpop.permute.xlu0 %2168 }
 0x73e   : > { %v2215_v58 = vadd.f32 %v2169_v61, %v5545_v6  ;;  %v2167_v57 = vpop.permute.xlu1 %2166 }
 0x73f   : > { %v2214_v17 = vadd.f32 %v2167_v57, %v5547_v50 }
 0x740   : > { %4225 = vtanh.f32 %v2215_v58 }
 0x741   : > { %4227 = vtanh.f32 %v2214_v17 }
 0x742   : > { %v2173_v31 = vpop.permute.xlu0 %2172 }
 0x743   : > { %v2217_v10 = vadd.f32 %v2173_v31, %v5553_v27  ;;  %v2171_v62 = vpop.permute.xlu1 %2170 }
 0x744   : > { %v2216_v36 = vadd.f32 %v2171_v62, %v5555_v37 }
 0x745   : > { %4229 = vtanh.f32 %v2217_v10 }
 0x746   : > { %4231 = vtanh.f32 %v2216_v36  ;;  %v2177_v53 = vpop.permute.xlu0 %2176 }
 0x747   : > { %v2219_v32 = vadd.f32 %v2177_v53, %v5561_v56  ;;  %v2175_v16 = vpop.permute.xlu1 %2174 }
 0x748   : > { %v2218_v51 = vadd.f32 %v2175_v16, %v5563_v18 }
 0x749   : > { %4233 = vtanh.f32 %v2219_v32 }
 0x74a   : > { %v4226_v6 = vpop.eup %4225  ;;  %4235 = vtanh.f32 %v2218_v51  ;;  %v2181_v50 = vpop.permute.xlu0 %2180 }
 0x74b   : > { %v4228_v52 = vpop.eup %4227  ;;  %2280 = vrot.lane.b32.xlu0 %v4226_v6, %s4420_s17  ;;  %v2221_v27 = vadd.f32 %v2181_v50, %v5569_v25  ;;  %v2179_v12 = vpop.permute.xlu1 %2178 }
 0x74c   : > { %2278 = vrot.lane.b32.xlu1 %v4228_v52, %s4420_s17  ;;  %v2220_v37 = vadd.f32 %v2179_v12, %v5571_v29  ;;  %v2247_v12 = vsub.f32 1.0, %v5623_v3 }
 0x74d   : > { %4237 = vtanh.f32 %v2221_v27 }
 0x74e   : > { %4239 = vtanh.f32 %v2220_v37  ;;  %v2185_v56 = vpop.permute.xlu0 %2184 }
 0x74f   : > { %v4230_v47 = vpop.eup %4229  ;;  %v2223_v18 = vadd.f32 %v2185_v56, %v5577_v28  ;;  %v2183_v42 = vpop.permute.xlu1 %2182  ;;  %v2246_v56 = vsub.f32 1.0, %v5626_v19 }
 0x750   : > { %v4232_v61 = vpop.eup %4231  ;;  %v2222_v58 = vadd.f32 %v2183_v42, %v5579_v14  ;;  %2284 = vrot.lane.b32.xlu0 %v4230_v47, %s4420_s17  ;;  %v2343_v47 = vmul.f32 %v5623_v3, %v5263_v20  ;;  %v2345_v20 = vmul.f32 %v5632_v45, %v5273_v11 }
 0x751   : > { %4241 = vtanh.f32 %v2223_v18  ;;  %2282 = vrot.lane.b32.xlu1 %v4232_v61, %s4420_s17  ;;  %v2342_v61 = vmul.f32 %v5626_v19, %v5269_v49  ;;  %v2344_v19 = vmul.f32 %v5635_v54, %v5267_v13  ;;  %v2346_v13 = vmul.f32 %v5643_v41, %v5271_v15 }
 0x752   : > { %4243 = vtanh.f32 %v2222_v58  ;;  %v2189_v25 = vpop.permute.xlu0 %2188  ;;  %v2348_v15 = vmul.f32 %v5651_v40, %v5275_v55  ;;  %v2350_v55 = vmul.f32 %v5659_v23, %v5279_v8  ;;  %v2352_v8 = vmul.f32 %v5667_v63, %v5424_v30 }
 0x753   : > { %v4234_v57 = vpop.eup %4233  ;;  %v2225_v29 = vadd.f32 %v2189_v25, %v5585_v33  ;;  %v2187_v17 = vpop.permute.xlu1 %2186  ;;  %v2354_v30 = vmul.f32 %v5675_v60, %v5512_v2  ;;  %v2356_v2 = vmul.f32 %v5683_v46, %v5531_v35 }
 0x754   : > { %v4236_v31 = vpop.eup %4235  ;;  %v2224_v10 = vadd.f32 %v2187_v17, %v5587_v4  ;;  %2288 = vrot.lane.b32.xlu0 %v4234_v57, %s4420_s17 }
 0x755   : > { %4245 = vtanh.f32 %v2225_v29  ;;  %2286 = vrot.lane.b32.xlu1 %v4236_v31, %s4420_s17  ;;  %v2249_v29 = vsub.f32 1.0, %v5632_v45  ;;  %v2248_v31 = vsub.f32 1.0, %v5635_v54 }
 0x756   : > { %4247 = vtanh.f32 %v2224_v10  ;;  %v2193_v28 = vpop.permute.xlu0 %2192 }
 0x757   : > { %v4238_v14 = vpop.eup %4237  ;;  %v2227_v62 = vadd.f32 %v2193_v28, %v5593_v9  ;;  %v2191_v36 = vpop.permute.xlu1 %2190 }
 0x758   : > { %v4240_v53 = vpop.eup %4239  ;;  %v2226_v32 = vadd.f32 %v2191_v36, %v5595_v0  ;;  %2292 = vrot.lane.b32.xlu0 %v4238_v14, %s4420_s17  ;;  %v2251_v14 = vsub.f32 1.0, %v5638_v22 }
 0x759   : > { %4249 = vtanh.f32 %v2227_v62  ;;  %2290 = vrot.lane.b32.xlu1 %v4240_v53, %s4420_s17  ;;  %v2250_v53 = vsub.f32 1.0, %v5643_v41 }
 0x75a   : > { %4251 = vtanh.f32 %v2226_v32  ;;  %v2197_v33 = vpop.permute.xlu0 %2196  ;;  %v2347_v32 = vmul.f32 %v5638_v22, %v5277_v7  ;;  %v2252_v7 = vsub.f32 1.0, %v5651_v40  ;;  %v2349_v22 = vmul.f32 %v5646_v39, %v5281_v26 }
 0x75b   : > { %v4242_v4 = vpop.eup %4241  ;;  %v2229_v16 = vadd.f32 %v2197_v33, %v5601_v1  ;;  %v2195_v51 = vpop.permute.xlu1 %2194  ;;  %v2254_v26 = vsub.f32 1.0, %v5659_v23 }
 0x75c   : > { %v4244_v6 = vpop.eup %4243  ;;  %v2228_v52 = vadd.f32 %v2195_v51, %v5603_v5  ;;  %2296 = vrot.lane.b32.xlu0 %v4242_v4, %s4420_s17  ;;  %v2253_v4 = vsub.f32 1.0, %v5646_v39  ;;  %v2351_v39 = vmul.f32 %v5656_v38, %v5422_v59  ;;  %v2256_v59 = vsub.f32 1.0, %v5667_v63 }
 0x75d   : > { %4253 = vtanh.f32 %v2229_v16  ;;  %2294 = vrot.lane.b32.xlu1 %v4244_v6, %s4420_s17 }
 0x75e   : > { %4255 = vtanh.f32 %v2228_v52 }
 0x75f   : > { %v4246_v9 = vpop.eup %4245 }
 0x760   : > { %v4248_v0 = vpop.eup %4247  ;;  %2300 = vrot.lane.b32.xlu0 %v4246_v9, %s4420_s17 }
 0x761   : > { %2298 = vrot.lane.b32.xlu1 %v4248_v0, %s4420_s17  ;;  %v2255_v0 = vsub.f32 1.0, %v5656_v38  ;;  %v2353_v38 = vmul.f32 %v5664_v44, %v5491_v48  ;;  %v2258_v48 = vsub.f32 1.0, %v5675_v60 }
 0x763   : > { %v4250_v50 = vpop.eup %4249 }
 0x764   : > { %v4252_v27 = vpop.eup %4251  ;;  %2304 = vrot.lane.b32.xlu0 %v4250_v50, %s4420_s17 }
 0x765   : > { %2302 = vrot.lane.b32.xlu1 %v4252_v27, %s4420_s17 }
 0x767   : > { %v4254_v1 = vpop.eup %4253 }
 0x768   : > { %v4256_v5 = vpop.eup %4255  ;;  %2308 = vrot.lane.b32.xlu0 %v4254_v1, %s4420_s17 }
 0x769   : > { %2306 = vrot.lane.b32.xlu1 %v4256_v5, %s4420_s17 }
 0x7bd   : > { %v2281_v37 = vpop.permute.xlu0 %2280 }
 0x7be   : > { %v2327_v18 = vmul.f32 %v2281_v37, %v2247_v12  ;;  %v2279_v42 = vpop.permute.xlu1 %2278  ;;  %v2257_v37 = vsub.f32 1.0, %v5664_v44  ;;  %v2355_v44 = vmul.f32 %v5672_v21, %v5514_v43  ;;  %v2260_v43 = vsub.f32 1.0, %v5683_v46 }
 0x7bf   : > { %v2326_v58 = vmul.f32 %v2279_v42, %v2246_v56 }
 0x7c0   : > { %v5727_v25 = vadd.f32 %v2343_v47, %v2327_v18 }
 0x7c1   : > { %v5729_v57 = vadd.f32 %v2342_v61, %v2326_v58  ;;  %v2259_v58 = vsub.f32 1.0, %v5672_v21  ;;  %v2357_v21 = vmul.f32 %v5680_v24, %v5533_v34 }
 0x7c2   : > { %2392 = vrot.lane.b32.xlu0 %v5727_v25, %s4420_s17  ;;  %v2285_v17 = vpop.permute.xlu0 %2284 }
 0x7c3   : > { %2390 = vrot.lane.b32.xlu1 %v5729_v57, %s4420_s17  ;;  %v2329_v49 = vmul.f32 %v2285_v17, %v2249_v29  ;;  %v2283_v3 = vpop.permute.xlu1 %2282 }
 0x7c4   : > { %v2328_v10 = vmul.f32 %v2283_v3, %v2248_v31  ;;  %v2261_v3 = vsub.f32 1.0, %v5680_v24 }
 0x7c5   : > { %v5741_v28 = vadd.f32 %v2345_v20, %v2329_v49 }
 0x7c6   : > { %v5744_v62 = vadd.f32 %v2344_v19, %v2328_v10  ;;  %v2289_v36 = vpop.permute.xlu0 %2288 }
 0x7c7   : > { %v2331_v33 = vmul.f32 %v2289_v36, %v2251_v14  ;;  %v2287_v11 = vpop.permute.xlu1 %2286  ;;  %2396 = vrot.lane.b32.xlu0 %v5741_v28, %s4420_s17 }
 0x7c8   : > { %v2330_v45 = vmul.f32 %v2287_v11, %v2250_v53  ;;  %2394 = vrot.lane.b32.xlu1 %v5744_v62, %s4420_s17 }
 0x7c9   : > { %v5755_v54 = vadd.f32 %v2347_v32, %v2331_v33 }
 0x7ca   : > { %v5758_v16 = vadd.f32 %v2346_v13, %v2330_v45  ;;  %v2293_v51 = vpop.permute.xlu0 %2292 }
 0x7cb   : > { %v2333_v6 = vmul.f32 %v2293_v51, %v2253_v4  ;;  %v2291_v52 = vpop.permute.xlu1 %2290  ;;  %2400 = vrot.lane.b32.xlu0 %v5755_v54, %s4420_s17 }
 0x7cc   : > { %v2332_v41 = vmul.f32 %v2291_v52, %v2252_v7  ;;  %2398 = vrot.lane.b32.xlu1 %v5758_v16, %s4420_s17 }
 0x7cd   : > { %v5769_v9 = vadd.f32 %v2349_v22, %v2333_v6 }
 0x7ce   : > { %v5772_v50 = vadd.f32 %v2348_v15, %v2332_v41  ;;  %v2297_v27 = vpop.permute.xlu0 %2296 }
 0x7cf   : > { %v2335_v1 = vmul.f32 %v2297_v27, %v2255_v0  ;;  %v2295_v5 = vpop.permute.xlu1 %2294  ;;  %2404 = vrot.lane.b32.xlu0 %v5769_v9, %s4420_s17 }
 0x7d0   : > { %v2334_v40 = vmul.f32 %v2295_v5, %v2254_v26  ;;  %2402 = vrot.lane.b32.xlu1 %v5772_v50, %s4420_s17 }
 0x7d1   : > { %v5783_v12 = vadd.f32 %v2351_v39, %v2335_v1 }
 0x7d2   : > { %v5786_v56 = vadd.f32 %v2350_v55, %v2334_v40  ;;  %v2301_v47 = vpop.permute.xlu0 %2300 }
 0x7d3   : > { %v2337_v18 = vmul.f32 %v2301_v47, %v2257_v37  ;;  %v2299_v42 = vpop.permute.xlu1 %2298  ;;  %2408 = vrot.lane.b32.xlu0 %v5783_v12, %s4420_s17 }
 0x7d4   : > { %v2336_v23 = vmul.f32 %v2299_v42, %v2256_v59  ;;  %2406 = vrot.lane.b32.xlu1 %v5786_v56, %s4420_s17 }
 0x7d5   : > { %v5797_v61 = vadd.f32 %v2353_v38, %v2337_v18 }
 0x7d6   : > { %v5800_v29 = vadd.f32 %v2352_v8, %v2336_v23  ;;  %v2305_v17 = vpop.permute.xlu0 %2304 }
 0x7d7   : > { %v2339_v31 = vmul.f32 %v2305_v17, %v2259_v58  ;;  %v2303_v20 = vpop.permute.xlu1 %2302  ;;  %2412 = vrot.lane.b32.xlu0 %v5797_v61, %s4420_s17 }
 0x7d8   : > { %v2338_v63 = vmul.f32 %v2303_v20, %v2258_v48  ;;  %2410 = vrot.lane.b32.xlu1 %v5800_v29, %s4420_s17 }
 0x7d9   : > { %v5811_v49 = vadd.f32 %v2355_v44, %v2339_v31 }
 0x7da   : > { %v5814_v19 = vadd.f32 %v2354_v30, %v2338_v63  ;;  %v2309_v10 = vpop.permute.xlu0 %2308 }
 0x7db   : > { %v2341_v14 = vmul.f32 %v2309_v10, %v2261_v3  ;;  %v2307_v36 = vpop.permute.xlu1 %2306  ;;  %2416 = vrot.lane.b32.xlu0 %v5811_v49, %s4420_s17 }
 0x7dc   : > { %v2340_v60 = vmul.f32 %v2307_v36, %v2260_v43  ;;  %2414 = vrot.lane.b32.xlu1 %v5814_v19, %s4420_s17 }
 0x7dd   : > { %v5825_v53 = vadd.f32 %v2357_v21, %v2341_v14 }
 0x7de   : > { %v5827_v32 = vadd.f32 %v2356_v2, %v2340_v60 }
 0x7df   : > { %2420 = vrot.lane.b32.xlu0 %v5825_v53, %s4420_s17 }
 0x7e0   : > { %2418 = vrot.lane.b32.xlu1 %v5827_v32, %s4420_s17 }
 0x834   : > { %v5833_v34 = vpop.permute.xlu0 %2392 }
 0x835   : > { %6782 = vst [vmem:[#allocation5_spill] sm:$0xff] %v5833_v34  ;;  %v5835_v24 = vpop.permute.xlu1 %2390  ;;  %v2441_v35 = vsel %vm845_vm1, %v5833_v34, 0.0 }
 0x836   : > { %6783 = vst [vmem:[#allocation6_spill] sm:$0xff] %v5835_v24  ;;  %2442 = vadd.xlane.f32.xlu0 %v2441_v35  ;;  %v2438_v46 = vsel %vm845_vm1, %v5835_v24, 0.0 }
 0x837   : > { %2439 = vadd.xlane.f32.xlu1 %v2438_v46 }
 0x839   : > { %v5841_v33 = vpop.permute.xlu0 %2396 }
 0x83a   : > { %6784 = vst [vmem:[#allocation7_spill] sm:$0xff] %v5841_v33  ;;  %v5843_v11 = vpop.permute.xlu1 %2394  ;;  %v2447_v13 = vsel %vm845_vm1, %v5841_v33, 0.0 }
 0x83b   : > { %6785 = vst [vmem:[#allocation8_spill] sm:$0xff] %v5843_v11  ;;  %v2444_v45 = vsel %vm845_vm1, %v5843_v11, 0.0  ;;  %2448 = vadd.xlane.f32.xlu1 %v2447_v13 }
 0x83c   : > { %2445 = vadd.xlane.f32.xlu0 %v2444_v45 }
 0x83d   : > { %v5849_v4 = vpop.permute.xlu0 %2400 }
 0x83e   : > { %6786 = vst [vmem:[#allocation9_spill] sm:$0xff] %v5849_v4  ;;  %v5851_v51 = vpop.permute.xlu1 %2398  ;;  %v2453_v7 = vsel %vm845_vm1, %v5849_v4, 0.0 }
 0x83f   : > { %6787 = vst [vmem:[#allocation10_spill] sm:$0xff] %v5851_v51  ;;  %v2450_v22 = vsel %vm845_vm1, %v5851_v51, 0.0  ;;  %2454 = vadd.xlane.f32.xlu1 %v2453_v7 }
 0x840   : > { %2451 = vadd.xlane.f32.xlu0 %v2450_v22 }
 0x841   : > { %v5857_v6 = vpop.permute.xlu0 %2404 }
 0x842   : > { %6788 = vst [vmem:[#allocation11_spill] sm:$0xff] %v5857_v6  ;;  %v5859_v52 = vpop.permute.xlu1 %2402  ;;  %v2459_v15 = vsel %vm845_vm1, %v5857_v6, 0.0 }
 0x843   : > { %6789 = vst [vmem:[#allocation12_spill] sm:$0xff] %v5859_v52  ;;  %v2456_v41 = vsel %vm845_vm1, %v5859_v52, 0.0  ;;  %2460 = vadd.xlane.f32.xlu1 %v2459_v15 }
 0x844   : > { %2457 = vadd.xlane.f32.xlu0 %v2456_v41 }
 0x845   : > { %v5865_v0 = vpop.permute.xlu0 %2408 }
 0x846   : > { %6790 = vst [vmem:[#allocation13_spill] sm:$0xff] %v5865_v0  ;;  %v5867_v27 = vpop.permute.xlu1 %2406  ;;  %v2465_v26 = vsel %vm845_vm1, %v5865_v0, 0.0 }
 0x847   : > { %6791 = vst [vmem:[#allocation14_spill] sm:$0xff] %v5867_v27  ;;  %v2462_v39 = vsel %vm845_vm1, %v5867_v27, 0.0  ;;  %2466 = vadd.xlane.f32.xlu1 %v2465_v26 }
 0x848   : > { %2463 = vadd.xlane.f32.xlu0 %v2462_v39 }
 0x849   : > { %v5873_v1 = vpop.permute.xlu0 %2412 }
 0x84a   : > { %6792 = vst [vmem:[#allocation15_spill] sm:$0xff] %v5873_v1  ;;  %v5875_v5 = vpop.permute.xlu1 %2410  ;;  %v2471_v55 = vsel %vm845_vm1, %v5873_v1, 0.0 }
 0x84b   : > { %6793 = vst [vmem:[#allocation16_spill] sm:$0xff] %v5875_v5  ;;  %v2468_v40 = vsel %vm845_vm1, %v5875_v5, 0.0  ;;  %2472 = vadd.xlane.f32.xlu1 %v2471_v55 }
 0x84c   : > { %2469 = vadd.xlane.f32.xlu0 %v2468_v40 }
 0x84d   : > { %v5881_v37 = vpop.permute.xlu0 %2416 }
 0x84e   : > { %6794 = vst [vmem:[#allocation17_spill] sm:$0xff] %v5881_v37  ;;  %v5883_v47 = vpop.permute.xlu1 %2414  ;;  %v2477_v59 = vsel %vm845_vm1, %v5881_v37, 0.0 }
 0x84f   : > { %6795 = vst [vmem:[#allocation18_spill] sm:$0xff] %v5883_v47  ;;  %v2474_v38 = vsel %vm845_vm1, %v5883_v47, 0.0  ;;  %2478 = vadd.xlane.f32.xlu1 %v2477_v59 }
 0x850   : > { %2475 = vadd.xlane.f32.xlu0 %v2474_v38 }
 0x851   : > { %v5889_v18 = vpop.permute.xlu0 %2420 }
 0x852   : > { %6796 = vst [vmem:[#allocation19_spill] sm:$0xff] %v5889_v18  ;;  %v5891_v42 = vpop.permute.xlu1 %2418  ;;  %v2483_v8 = vsel %vm845_vm1, %v5889_v18, 0.0 }
 0x853   : > { %6797 = vst [vmem:[#allocation20_spill] sm:$0xff] %v5891_v42  ;;  %v2480_v23 = vsel %vm845_vm1, %v5891_v42, 0.0  ;;  %2484 = vadd.xlane.f32.xlu1 %v2483_v8 }
 0x854   : > { %2481 = vadd.xlane.f32.xlu0 %v2480_v23 }
 0x8c3   : > { %v2443_v58 = vpop.xlane.xlu0 %2442 }
 0x8c4   : > { %v2487_v17 = vmul.f32 0.03125, %v2443_v58  ;;  %v2440_v48 = vpop.xlane.xlu1 %2439 }
 0x8c5   : > { %v2486_v44 = vmul.f32 0.03125, %v2440_v48 }
 0x8c6   : > { %v5898_v31 = vsub.f32 %v5727_v25, %v2487_v17 }
 0x8c7   : > { %v5901_v20 = vsub.f32 %v5729_v57, %v2486_v44 }
 0x8c8   : > { %v2519_v30 = vmul.f32 %v5898_v31, %v5898_v31  ;;  %v2449_v3 = vpop.xlane.xlu1 %2448 }
 0x8c9   : > { %v2518_v63 = vmul.f32 %v5901_v20, %v5901_v20  ;;  %v2489_v10 = vmul.f32 0.03125, %v2449_v3  ;;  %v2446_v43 = vpop.xlane.xlu0 %2445 }
 0x8ca   : > { %2552 = vrot.lane.b32.xlu1 %v2519_v30, %s4420_s17  ;;  %v2488_v21 = vmul.f32 0.03125, %v2446_v43 }
 0x8cb   : > { %2550 = vrot.lane.b32.xlu0 %v2518_v63, %s4420_s17  ;;  %v5910_v25 = vsub.f32 %v5741_v28, %v2489_v10 }
 0x8cc   : > { %v5913_v57 = vsub.f32 %v5744_v62, %v2488_v21  ;;  %v2455_v14 = vpop.xlane.xlu1 %2454 }
 0x8cd   : > { %v2521_v36 = vmul.f32 %v5910_v25, %v5910_v25  ;;  %v2491_v2 = vmul.f32 0.03125, %v2455_v14  ;;  %v2452_v60 = vpop.xlane.xlu0 %2451 }
 0x8ce   : > { %v2520_v35 = vmul.f32 %v5913_v57, %v5913_v57  ;;  %v2490_v46 = vmul.f32 0.03125, %v2452_v60 }
 0x8cf   : > { %v5920_v13 = vsub.f32 %v5755_v54, %v2491_v2  ;;  %2556 = vrot.lane.b32.xlu0 %v2521_v36, %s4420_s17 }
 0x8d0   : > { %v5924_v28 = vsub.f32 %v5758_v16, %v2490_v46  ;;  %2554 = vrot.lane.b32.xlu1 %v2520_v35, %s4420_s17  ;;  %v2461_v62 = vpop.xlane.xlu1 %2460 }
 0x8d1   : > { %v2523_v45 = vmul.f32 %v5920_v13, %v5920_v13  ;;  %v2493_v7 = vmul.f32 0.03125, %v2461_v62  ;;  %v2458_v22 = vpop.xlane.xlu0 %2457 }
 0x8d2   : > { %v2522_v15 = vmul.f32 %v5924_v28, %v5924_v28  ;;  %v2492_v41 = vmul.f32 0.03125, %v2458_v22 }
 0x8d3   : > { %v5932_v54 = vsub.f32 %v5769_v9, %v2493_v7  ;;  %2560 = vrot.lane.b32.xlu0 %v2523_v45, %s4420_s17 }
 0x8d4   : > { %v5936_v16 = vsub.f32 %v5772_v50, %v2492_v41  ;;  %2558 = vrot.lane.b32.xlu1 %v2522_v15, %s4420_s17  ;;  %v2467_v26 = vpop.xlane.xlu1 %2466 }
 0x8d5   : > { %v2525_v39 = vmul.f32 %v5932_v54, %v5932_v54  ;;  %v2495_v55 = vmul.f32 0.03125, %v2467_v26  ;;  %v2464_v40 = vpop.xlane.xlu0 %2463 }
 0x8d6   : > { %v2524_v59 = vmul.f32 %v5936_v16, %v5936_v16  ;;  %v2494_v38 = vmul.f32 0.03125, %v2464_v40 }
 0x8d7   : > { %v5944_v9 = vsub.f32 %v5783_v12, %v2495_v55  ;;  %2564 = vrot.lane.b32.xlu0 %v2525_v39, %s4420_s17 }
 0x8d8   : > { %v5948_v50 = vsub.f32 %v5786_v56, %v2494_v38  ;;  %2562 = vrot.lane.b32.xlu1 %v2524_v59, %s4420_s17  ;;  %v2473_v8 = vpop.xlane.xlu1 %2472 }
 0x8d9   : > { %v2527_v23 = vmul.f32 %v5944_v9, %v5944_v9  ;;  %v2497_v58 = vmul.f32 0.03125, %v2473_v8  ;;  %v2470_v17 = vpop.xlane.xlu0 %2469 }
 0x8da   : > { %v2526_v48 = vmul.f32 %v5948_v50, %v5948_v50  ;;  %v2496_v44 = vmul.f32 0.03125, %v2470_v17 }
 0x8db   : > { %v5956_v12 = vsub.f32 %v5797_v61, %v2497_v58  ;;  %2568 = vrot.lane.b32.xlu0 %v2527_v23, %s4420_s17 }
 0x8dc   : > { %v5960_v56 = vsub.f32 %v5800_v29, %v2496_v44  ;;  %2566 = vrot.lane.b32.xlu1 %v2526_v48, %s4420_s17  ;;  %v2479_v30 = vpop.xlane.xlu1 %2478 }
 0x8dd   : > { %v2529_v63 = vmul.f32 %v5956_v12, %v5956_v12  ;;  %v2499_v3 = vmul.f32 0.03125, %v2479_v30  ;;  %v2476_v10 = vpop.xlane.xlu0 %2475 }
 0x8de   : > { %v2528_v43 = vmul.f32 %v5960_v56, %v5960_v56  ;;  %v2498_v21 = vmul.f32 0.03125, %v2476_v10 }
 0x8df   : > { %v5968_v61 = vsub.f32 %v5811_v49, %v2499_v3  ;;  %2572 = vrot.lane.b32.xlu0 %v2529_v63, %s4420_s17 }
 0x8e0   : > { %v5972_v29 = vsub.f32 %v5814_v19, %v2498_v21  ;;  %2570 = vrot.lane.b32.xlu1 %v2528_v43, %s4420_s17  ;;  %v2485_v14 = vpop.xlane.xlu1 %2484 }
 0x8e1   : > { %v2531_v36 = vmul.f32 %v5968_v61, %v5968_v61  ;;  %v2501_v2 = vmul.f32 0.03125, %v2485_v14  ;;  %v2482_v60 = vpop.xlane.xlu0 %2481 }
 0x8e2   : > { %v2530_v35 = vmul.f32 %v5972_v29, %v5972_v29  ;;  %v2500_v46 = vmul.f32 0.03125, %v2482_v60 }
 0x8e3   : > { %v5980_v49 = vsub.f32 %v5825_v53, %v2501_v2  ;;  %2576 = vrot.lane.b32.xlu0 %v2531_v36, %s4420_s17 }
 0x8e4   : > { %v5984_v19 = vsub.f32 %v5827_v32, %v2500_v46  ;;  %2574 = vrot.lane.b32.xlu1 %v2530_v35, %s4420_s17 }
 0x8e5   : > { %v2533_v62 = vmul.f32 %v5980_v49, %v5980_v49 }
 0x8e6   : > { %v2532_v45 = vmul.f32 %v5984_v19, %v5984_v19 }
 0x8e7   : > { %2580 = vrot.lane.b32.xlu0 %v2533_v62, %s4420_s17 }
 0x8e8   : > { %2578 = vrot.lane.b32.xlu1 %v2532_v45, %s4420_s17 }
 0x93c   : > { %v2553_v7 = vpop.permute.xlu1 %2552 }
 0x93d   : > { %v2551_v53 = vpop.permute.xlu0 %2550  ;;  %v2601_v22 = vsel %vm845_vm1, %v2553_v7, 0.0  ;;  %v3741_v7 = vld [vmem:[%s6748_s3 + $0xa] ss:$0 sm:$0xff] }
 0x93e   : > { %2602 = vadd.xlane.f32.xlu0 %v2601_v22  ;;  %v2598_v32 = vsel %vm845_vm1, %v2551_v53, 0.0  ;;  %v3740_v53 = vld [vmem:[%s6748_s3 + $0x9] ss:$0 sm:$0xff]  ;;  %v2758_v22 = vld [vmem:[%s6752_s7] sm:$0xff] }
 0x93f   : > { %2599 = vadd.xlane.f32.xlu1 %v2598_v32  ;;  %v2759_v32 = vld [vmem:[%s6752_s7 + $0x8] sm:$0xff] }
 0x941   : > { %v2557_v15 = vpop.permute.xlu0 %2556 }
 0x942   : > { %v2555_v41 = vpop.permute.xlu1 %2554  ;;  %v2607_v26 = vsel %vm845_vm1, %v2557_v15, 0.0  ;;  %v2760_v15 = vld [vmem:[%s6752_s7 + $0x10] sm:$0xff] }
 0x943   : > { %v2604_v39 = vsel %vm845_vm1, %v2555_v41, 0.0  ;;  %2608 = vadd.xlane.f32.xlu1 %v2607_v26  ;;  %v4010_v41 = vpack.c.bf16 %v2759_v32, %v2758_v22  ;;  %v2761_v26 = vld [vmem:[%s6752_s7 + $0x18] sm:$0xff] }
 0x944   : > { %2605 = vadd.xlane.f32.xlu0 %v2604_v39  ;;  %v4014_v39 = vpack.c.bf16 %v2761_v26, %v2760_v15 }
 0x945   : > { %v2561_v55 = vpop.permute.xlu0 %2560  ;;  %4011 = vmatprep.subr.bf16.mxu1 %v4010_v41 }
 0x946   : > { %v2559_v40 = vpop.permute.xlu1 %2558  ;;  %v2613_v59 = vsel %vm845_vm1, %v2561_v55, 0.0  ;;  %4013 = vmatpush3.bf16.msra.mxu1 %v4010_v41 }
 0x947   : > { %v2610_v38 = vsel %vm845_vm1, %v2559_v40, 0.0  ;;  %2614 = vadd.xlane.f32.xlu1 %v2613_v59  ;;  %4015 = vmatprep.subr.bf16.mxu1 %v4014_v39 }
 0x948   : > { %2611 = vadd.xlane.f32.xlu0 %v2610_v38 }
 0x949   : > { %v2565_v8 = vpop.permute.xlu0 %2564 }
 0x94a   : > { %v2563_v23 = vpop.permute.xlu1 %2562  ;;  %v2619_v58 = vsel %vm845_vm1, %v2565_v8, 0.0  ;;  %4017 = vmatpush3.bf16.msra.mxu1 %v4014_v39 }
 0x94b   : > { %v2616_v17 = vsel %vm845_vm1, %v2563_v23, 0.0  ;;  %2620 = vadd.xlane.f32.xlu1 %v2619_v58 }
 0x94c   : > { %2617 = vadd.xlane.f32.xlu0 %v2616_v17 }
 0x94d   : > { %v2569_v48 = vpop.permute.xlu0 %2568 }
 0x94e   : > { %v2567_v44 = vpop.permute.xlu1 %2566  ;;  %v2625_v30 = vsel %vm845_vm1, %v2569_v48, 0.0 }
 0x94f   : > { %v2622_v63 = vsel %vm845_vm1, %v2567_v44, 0.0  ;;  %2626 = vadd.xlane.f32.xlu1 %v2625_v30 }
 0x950   : > { %2623 = vadd.xlane.f32.xlu0 %v2622_v63 }
 0x951   : > { %v2573_v3 = vpop.permute.xlu0 %2572 }
 0x952   : > { %v2571_v10 = vpop.permute.xlu1 %2570  ;;  %v2631_v43 = vsel %vm845_vm1, %v2573_v3, 0.0 }
 0x953   : > { %v2628_v21 = vsel %vm845_vm1, %v2571_v10, 0.0  ;;  %2632 = vadd.xlane.f32.xlu1 %v2631_v43 }
 0x954   : > { %2629 = vadd.xlane.f32.xlu0 %v2628_v21 }
 0x955   : > { %v2577_v14 = vpop.permute.xlu0 %2576 }
 0x956   : > { %v2575_v36 = vpop.permute.xlu1 %2574  ;;  %v2637_v2 = vsel %vm845_vm1, %v2577_v14, 0.0 }
 0x957   : > { %v2634_v60 = vsel %vm845_vm1, %v2575_v36, 0.0  ;;  %2638 = vadd.xlane.f32.xlu1 %v2637_v2 }
 0x958   : > { %2635 = vadd.xlane.f32.xlu0 %v2634_v60 }
 0x959   : > { %v2581_v35 = vpop.permute.xlu0 %2580 }
 0x95a   : > { %v2579_v46 = vpop.permute.xlu1 %2578  ;;  %v2643_v62 = vsel %vm845_vm1, %v2581_v35, 0.0 }
 0x95b   : > { %v2640_v45 = vsel %vm845_vm1, %v2579_v46, 0.0  ;;  %2644 = vadd.xlane.f32.xlu1 %v2643_v62 }
 0x95c   : > { %2641 = vadd.xlane.f32.xlu0 %v2640_v45 }
 0x96c   : > { %2739 = vrot.lane.b32.xlu1 %v3741_v7, %s4418_s18 }
 0x972   : > { %2715 = vrot.lane.b32.xlu0 %v3740_v53, %s4418_s18  ;;  %s4359_s18 = scalar_lea.vmem %s4358_s19, 4096 }
 0x973   : > { %p4361_p1 = scmp.lt.s32.totalorder %s4359_s18, %s4353_s12 }
 0x975   : > { %p4362_p2 = por %p4361_p1, %p4360_p0 }
 0x977   : > { %p4363_p3 = pnand %p4362_p2, %p4356_p13 }
 0x9cb   : > { %v2603_v55 = vpop.xlane.xlu0 %2602 }
 0x9cc   : > { %v2600_v40 = vpop.xlane.xlu1 %2599  ;;  %v2647_v23 = vmul.f32 0.03125, %v2603_v55 }
 0x9cd   : > { %v2646_v17 = vmul.f32 0.03125, %v2600_v40 }
 0x9ce   : > { %v2663_v63 = vadd.f32 1e-05, %v2647_v23 }
 0x9cf   : > { %v2662_v10 = vadd.f32 1e-05, %v2646_v17 }
 0x9d0   : > { %v2609_v59 = vpop.xlane.xlu1 %2608  ;;  %4257 = vrsqrt.f32 %v2663_v63 }
 0x9d1   : > { %v2606_v38 = vpop.xlane.xlu0 %2605  ;;  %v2649_v48 = vmul.f32 0.03125, %v2609_v59  ;;  %4259 = vrsqrt.f32 %v2662_v10 }
 0x9d2   : > { %v2648_v44 = vmul.f32 0.03125, %v2606_v38 }
 0x9d3   : > { %v2665_v43 = vadd.f32 1e-05, %v2649_v48 }
 0x9d4   : > { %v2615_v8 = vpop.xlane.xlu1 %2614  ;;  %v2664_v21 = vadd.f32 1e-05, %v2648_v44 }
 0x9d5   : > { %v2612_v58 = vpop.xlane.xlu0 %2611  ;;  %v2651_v14 = vmul.f32 0.03125, %v2615_v8  ;;  %4261 = vrsqrt.f32 %v2665_v43 }
 0x9d6   : > { %v2650_v2 = vmul.f32 0.03125, %v2612_v58  ;;  %4263 = vrsqrt.f32 %v2664_v21 }
 0x9d7   : > { %v2667_v35 = vadd.f32 1e-05, %v2651_v14 }
 0x9d8   : > { %v2621_v30 = vpop.xlane.xlu1 %2620  ;;  %v2666_v45 = vadd.f32 1e-05, %v2650_v2 }
 0x9d9   : > { %v2618_v3 = vpop.xlane.xlu0 %2617  ;;  %v2653_v46 = vmul.f32 0.03125, %v2621_v30  ;;  %4265 = vrsqrt.f32 %v2667_v35 }
 0x9da   : > { %v2652_v7 = vmul.f32 0.03125, %v2618_v3  ;;  %4267 = vrsqrt.f32 %v2666_v45  ;;  %v4258_v59 = vpop.eup %4257 }
 0x9db   : > { %v2669_v15 = vadd.f32 1e-05, %v2653_v46  ;;  %v4260_v23 = vpop.eup %4259  ;;  %v2695_v43 = vmul.f32 %v4258_v59, %v5898_v31 }
 0x9dc   : > { %v2627_v36 = vpop.xlane.xlu1 %2626  ;;  %v2668_v26 = vadd.f32 1e-05, %v2652_v7  ;;  %v2694_v21 = vmul.f32 %v4260_v23, %v5901_v20 }
 0x9dd   : > { %v2624_v60 = vpop.xlane.xlu0 %2623  ;;  %v2655_v22 = vmul.f32 0.03125, %v2627_v36  ;;  %4269 = vrsqrt.f32 %v2669_v15 }
 0x9de   : > { %v2654_v32 = vmul.f32 0.03125, %v2624_v60  ;;  %4271 = vrsqrt.f32 %v2668_v26 }
 0x9df   : > { %v2671_v40 = vadd.f32 1e-05, %v2655_v22  ;;  %v4262_v58 = vpop.eup %4261 }
 0x9e0   : > { %v2633_v62 = vpop.xlane.xlu1 %2632  ;;  %v2670_v38 = vadd.f32 1e-05, %v2654_v32  ;;  %v4264_v30 = vpop.eup %4263  ;;  %v2697_v2 = vmul.f32 %v4262_v58, %v5910_v25 }
 0x9e1   : > { %v2630_v53 = vpop.xlane.xlu0 %2629  ;;  %v2657_v39 = vmul.f32 0.03125, %v2633_v62  ;;  %4273 = vrsqrt.f32 %v2671_v40  ;;  %v2696_v60 = vmul.f32 %v4264_v30, %v5913_v57 }
 0x9e2   : > { %v2656_v8 = vmul.f32 0.03125, %v2630_v53  ;;  %4275 = vrsqrt.f32 %v2670_v38 }
 0x9e3   : > { %v2673_v17 = vadd.f32 1e-05, %v2657_v39  ;;  %v4266_v35 = vpop.eup %4265 }
 0x9e4   : > { %v2639_v41 = vpop.xlane.xlu1 %2638  ;;  %v2672_v3 = vadd.f32 1e-05, %v2656_v8  ;;  %v4268_v53 = vpop.eup %4267  ;;  %v2699_v26 = vmul.f32 %v4266_v35, %v5920_v13 }
 0x9e5   : > { %v2636_v55 = vpop.xlane.xlu0 %2635  ;;  %v2659_v63 = vmul.f32 0.03125, %v2639_v41  ;;  %4277 = vrsqrt.f32 %v2673_v17  ;;  %v2698_v39 = vmul.f32 %v4268_v53, %v5924_v28 }
 0x9e6   : > { %v2658_v10 = vmul.f32 0.03125, %v2636_v55  ;;  %4279 = vrsqrt.f32 %v2672_v3 }
 0x9e7   : > { %v2675_v46 = vadd.f32 1e-05, %v2659_v63  ;;  %v4270_v57 = vpop.eup %4269 }
 0x9e8   : > { %v2645_v48 = vpop.xlane.xlu1 %2644  ;;  %v2674_v31 = vadd.f32 1e-05, %v2658_v10  ;;  %v4272_v55 = vpop.eup %4271 }
 0x9e9   : > { %v2642_v44 = vpop.xlane.xlu0 %2641  ;;  %v2661_v62 = vmul.f32 0.03125, %v2645_v48  ;;  %4281 = vrsqrt.f32 %v2675_v46  ;;  %v2701_v48 = vmul.f32 %v4270_v57, %v5932_v54  ;;  %v2700_v13 = vmul.f32 %v4272_v55, %v5936_v16 }
 0x9ea   : > { %v2660_v20 = vmul.f32 0.03125, %v2642_v44  ;;  %4283 = vrsqrt.f32 %v2674_v31 }
 0x9eb   : > { %v2677_v41 = vadd.f32 1e-05, %v2661_v62  ;;  %v4274_v59 = vpop.eup %4273 }
 0x9ec   : > { %v6033_v36 = vpop.permute.xlu1 %2739  ;;  %v2676_v40 = vadd.f32 1e-05, %v2660_v20  ;;  %v4276_v17 = vpop.eup %4275  ;;  %v2703_v30 = vmul.f32 %v4274_v59, %v5944_v9 }
 0x9ed   : > { %v6031_v14 = vpop.permute.xlu0 %2715  ;;  %4285 = vrsqrt.f32 %v2677_v41  ;;  %v2702_v54 = vmul.f32 %v4276_v17, %v5948_v50 }
 0x9ee   : > { %v2719_v45 = vmul.f32 %v6031_v14, %v2695_v43  ;;  %v2718_v7 = vmul.f32 %v6031_v14, %v2694_v21  ;;  %v2721_v15 = vmul.f32 %v6031_v14, %v2697_v2  ;;  %v2720_v25 = vmul.f32 %v6031_v14, %v2696_v60 }
 0x9ef   : > { %v2723_v23 = vmul.f32 %v6031_v14, %v2699_v26  ;;  %v2722_v58 = vmul.f32 %v6031_v14, %v2698_v39  ;;  %v4278_v28 = vpop.eup %4277  ;;  %4287 = vrsqrt.f32 %v2676_v40  ;;  %v2725_v44 = vmul.f32 %v6031_v14, %v2701_v48 }
 0x9f0   : > { %v2743_v22 = vadd.f32 %v6033_v36, %v2719_v45  ;;  %v2742_v32 = vadd.f32 %v6033_v36, %v2718_v7  ;;  %v2745_v38 = vadd.f32 %v6033_v36, %v2721_v15  ;;  %v2744_v8 = vadd.f32 %v6033_v36, %v2720_v25  ;;  %v4280_v43 = vpop.eup %4279 }
 0x9f1   : > { %v2747_v63 = vadd.f32 %v6033_v36, %v2723_v23  ;;  %v2746_v3 = vadd.f32 %v6033_v36, %v2722_v58  ;;  %v2724_v10 = vmul.f32 %v6031_v14, %v2700_v13  ;;  %v2749_v16 = vadd.f32 %v6033_v36, %v2725_v44 }
 0x9f2   : > { %2784 = vrot.lane.b32.xlu0 %v2743_v22, %s4420_s17  ;;  %2782 = vrot.lane.b32.xlu1 %v2742_v32, %s4420_s17  ;;  %v2705_v21 = vmul.f32 %v4278_v28, %v5956_v12  ;;  %v2727_v60 = vmul.f32 %v6031_v14, %v2703_v30  ;;  %v2726_v35 = vmul.f32 %v6031_v14, %v2702_v54 }
 0x9f3   : > { %v4282_v2 = vpop.eup %4281  ;;  %v2748_v9 = vadd.f32 %v6033_v36, %v2724_v10  ;;  %v2704_v46 = vmul.f32 %v4280_v43, %v5960_v56 }
 0x9f4   : > { %v4284_v62 = vpop.eup %4283  ;;  %v2729_v50 = vmul.f32 %v6031_v14, %v2705_v21  ;;  %v2707_v45 = vmul.f32 %v4282_v2, %v5968_v61  ;;  %v2751_v12 = vadd.f32 %v6033_v36, %v2727_v60  ;;  %v2750_v53 = vadd.f32 %v6033_v36, %v2726_v35 }
 0x9f5   : > { %v2728_v31 = vmul.f32 %v6031_v14, %v2704_v46  ;;  %v2706_v20 = vmul.f32 %v4284_v62, %v5972_v29 }
 0x9f6   : > { %2788 = vrot.lane.b32.xlu0 %v2745_v38, %s4420_s17  ;;  %2786 = vrot.lane.b32.xlu1 %v2744_v8, %s4420_s17  ;;  %v2753_v56 = vadd.f32 %v6033_v36, %v2729_v50  ;;  %v2731_v32 = vmul.f32 %v6031_v14, %v2707_v45 }
 0x9f7   : > { %v4286_v7 = vpop.eup %4285  ;;  %v2752_v61 = vadd.f32 %v6033_v36, %v2728_v31  ;;  %v2730_v15 = vmul.f32 %v6031_v14, %v2706_v20 }
 0x9f8   : > { %v2709_v25 = vmul.f32 %v4286_v7, %v5980_v49  ;;  %v2755_v29 = vadd.f32 %v6033_v36, %v2731_v32 }
 0x9f9   : > { %v4288_v22 = vpop.eup %4287  ;;  %v2754_v41 = vadd.f32 %v6033_v36, %v2730_v15 }
 0x9fa   : > { %2792 = vrot.lane.b32.xlu0 %v2747_v63, %s4420_s17  ;;  %2790 = vrot.lane.b32.xlu1 %v2746_v3, %s4420_s17  ;;  %v2708_v57 = vmul.f32 %v4288_v22, %v5984_v19  ;;  %v2733_v26 = vmul.f32 %v6031_v14, %v2709_v25  ;;  %v3742_v3 = vld [vmem:[%s6748_s3 + $0xb] ss:$0 sm:$0xff] }
 0x9fc   : > { %v2732_v39 = vmul.f32 %v6031_v14, %v2708_v57  ;;  %v2757_v49 = vadd.f32 %v6033_v36, %v2733_v26 }
 0x9fe   : > { %2796 = vrot.lane.b32.xlu0 %v2749_v16, %s4420_s17  ;;  %2794 = vrot.lane.b32.xlu1 %v2748_v9, %s4420_s17  ;;  %v2756_v19 = vadd.f32 %v6033_v36, %v2732_v39 }
 0xa02   : > { %2800 = vrot.lane.b32.xlu0 %v2751_v12, %s4420_s17  ;;  %2798 = vrot.lane.b32.xlu1 %v2750_v53, %s4420_s17 }
 0xa06   : > { %2804 = vrot.lane.b32.xlu0 %v2753_v56, %s4420_s17  ;;  %2802 = vrot.lane.b32.xlu1 %v2752_v61, %s4420_s17 }
 0xa0a   : > { %2808 = vrot.lane.b32.xlu0 %v2755_v29, %s4420_s17  ;;  %2806 = vrot.lane.b32.xlu1 %v2754_v41, %s4420_s17 }
 0xa0e   : > { %2812 = vrot.lane.b32.xlu0 %v2757_v49, %s4420_s17  ;;  %2810 = vrot.lane.b32.xlu1 %v2756_v19, %s4420_s17 }
 0xa64   : > { %v2785_v55 = vpop.permute.xlu0 %2784  ;;  %v2783_v40 = vpop.permute.xlu1 %2782 }
 0xa65   : > { %3958 = vmatprep.mubr.msk.f32.mxu1 %vm845_vm1, %v2783_v40 }
 0xa66   : > { %3959 = vmatmul.mubr.msk.f32.vlgmr.msra.gmra.mrb[16].mxu1 %vm845_vm1, %v2785_v55 }
 0xa68   : > { %v2789_v59 = vpop.permute.xlu0 %2788  ;;  %v2787_v14 = vpop.permute.xlu1 %2786 }
 0xa69   : > { %3961 = vmatprep.mubr.msk.f32.mxu1 %vm845_vm1, %v2787_v14 }
 0xa6a   : > { %3962 = vmatmul.mubr.msk.f32.gmra.mrb[18].mxu1 %vm845_vm1, %v2789_v59 }
 0xa6c   : > { %v2793_v38 = vpop.permute.xlu0 %2792  ;;  %v2791_v8 = vpop.permute.xlu1 %2790 }
 0xa6d   : > { %3964 = vmatprep.mubr.msk.f32.mxu1 %vm845_vm1, %v2791_v8 }
 0xa6e   : > { %3965 = vmatmul.mubr.msk.f32.gmra.mrb[20].mxu1 %vm845_vm1, %v2793_v38 }
 0xa70   : > { %v2797_v36 = vpop.permute.xlu0 %2796  ;;  %v2795_v23 = vpop.permute.xlu1 %2794 }
 0xa71   : > { %3967 = vmatprep.mubr.msk.f32.mxu1 %vm845_vm1, %v2795_v23 }
 0xa72   : > { %3968 = vmatmul.mubr.msk.f32.gmra.mrb[22].mxu1 %vm845_vm1, %v2797_v36 }
 0xa74   : > { %v2801_v58 = vpop.permute.xlu0 %2800  ;;  %v2799_v17 = vpop.permute.xlu1 %2798 }
 0xa75   : > { %3970 = vmatprep.mubr.msk.f32.mxu1 %vm845_vm1, %v2799_v17 }
 0xa76   : > { %3971 = vmatmul.mubr.msk.f32.gmra.mrb[24].mxu1 %vm845_vm1, %v2801_v58 }
 0xa78   : > { %v2805_v48 = vpop.permute.xlu0 %2804  ;;  %v2803_v13 = vpop.permute.xlu1 %2802 }
 0xa79   : > { %3973 = vmatprep.mubr.msk.f32.mxu1 %vm845_vm1, %v2803_v13 }
 0xa7a   : > { %3974 = vmatmul.mubr.msk.f32.gmra.mrb[26].mxu1 %vm845_vm1, %v2805_v48 }
 0xa7c   : > { %v2809_v28 = vpop.permute.xlu0 %2808  ;;  %v2807_v44 = vpop.permute.xlu1 %2806 }
 0xa7d   : > { %3976 = vmatprep.mubr.msk.f32.mxu1 %vm845_vm1, %v2807_v44 }
 0xa7e   : > { %3977 = vmatmul.mubr.msk.f32.gmra.mrb[28].mxu1 %vm845_vm1, %v2809_v28 }
 0xa80   : > { %v2813_v30 = vpop.permute.xlu0 %2812  ;;  %v2811_v63 = vpop.permute.xlu1 %2810 }
 0xa81   : > { %3979 = vmatprep.mubr.msk.f32.mxu1 %vm845_vm1, %v2811_v63 }
 0xa82   : > { %3980 = vmatmul.mubr.msk.f32.gmra.mrb[30].mxu1 %vm845_vm1, %v2813_v30 }
 0xb39   : > { %v3960_v10 = vpop.f32.mrb[16].mxu1 }
 0xb3a   : > { %v6116_v54 = vadd.f32 %v3960_v10, %v3742_v3  ;;  %v2912_v43 = vpop.f32.mrb[17].mxu1 }
 0xb3b   : > { %v6118_v16 = vadd.f32 %v3742_v3, %v2912_v43  ;;  %v3040_v43 = vlaneseq }
 0xb3c   : > { %v2995_v21 = vsel %vm2991_vm3, %v6116_v54, -inf }
 0xb3d   : > { %2996 = vmax.xlane.f32.xlu0 %v2995_v21  ;;  %v3963_v2 = vpop.f32.mrb[18].mxu1  ;;  %v2992_v9 = vsel %vm2991_vm3, %v6118_v16, -inf  ;;  %v6180_v21 = vand.u32 127, %v3040_v43 }
 0xb3e   : > { %v6124_v60 = vadd.f32 %v3963_v2, %v3742_v3  ;;  %2993 = vmax.xlane.f32.xlu1 %v2992_v9  ;;  %v2922_v35 = vpop.f32.mrb[19].mxu1 }
 0xb3f   : > { %v6126_v46 = vadd.f32 %v3742_v3, %v2922_v35 }
 0xb40   : > { %v3001_v62 = vsel %vm2991_vm3, %v6124_v60, -inf }
 0xb41   : > { %v3966_v50 = vpop.f32.mrb[20].mxu1  ;;  %v2998_v45 = vsel %vm2991_vm3, %v6126_v46, -inf }
 0xb42   : > { %v6132_v7 = vadd.f32 %v3966_v50, %v3742_v3  ;;  %3002 = vmax.xlane.f32.xlu1 %v3001_v62  ;;  %2999 = vmax.xlane.f32.xlu0 %v2998_v45  ;;  %v2932_v12 = vpop.f32.mrb[21].mxu1 }
 0xb43   : > { %v6134_v53 = vadd.f32 %v3742_v3, %v2932_v12 }
 0xb44   : > { %v3007_v31 = vsel %vm2991_vm3, %v6132_v7, -inf }
 0xb45   : > { %v3969_v20 = vpop.f32.mrb[22].mxu1  ;;  %v3004_v22 = vsel %vm2991_vm3, %v6134_v53, -inf }
 0xb46   : > { %v6140_v56 = vadd.f32 %v3969_v20, %v3742_v3  ;;  %3008 = vmax.xlane.f32.xlu1 %v3007_v31  ;;  %3005 = vmax.xlane.f32.xlu0 %v3004_v22  ;;  %v2942_v32 = vpop.f32.mrb[23].mxu1 }
 0xb47   : > { %v6142_v61 = vadd.f32 %v3742_v3, %v2942_v32 }
 0xb48   : > { %v3013_v15 = vsel %vm2991_vm3, %v6140_v56, -inf }
 0xb49   : > { %v3972_v25 = vpop.f32.mrb[24].mxu1  ;;  %v3010_v57 = vsel %vm2991_vm3, %v6142_v61, -inf }
 0xb4a   : > { %v6148_v29 = vadd.f32 %v3972_v25, %v3742_v3  ;;  %3014 = vmax.xlane.f32.xlu1 %v3013_v15  ;;  %3011 = vmax.xlane.f32.xlu0 %v3010_v57  ;;  %v2952_v41 = vpop.f32.mrb[25].mxu1 }
 0xb4b   : > { %v6150_v26 = vadd.f32 %v3742_v3, %v2952_v41 }
 0xb4c   : > { %v3019_v39 = vsel %vm2991_vm3, %v6148_v29, -inf }
 0xb4d   : > { %v3975_v49 = vpop.f32.mrb[26].mxu1  ;;  %v3016_v19 = vsel %vm2991_vm3, %v6150_v26, -inf }
 0xb4e   : > { %v6156_v55 = vadd.f32 %v3975_v49, %v3742_v3  ;;  %3020 = vmax.xlane.f32.xlu1 %v3019_v39  ;;  %3017 = vmax.xlane.f32.xlu0 %v3016_v19  ;;  %v2962_v40 = vpop.f32.mrb[27].mxu1 }
 0xb4f   : > { %v6158_v59 = vadd.f32 %v3742_v3, %v2962_v40 }
 0xb50   : > { %v3025_v14 = vsel %vm2991_vm3, %v6156_v55, -inf }
 0xb51   : > { %v3978_v38 = vpop.f32.mrb[28].mxu1  ;;  %v3022_v8 = vsel %vm2991_vm3, %v6158_v59, -inf }
 0xb52   : > { %v6164_v36 = vadd.f32 %v3978_v38, %v3742_v3  ;;  %3026 = vmax.xlane.f32.xlu1 %v3025_v14  ;;  %3023 = vmax.xlane.f32.xlu0 %v3022_v8  ;;  %v2972_v23 = vpop.f32.mrb[29].mxu1 }
 0xb53   : > { %v6166_v58 = vadd.f32 %v3742_v3, %v2972_v23 }
 0xb54   : > { %v3031_v17 = vsel %vm2991_vm3, %v6164_v36, -inf }
 0xb55   : > { %v3981_v48 = vpop.f32.mrb[30].mxu1  ;;  %v3028_v13 = vsel %vm2991_vm3, %v6166_v58, -inf }
 0xb56   : > { %v6172_v28 = vadd.f32 %v3981_v48, %v3742_v3  ;;  %3032 = vmax.xlane.f32.xlu1 %v3031_v17  ;;  %3029 = vmax.xlane.f32.xlu0 %v3028_v13  ;;  %v2982_v44 = vpop.f32.mrb[31].mxu1 }
 0xb57   : > { %v6174_v30 = vadd.f32 %v3742_v3, %v2982_v44 }
 0xb58   : > { %v3037_v63 = vsel %vm2991_vm3, %v6172_v28, -inf }
 0xb59   : > { %v3034_v10 = vsel %vm2991_vm3, %v6174_v30, -inf }
 0xb5a   : > { %3038 = vmax.xlane.f32.xlu1 %v3037_v63  ;;  %3035 = vmax.xlane.f32.xlu0 %v3034_v10 }
 0xbca   : > { %v6182_v2 = vpop.xlane.xlu0 %2996 }
 0xbcb   : > { %vm3043_vm4 = vcmp.eq.f32.partialorder %v6116_v54, %v6182_v2  ;;  %v6186_v9 = vpop.xlane.xlu1 %2993 }
 0xbcc   : > { %vm3042_vm5 = vcmp.eq.f32.partialorder %v6118_v16, %v6186_v9  ;;  %v3059_v3 = vsel %vm3043_vm4, %v6180_v21, 5 }
 0xbcd   : > { %v6192_v35 = vsel %vm2991_vm3, %v3059_v3, 2147483647  ;;  %v3058_v62 = vsel %vm3042_vm5, %v6180_v21, 5 }
 0xbce   : > { %v3091_v50 = vshra.s32 %v6192_v35, 16  ;;  %v6197_v45 = vsel %vm2991_vm3, %v3058_v62, 2147483647 }
 0xbcf   : > { %v6199_v12 = vpop.xlane.xlu0 %2999  ;;  %v6201_v31 = vpop.xlane.xlu1 %3002  ;;  %v3076_v20 = vshra.s32 %v6197_v45, 16 }
 0xbd0   : > { %6798 = vst [vmem:[#allocation21_spill] sm:$0xff] %v6201_v31  ;;  %vm3044_vm6 = vcmp.eq.f32.partialorder %v6126_v46, %v6199_v12  ;;  %vm3045_vm7 = vcmp.eq.f32.partialorder %v6124_v60, %v6201_v31  ;;  %v6208_v22 = vcvt.s32.f32 %v3091_v50  ;;  %v3316_v1 = vsub.f32 %v6126_v46, %v6199_v12 }
 0xbd1   : > { %v6210_v32 = vcvt.s32.f32 %v3076_v20  ;;  %v3060_v15 = vsel %vm3044_vm6, %v6180_v21, 5  ;;  %v3061_v57 = vsel %vm3045_vm7, %v6180_v21, 5 }
 0xbd2   : > { %v6214_v25 = vsel %vm2991_vm3, %v3060_v15, 2147483647  ;;  %3094 = vmin.xlane.f32.xlu1 %v6208_v22  ;;  %v6225_v19 = vsel %vm2991_vm3, %v3061_v57, 2147483647  ;;  %v3334_v52 = vmul.f32 1.442695, %v3316_v1 }
 0xbd3   : > { %v6218_v41 = vpop.xlane.xlu0 %3005  ;;  %3079 = vmin.xlane.f32.xlu0 %v6210_v32  ;;  %v6221_v39 = vpop.xlane.xlu1 %3008  ;;  %v3106_v49 = vshra.s32 %v6214_v25, 16  ;;  %v3121_v14 = vshra.s32 %v6225_v19, 16 }
 0xbd4   : > { %6799 = vst [vmem:[#allocation22_spill] sm:$0xff] %v6218_v41  ;;  %6800 = vst [vmem:[#allocation23_spill] sm:$0xff] %v6221_v39  ;;  %vm3046_vm8 = vcmp.eq.f32.partialorder %v6134_v53, %v6218_v41  ;;  %vm3047_vm9 = vcmp.eq.f32.partialorder %v6132_v7, %v6221_v39 }
 0xbd5   : > { %v6231_v40 = vcvt.s32.f32 %v3106_v49  ;;  %v3062_v38 = vsel %vm3046_vm8, %v6180_v21, 5  ;;  %v3063_v8 = vsel %vm3047_vm9, %v6180_v21, 5  ;;  %v6239_v17 = vcvt.s32.f32 %v3121_v14 }
 0xbd6   : > { %v6244_v13 = vsel %vm2991_vm3, %v3062_v38, 2147483647  ;;  %v6247_v44 = vsel %vm2991_vm3, %v3063_v8, 2147483647  ;;  %v3315_v49 = vsub.f32 %v6116_v54, %v6182_v2 }
 0xbd7   : > { %v6236_v23 = vpop.xlane.xlu0 %3011  ;;  %3109 = vmin.xlane.f32.xlu0 %v6231_v40  ;;  %v6241_v48 = vpop.xlane.xlu1 %3014  ;;  %3124 = vmin.xlane.f32.xlu1 %v6239_v17  ;;  %v3136_v63 = vshra.s32 %v6244_v13, 16  ;;  %v3151_v10 = vshra.s32 %v6247_v44, 16 }
 0xbd8   : > { %6801 = vst [vmem:[#allocation24_spill] sm:$0xff] %v6236_v23  ;;  %6802 = vst [vmem:[#allocation25_spill] sm:$0xff] %v6241_v48  ;;  %vm3048_vm10 = vcmp.eq.f32.partialorder %v6142_v61, %v6236_v23  ;;  %vm3049_vm11 = vcmp.eq.f32.partialorder %v6140_v56, %v6241_v48  ;;  %v3332_v47 = vmul.f32 1.442695, %v3315_v49 }
 0xbd9   : > { %v3064_v43 = vsel %vm3048_vm10, %v6180_v21, 5  ;;  %v3065_v3 = vsel %vm3049_vm11, %v6180_v21, 5  ;;  %v6260_v50 = vcvt.s32.f32 %v3136_v63  ;;  %v6262_v20 = vcvt.s32.f32 %v3151_v10 }
 0xbda   : > { %v6267_v57 = vsel %vm2991_vm3, %v3064_v43, 2147483647  ;;  %v6279_v38 = vsel %vm2991_vm3, %v3065_v3, 2147483647  ;;  %v3314_v10 = vsub.f32 %v6118_v16, %v6186_v9  ;;  %4289 = vpow2.f32 %v3332_v47 }
 0xbdb   : > { %v6258_v62 = vpop.xlane.xlu0 %3017  ;;  %v6264_v15 = vpop.xlane.xlu1 %3020  ;;  %3139 = vmin.xlane.f32.xlu0 %v6260_v50  ;;  %3154 = vmin.xlane.f32.xlu1 %v6262_v20  ;;  %v3166_v14 = vshra.s32 %v6267_v57, 16  ;;  %v3181_v8 = vshra.s32 %v6279_v38, 16  ;;  %v3319_v47 = vsub.f32 %v6132_v7, %v6221_v39 }
 0xbdc   : > { %vm3050_vm12 = vcmp.eq.f32.partialorder %v6150_v26, %v6258_v62  ;;  %vm3051_vm13 = vcmp.eq.f32.partialorder %v6148_v29, %v6264_v15 }
 0xbdd   : > { %v3066_v63 = vsel %vm3050_vm12, %v6180_v21, 5  ;;  %v3067_v54 = vsel %vm3051_vm13, %v6180_v21, 5  ;;  %v6288_v18 = vcvt.s32.f32 %v3166_v14  ;;  %v6302_v16 = vcvt.s32.f32 %v3181_v8 }
 0xbde   : > { %v6293_v37 = vsel %vm2991_vm3, %v3066_v63, 2147483647  ;;  %v6296_v3 = vsel %vm2991_vm3, %v3067_v54, 2147483647  ;;  %v3317_v14 = vsub.f32 %v6124_v60, %v6201_v31  ;;  %v3330_v8 = vmul.f32 1.442695, %v3314_v10 }
 0xbdf   : > { %v6286_v43 = vpop.xlane.xlu0 %3023  ;;  %v6290_v42 = vpop.xlane.xlu1 %3026  ;;  %3169 = vmin.xlane.f32.xlu0 %v6288_v18  ;;  %v3196_v63 = vshra.s32 %v6293_v37, 16  ;;  %3184 = vmin.xlane.f32.xlu1 %v6302_v16  ;;  %v3211_v49 = vshra.s32 %v6296_v3, 16 }
 0xbe0   : > { %vm3052_vm14 = vcmp.eq.f32.partialorder %v6158_v59, %v6286_v43  ;;  %vm3053_vm15 = vcmp.eq.f32.partialorder %v6156_v55, %v6290_v42  ;;  %v3336_v10 = vmul.f32 1.442695, %v3317_v14  ;;  %4291 = vpow2.f32 %v3330_v8 }
 0xbe1   : > { %v3068_v46 = vsel %vm3052_vm14, %v6180_v21, 5  ;;  %v3069_v54 = vsel %vm3053_vm15, %v6180_v21, 5  ;;  %v6316_v0 = vcvt.s32.f32 %v3196_v63  ;;  %v6328_v4 = vcvt.s32.f32 %v3211_v49 }
 0xbe2   : > { %v6321_v27 = vsel %vm2991_vm3, %v3068_v46, 2147483647  ;;  %v6324_v6 = vsel %vm2991_vm3, %v3069_v54, 2147483647  ;;  %v3318_v63 = vsub.f32 %v6134_v53, %v6218_v41  ;;  %4293 = vpow2.f32 %v3334_v52 }
 0xbe3   : > { %v6314_v5 = vpop.xlane.xlu0 %3029  ;;  %v6318_v60 = vpop.xlane.xlu1 %3032  ;;  %3199 = vmin.xlane.f32.xlu0 %v6316_v0  ;;  %v3226_v46 = vshra.s32 %v6321_v27, 16  ;;  %3214 = vmin.xlane.f32.xlu1 %v6328_v4  ;;  %v3241_v1 = vshra.s32 %v6324_v6, 16  ;;  %4295 = vpow2.f32 %v3336_v10  ;;  %v3320_v10 = vsub.f32 %v6142_v61, %v6236_v23 }
 0xbe4   : > { %vm3054_vm0 = vcmp.eq.f32.partialorder %v6166_v58, %v6314_v5  ;;  %vm3055_vm2 = vcmp.eq.f32.partialorder %v6164_v36, %v6318_v60  ;;  %v3338_v8 = vmul.f32 1.442695, %v3318_v63  ;;  %v4290_v61 = vpop.eup %4289 }
 0xbe5   : > { %v3070_v49 = vsel %vm3054_vm0, %v6180_v21, 5  ;;  %v3071_v14 = vsel %vm3055_vm2, %v6180_v21, 5  ;;  %v6344_v54 = vcvt.s32.f32 %v3226_v46  ;;  %v6356_v39 = vcvt.s32.f32 %v3241_v1 }
 0xbe6   : > { %v6349_v33 = vsel %vm2991_vm3, %v3070_v49, 2147483647  ;;  %v6352_v7 = vsel %vm2991_vm3, %v3071_v14, 2147483647  ;;  %v3340_v49 = vmul.f32 1.442695, %v3319_v47  ;;  %v3321_v47 = vsub.f32 %v6140_v56, %v6241_v48 }
 0xbe7   : > { %v6342_v53 = vpop.xlane.xlu0 %3035  ;;  %v6346_v51 = vpop.xlane.xlu1 %3038  ;;  %3229 = vmin.xlane.f32.xlu0 %v6344_v54  ;;  %v3256_v46 = vshra.s32 %v6349_v33, 16  ;;  %3244 = vmin.xlane.f32.xlu1 %v6356_v39  ;;  %v3271_v14 = vshra.s32 %v6352_v7, 16  ;;  %4297 = vpow2.f32 %v3338_v8  ;;  %v3322_v56 = vsub.f32 %v6150_v26, %v6258_v62 }
 0xbe8   : > { %vm3056_vm4 = vcmp.eq.f32.partialorder %v6174_v30, %v6342_v53  ;;  %vm3057_vm5 = vcmp.eq.f32.partialorder %v6172_v28, %v6346_v51  ;;  %4299 = vpow2.f32 %v3340_v49  ;;  %v3323_v48 = vsub.f32 %v6148_v29, %v6264_v15 }
 0xbe9   : > { %v3072_v52 = vsel %vm3056_vm4, %v6180_v21, 5  ;;  %v3073_v11 = vsel %vm3057_vm5, %v6180_v21, 5  ;;  %v6368_v63 = vcvt.s32.f32 %v3256_v46  ;;  %v6378_v34 = vcvt.s32.f32 %v3271_v14 }
 0xbea   : > { %v6371_v1 = vsel %vm2991_vm3, %v3072_v52, 2147483647  ;;  %v6374_v24 = vsel %vm2991_vm3, %v3073_v11, 2147483647  ;;  %v3342_v11 = vmul.f32 1.442695, %v3320_v10  ;;  %v4292_v23 = vpop.eup %4291  ;;  %v3324_v8 = vsub.f32 %v6158_v59, %v6286_v43 }
 0xbeb   : > { %v3286_v41 = vshra.s32 %v6371_v1, 16  ;;  %v3301_v21 = vshra.s32 %v6374_v24, 16  ;;  %3259 = vmin.xlane.f32.xlu0 %v6368_v63  ;;  %3274 = vmin.xlane.f32.xlu1 %v6378_v34  ;;  %v3344_v14 = vmul.f32 1.442695, %v3321_v47  ;;  %v3348_v10 = vmul.f32 1.442695, %v3323_v48 }
 0xbec   : > { %v4294_v31 = vpop.eup %4293  ;;  %4301 = vpow2.f32 %v3342_v11  ;;  %v3325_v26 = vsub.f32 %v6156_v55, %v6290_v42  ;;  %v3362_v49 = vsel %vm2991_vm3, %v4292_v23, 0.0  ;;  %v3365_v29 = vsel %vm2991_vm3, %v4290_v61, 0.0 }
 0xbed   : > { %v6384_v46 = vcvt.s32.f32 %v3286_v41  ;;  %v6386_v52 = vcvt.s32.f32 %v3301_v21  ;;  %v4296_v41 = vpop.eup %4295  ;;  %v3346_v21 = vmul.f32 1.442695, %v3322_v56  ;;  %4303 = vpow2.f32 %v3344_v14 }
 0xbee   : > { %v3350_v47 = vmul.f32 1.442695, %v3324_v8  ;;  %v3326_v11 = vsub.f32 %v6166_v58, %v6314_v5  ;;  %v3352_v56 = vmul.f32 1.442695, %v3325_v26  ;;  %v3327_v59 = vsub.f32 %v6164_v36, %v6318_v60 }
 0xbef   : > { %3289 = vmin.xlane.f32.xlu0 %v6384_v46  ;;  %3304 = vmin.xlane.f32.xlu1 %v6386_v52  ;;  %4305 = vpow2.f32 %v3346_v21  ;;  %v3368_v48 = vsel %vm2991_vm3, %v4294_v31, 0.0  ;;  %v3371_v55 = vsel %vm2991_vm3, %v4296_v41, 0.0  ;;  %v3328_v21 = vsub.f32 %v6174_v30, %v6342_v53 }
 0xbf0   : > { %4307 = vpow2.f32 %v3348_v10  ;;  %v3354_v61 = vmul.f32 1.442695, %v3326_v11  ;;  %v3356_v58 = vmul.f32 1.442695, %v3327_v59  ;;  %v3329_v8 = vsub.f32 %v6172_v28, %v6346_v51 }
 0xbf1   : > { %v4298_v14 = vpop.eup %4297  ;;  %4309 = vpow2.f32 %v3350_v47  ;;  %v3358_v41 = vmul.f32 1.442695, %v3328_v21 }
 0xbf2   : > { %v4300_v23 = vpop.eup %4299  ;;  %4311 = vpow2.f32 %v3352_v56  ;;  %v3374_v36 = vsel %vm2991_vm3, %v4298_v14, 0.0 }
 0xbf3   : > { %3363 = vadd.xlane.f32.xlu0 %v3362_v49  ;;  %3366 = vadd.xlane.f32.xlu1 %v3365_v29  ;;  %v3377_v31 = vsel %vm2991_vm3, %v4300_v23, 0.0  ;;  %4313 = vpow2.f32 %v3354_v61  ;;  %v3360_v49 = vmul.f32 1.442695, %v3329_v8 }
 0xbf4   : > { %4315 = vpow2.f32 %v3356_v58 }
 0xbf5   : > { %4317 = vpow2.f32 %v3358_v41  ;;  %v3075_v41 = vand.u32 65535, %v6197_v45 }
 0xbf6   : > { %v4302_v10 = vpop.eup %4301  ;;  %4319 = vpow2.f32 %v3360_v49 }
 0xbf7   : > { %3369 = vadd.xlane.f32.xlu0 %v3368_v48  ;;  %3372 = vadd.xlane.f32.xlu1 %v3371_v55  ;;  %v4304_v26 = vpop.eup %4303  ;;  %v3380_v29 = vsel %vm2991_vm3, %v4302_v10, 0.0 }
 0xbf8   : > { %v3383_v47 = vsel %vm2991_vm3, %v4304_v26, 0.0  ;;  %v3090_v26 = vand.u32 65535, %v6192_v35  ;;  %v3120_v35 = vand.u32 65535, %v6225_v19 }
 0xbf9   : > { %v4306_v30 = vpop.eup %4305 }
 0xbfa   : > { %v4308_v11 = vpop.eup %4307  ;;  %v3386_v28 = vsel %vm2991_vm3, %v4306_v30, 0.0  ;;  %v3092_v30 = vcvt.s32.f32 %v3090_v26 }
 0xbfb   : > { %3375 = vadd.xlane.f32.xlu0 %v3374_v36  ;;  %3378 = vadd.xlane.f32.xlu1 %v3377_v31  ;;  %v4310_v56 = vpop.eup %4309  ;;  %v3389_v59 = vsel %vm2991_vm3, %v4308_v11, 0.0  ;;  %v3105_v11 = vand.u32 65535, %v6214_v25 }
 0xbfc   : > { %v4312_v48 = vpop.eup %4311  ;;  %v3392_v14 = vsel %vm2991_vm3, %v4310_v56, 0.0 }
 0xbfd   : > { %v4314_v55 = vpop.eup %4313  ;;  %v3395_v23 = vsel %vm2991_vm3, %v4312_v48, 0.0 }
 0xbfe   : > { %v4316_v61 = vpop.eup %4315  ;;  %v3398_v21 = vsel %vm2991_vm3, %v4314_v55, 0.0 }
 0xbff   : > { %3381 = vadd.xlane.f32.xlu0 %v3380_v29  ;;  %3384 = vadd.xlane.f32.xlu1 %v3383_v47  ;;  %v4318_v58 = vpop.eup %4317  ;;  %v3401_v8 = vsel %vm2991_vm3, %v4316_v61, 0.0  ;;  %v3077_v47 = vcvt.s32.f32 %v3075_v41 }
 0xc00   : > { %v4320_v36 = vpop.eup %4319  ;;  %v3404_v10 = vsel %vm2991_vm3, %v4318_v58, 0.0 }
 0xc01   : > { %v3407_v31 = vsel %vm2991_vm3, %v4320_v36, 0.0  ;;  %v3195_v36 = vand.u32 65535, %v6293_v37  ;;  %v3225_v37 = vand.u32 65535, %v6321_v27  ;;  %v3255_v27 = vand.u32 65535, %v6349_v33 }
 0xc02   : > { %v3285_v33 = vand.u32 65535, %v6371_v1 }
 0xc03   : > { %3387 = vadd.xlane.f32.xlu0 %v3386_v28  ;;  %3390 = vadd.xlane.f32.xlu1 %v3389_v59  ;;  %v3107_v59 = vcvt.s32.f32 %v3105_v11  ;;  %v3197_v26 = vcvt.s32.f32 %v3195_v36  ;;  %v3227_v11 = vcvt.s32.f32 %v3225_v37 }
 0xc07   : > { %3393 = vadd.xlane.f32.xlu0 %v3392_v14  ;;  %3396 = vadd.xlane.f32.xlu1 %v3395_v23  ;;  %v3122_v14 = vcvt.s32.f32 %v3120_v35 }
 0xc0b   : > { %3399 = vadd.xlane.f32.xlu0 %v3398_v21  ;;  %3402 = vadd.xlane.f32.xlu1 %v3401_v8  ;;  %v3165_v21 = vand.u32 65535, %v6267_v57 }
 0xc0d   : > { %v3167_v8 = vcvt.s32.f32 %v3165_v21 }
 0xc0f   : > { %3405 = vadd.xlane.f32.xlu0 %v3404_v10  ;;  %3408 = vadd.xlane.f32.xlu1 %v3407_v31  ;;  %v3210_v10 = vand.u32 65535, %v6296_v3  ;;  %v3240_v3 = vand.u32 65535, %v6324_v6  ;;  %v3270_v6 = vand.u32 65535, %v6352_v7  ;;  %v3300_v7 = vand.u32 65535, %v6374_v24 }
 0xc11   : > { %v3212_v41 = vcvt.s32.f32 %v3210_v10 }
 0xc5f   : > { %v6424_v49 = vpop.xlane.xlu1 %3094 }
 0xc60   : > { %v6426_v29 = vpop.xlane.xlu0 %3079  ;;  %vm3096_vm6 = vcmp.eq.f32.partialorder %v6208_v22, %v6424_v49  ;;  %v3135_v22 = vand.u32 65535, %v6244_v13  ;;  %v3180_v13 = vand.u32 65535, %v6279_v38  ;;  %v3101_v10 = vcvt.f32.s32 %v6424_v49 }
 0xc61   : > { %vm3081_vm7 = vcmp.eq.f32.partialorder %v6210_v32, %v6426_v29  ;;  %v3097_v28 = vsel %vm3096_vm6, %v3092_v30, inf  ;;  %v3150_v32 = vand.u32 65535, %v6247_v44 }
 0xc62   : > { %v3082_v56 = vsel %vm3081_vm7, %v3077_v47, inf  ;;  %3098 = vmin.xlane.f32.xlu1 %v3097_v28  ;;  %v3137_v61 = vcvt.s32.f32 %v3135_v22  ;;  %v3242_v28 = vcvt.s32.f32 %v3240_v3  ;;  %vm3506_vm7 = vcmask 269312  }
 0xc63   : > { %3083 = vmin.xlane.f32.xlu0 %v3082_v56 }
 0xc64   : > { %v6434_v45 = vpop.xlane.xlu0 %3109  ;;  %v6438_v48 = vpop.xlane.xlu1 %3124 }
 0xc65   : > { %vm3111_vm3 = vcmp.eq.f32.partialorder %v6231_v40, %v6434_v45  ;;  %vm3126_vm8 = vcmp.eq.f32.partialorder %v6239_v17, %v6438_v48  ;;  %v3152_v40 = vcvt.s32.f32 %v3150_v32  ;;  %v3287_v32 = vcvt.s32.f32 %v3285_v33 }
 0xc66   : > { %v3112_v25 = vsel %vm3111_vm3, %v3107_v59, inf  ;;  %v3127_v19 = vsel %vm3126_vm8, %v3122_v14, inf  ;;  %v3257_v59 = vcvt.s32.f32 %v3255_v27  ;;  %v3131_v49 = vcvt.f32.s32 %v6438_v48 }
 0xc67   : > { %3113 = vmin.xlane.f32.xlu0 %v3112_v25  ;;  %3128 = vmin.xlane.f32.xlu1 %v3127_v19  ;;  %v3272_v25 = vcvt.s32.f32 %v3270_v6  ;;  %vm3523_vm3 = vcmask 277504  }
 0xc68   : > { %v6444_v55 = vpop.xlane.xlu0 %3139  ;;  %v6446_v23 = vpop.xlane.xlu1 %3154 }
 0xc69   : > { %vm3141_vm9 = vcmp.eq.f32.partialorder %v6260_v50, %v6444_v55  ;;  %vm3156_vm10 = vcmp.eq.f32.partialorder %v6262_v20, %v6446_v23  ;;  %v3182_v50 = vcvt.s32.f32 %v3180_v13 }
 0xc6a   : > { %v3142_v17 = vsel %vm3141_vm9, %v3137_v61, inf  ;;  %v3157_v44 = vsel %vm3156_vm10, %v3152_v40, inf }
 0xc6b   : > { %3143 = vmin.xlane.f32.xlu0 %v3142_v17  ;;  %3158 = vmin.xlane.f32.xlu1 %v3157_v44 }
 0xc6c   : > { %v6454_v58 = vpop.xlane.xlu0 %3169  ;;  %v6459_v57 = vpop.xlane.xlu1 %3184 }
 0xc6d   : > { %vm3171_vm11 = vcmp.eq.f32.partialorder %v6288_v18, %v6454_v58  ;;  %vm3186_vm12 = vcmp.eq.f32.partialorder %v6302_v16, %v6459_v57  ;;  %v3191_v33 = vcvt.f32.s32 %v6459_v57 }
 0xc6e   : > { %v3172_v20 = vsel %vm3171_vm11, %v3167_v8, inf  ;;  %v3187_v38 = vsel %vm3186_vm12, %v3182_v50, inf }
 0xc6f   : > { %3173 = vmin.xlane.f32.xlu0 %v3172_v20  ;;  %3188 = vmin.xlane.f32.xlu1 %v3187_v38  ;;  %v3086_v20 = vcvt.f32.s32 %v6426_v29 }
 0xc70   : > { %v6464_v31 = vpop.xlane.xlu0 %3199  ;;  %v6469_v18 = vpop.xlane.xlu1 %3214 }
 0xc71   : > { %vm3201_vm13 = vcmp.eq.f32.partialorder %v6316_v0, %v6464_v31  ;;  %vm3216_vm14 = vcmp.eq.f32.partialorder %v6328_v4, %v6469_v18 }
 0xc72   : > { %v3202_v16 = vsel %vm3201_vm13, %v3197_v26, inf  ;;  %v3217_v30 = vsel %vm3216_vm14, %v3212_v41, inf  ;;  %v3116_v26 = vcvt.f32.s32 %v6434_v45  ;;  %v3161_v45 = vcvt.f32.s32 %v6446_v23 }
 0xc73   : > { %3203 = vmin.xlane.f32.xlu0 %v3202_v16  ;;  %3218 = vmin.xlane.f32.xlu1 %v3217_v30  ;;  %v3102_v30 = vshll.u32 %v3101_v10, 16 }
 0xc74   : > { %v6474_v47 = vpop.xlane.xlu0 %3229  ;;  %v6479_v0 = vpop.xlane.xlu1 %3244  ;;  %v6513_v27 = vshll.u32 %v3116_v26, 16 }
 0xc75   : > { %vm3231_vm15 = vcmp.eq.f32.partialorder %v6344_v54, %v6474_v47  ;;  %vm3246_vm0 = vcmp.eq.f32.partialorder %v6356_v39, %v6479_v0  ;;  %v3251_v48 = vcvt.f32.s32 %v6479_v0  ;;  %v6535_v0 = vshll.u32 %v3161_v45, 16 }
 0xc76   : > { %v3232_v4 = vsel %vm3231_vm15, %v3227_v11, inf  ;;  %v3247_v56 = vsel %vm3246_vm0, %v3242_v28, inf  ;;  %v3087_v11 = vshll.u32 %v3086_v20, 16 }
 0xc77   : > { %3233 = vmin.xlane.f32.xlu0 %v3232_v4  ;;  %3248 = vmin.xlane.f32.xlu1 %v3247_v56  ;;  %v3146_v4 = vcvt.f32.s32 %v6444_v55 }
 0xc78   : > { %v6484_v35 = vpop.xlane.xlu0 %3259  ;;  %v6489_v54 = vpop.xlane.xlu1 %3274 }
 0xc79   : > { %vm3261_vm2 = vcmp.eq.f32.partialorder %v6368_v63, %v6484_v35  ;;  %vm3276_vm4 = vcmp.eq.f32.partialorder %v6378_v34, %v6489_v54  ;;  %v3302_v63 = vcvt.s32.f32 %v3300_v7  ;;  %v3221_v7 = vcvt.f32.s32 %v6469_v18 }
 0xc7a   : > { %v3262_v39 = vsel %vm3261_vm2, %v3257_v59, inf  ;;  %v3277_v14 = vsel %vm3276_vm4, %v3272_v25, inf  ;;  %v3176_v59 = vcvt.f32.s32 %v6454_v58  ;;  %v3206_v25 = vcvt.f32.s32 %v6464_v31 }
 0xc7b   : > { %3263 = vmin.xlane.f32.xlu0 %v3262_v39  ;;  %3278 = vmin.xlane.f32.xlu1 %v3277_v14  ;;  %v3236_v39 = vcvt.f32.s32 %v6474_v47  ;;  %v3266_v14 = vcvt.f32.s32 %v6484_v35  ;;  %v6531_v18 = vshll.u32 %v3131_v49, 16  ;;  %v6533_v47 = vshll.u32 %v3146_v4, 16 }
 0xc7c   : > { %v6494_v22 = vpop.xlane.xlu0 %3289  ;;  %v6498_v1 = vpop.xlane.xlu1 %3304 }
 0xc7d   : > { %vm3291_vm5 = vcmp.eq.f32.partialorder %v6384_v46, %v6494_v22  ;;  %vm3306_vm6 = vcmp.eq.f32.partialorder %v6386_v52, %v6498_v1 }
 0xc7e   : > { %v3292_v24 = vsel %vm3291_vm5, %v3287_v32, inf  ;;  %v3307_v19 = vsel %vm3306_vm6, %v3302_v63, inf }
 0xc7f   : > { %3293 = vmin.xlane.f32.xlu0 %v3292_v24  ;;  %3308 = vmin.xlane.f32.xlu1 %v3307_v19  ;;  %v6538_v24 = vshll.u32 %v3176_v59, 16  ;;  %v6540_v19 = vshll.u32 %v3191_v33, 16  ;;  %v6805_v59 = vld [vmem:[#allocation5_spill] sm:$0xff] }
 0xc80   : > { %v3364_v34 = vpop.xlane.xlu0 %3363  ;;  %v3367_v61 = vpop.xlane.xlu1 %3366 }
 0xc81   : > { %4321 = vlog2.f32 %v3364_v34  ;;  %v6542_v34 = vshll.u32 %v3206_v25, 16  ;;  %v6806_v25 = vld [vmem:[#allocation6_spill] sm:$0xff] }
 0xc82   : > { %4323 = vlog2.f32 %v3367_v61  ;;  %v3281_v61 = vcvt.f32.s32 %v6489_v54 }
 0xc84   : > { %v3370_v40 = vpop.xlane.xlu0 %3369  ;;  %v3373_v21 = vpop.xlane.xlu1 %3372  ;;  %v6559_v49 = vshll.u32 %v3281_v61, 16 }
 0xc85   : > { %4325 = vlog2.f32 %v3370_v40 }
 0xc86   : > { %4327 = vlog2.f32 %v3373_v21  ;;  %v6545_v21 = vshll.u32 %v3221_v7, 16 }
 0xc88   : > { %v3376_v13 = vpop.xlane.xlu0 %3375  ;;  %v3379_v17 = vpop.xlane.xlu1 %3378 }
 0xc89   : > { %4329 = vlog2.f32 %v3376_v13  ;;  %v6547_v13 = vshll.u32 %v3236_v39, 16 }
 0xc8a   : > { %4331 = vlog2.f32 %v3379_v17  ;;  %v6549_v17 = vshll.u32 %v3251_v48, 16 }
 0xc8b   : > { %v4322_v38 = vpop.eup %4321 }
 0xc8c   : > { %v3382_v44 = vpop.xlane.xlu0 %3381  ;;  %v3385_v8 = vpop.xlane.xlu1 %3384  ;;  %v3411_v28 = vmul.f32 0.6931472, %v4322_v38 }
 0xc8d   : > { %v4324_v37 = vpop.eup %4323  ;;  %4333 = vlog2.f32 %v3382_v44  ;;  %v6551_v44 = vshll.u32 %v3266_v14, 16 }
 0xc8e   : > { %v3413_v29 = vmul.f32 0.6931472, %v4324_v37  ;;  %4335 = vlog2.f32 %v3385_v8  ;;  %v3442_v55 = vadd.f32 %v3411_v28, %v6186_v9 }
 0xc8f   : > { %v4326_v41 = vpop.eup %4325 }
 0xc90   : > { %v3388_v46 = vpop.xlane.xlu0 %3387  ;;  %v3391_v36 = vpop.xlane.xlu1 %3390  ;;  %v3415_v56 = vmul.f32 0.6931472, %v4326_v41  ;;  %v3443_v23 = vadd.f32 %v3413_v29, %v6182_v2  ;;  %v3458_v8 = vsub.f32 %v6186_v9, %v3442_v55  ;;  %v3296_v9 = vcvt.f32.s32 %v6494_v22  ;;  %v6807_v55 = vld [vmem:[#allocation8_spill] sm:$0xff] }
 0xc91   : > { %v4328_v6 = vpop.eup %4327  ;;  %4337 = vlog2.f32 %v3388_v46 }
 0xc92   : > { %v3417_v32 = vmul.f32 0.6931472, %v4328_v6  ;;  %4339 = vlog2.f32 %v3391_v36  ;;  %v3444_v35 = vadd.f32 %v3415_v56, %v6199_v12  ;;  %v3459_v46 = vsub.f32 %v6182_v2, %v3443_v23  ;;  %v6803_v36 = vld [vmem:[#allocation21_spill] sm:$0xff] }
 0xc93   : > { %v4330_v31 = vpop.eup %4329  ;;  %v3311_v6 = vcvt.f32.s32 %v6498_v1  ;;  %v3490_v7 = vsel %vm845_vm1, %v6806_v25, %v3458_v8 }
 0xc94   : > { %v6502_v50 = vpop.xlane.xlu0 %3393  ;;  %v6504_v52 = vpop.xlane.xlu1 %3396  ;;  %v3445_v10 = vadd.f32 %v3417_v32, %v6803_v36  ;;  %v3419_v20 = vmul.f32 0.6931472, %v4330_v31  ;;  %v3460_v26 = vsub.f32 %v6199_v12, %v3444_v35  ;;  %v3491_v33 = vsel %vm845_vm1, %v6805_v59, %v3459_v46  ;;  %v6809_v35 = vld [vmem:[#allocation24_spill] sm:$0xff] }
 0xc95   : > { %v4332_v63 = vpop.eup %4331  ;;  %4341 = vlog2.f32 %v6502_v50  ;;  %v6804_v50 = vld [vmem:[#allocation22_spill] sm:$0xff] }
 0xc96   : > { %v3421_v28 = vmul.f32 0.6931472, %v4332_v63  ;;  %4343 = vlog2.f32 %v6504_v52  ;;  %v3461_v12 = vsub.f32 %v6803_v36, %v3445_v10  ;;  %v3446_v56 = vadd.f32 %v3419_v20, %v6804_v50 }
 0xc97   : > { %v4334_v40 = vpop.eup %4333  ;;  %v3492_v23 = vsel %vm845_vm1, %v6807_v55, %v3460_v26 }
 0xc98   : > { %v6509_v3 = vpop.xlane.xlu0 %3399  ;;  %v6511_v16 = vpop.xlane.xlu1 %3402  ;;  %v3423_v29 = vmul.f32 0.6931472, %v4334_v40 }
 0xc99   : > { %v4336_v2 = vpop.eup %4335  ;;  %4345 = vlog2.f32 %v6509_v3 }
 0xc9a   : > { %v3448_v63 = vadd.f32 %v3423_v29, %v6809_v35  ;;  %v3425_v61 = vmul.f32 0.6931472, %v4336_v2  ;;  %4347 = vlog2.f32 %v6511_v16  ;;  %v6811_v29 = vld [vmem:[#allocation25_spill] sm:$0xff] }
 0xc9b   : > { %v4338_v39 = vpop.eup %4337 }
 0xc9c   : > { %v6527_v58 = vpop.xlane.xlu0 %3405  ;;  %v6529_v57 = vpop.xlane.xlu1 %3408  ;;  %v3427_v20 = vmul.f32 0.6931472, %v4338_v39  ;;  %v3449_v2 = vadd.f32 %v3425_v61, %v6811_v29 }
 0xc9d   : > { %4349 = vlog2.f32 %v6527_v58 }
 0xc9e   : > { %4351 = vlog2.f32 %v6529_v57  ;;  %v3465_v55 = vsub.f32 %v6811_v29, %v3449_v2  ;;  %v6815_v2 = vld [vmem:[#allocation11_spill] sm:$0xff] }
 0xcef   : > { %v3099_v38 = vpop.xlane.xlu1 %3098 }
 0xcf0   : > { %v3084_v54 = vpop.xlane.xlu0 %3083  ;;  %v3100_v37 = vcvt.f32.s32 %v3099_v38 }
 0xcf1   : > { %v3085_v41 = vcvt.f32.s32 %v3084_v54 }
 0xcf2   : > { %v3103_v4 = vadd.s32 %v3102_v30, %v3100_v37  ;;  %v4340_v30 = vpop.eup %4339  ;;  %v6810_v37 = vld [vmem:[#allocation7_spill] sm:$0xff] }
 0xcf3   : > { %v3088_v45 = vadd.s32 %v3087_v11, %v3085_v41  ;;  %v6808_v11 = vld [vmem:[#allocation23_spill] sm:$0xff]  ;;  %v3429_v26 = vmul.f32 0.6931472, %v4340_v30  ;;  %v3493_v41 = vsel %vm845_vm1, %v6810_v37, %v3461_v12  ;;  %v4342_v59 = vpop.eup %4341  ;;  %v6812_v30 = vld [vmem:[#allocation10_spill] sm:$0xff] }
 0xcf4   : > { %v3114_v52 = vpop.xlane.xlu0 %3113  ;;  %v3475_v48 = vcvt.s32.f32 %v3103_v4  ;;  %v3447_v31 = vadd.f32 %v3421_v28, %v6808_v11  ;;  %v3129_v40 = vpop.xlane.xlu1 %3128  ;;  %v3462_v28 = vsub.f32 %v6804_v50, %v3446_v56  ;;  %v3450_v50 = vadd.f32 %v3427_v20, %v6258_v62 }
 0xcf5   : > { %v3474_v14 = vcvt.s32.f32 %v3088_v45  ;;  %v3115_v32 = vcvt.f32.s32 %v3114_v52  ;;  %v3130_v10 = vcvt.f32.s32 %v3129_v40  ;;  %v4344_v12 = vpop.eup %4343  ;;  %v3451_v58 = vadd.f32 %v3429_v26, %v6264_v15 }
 0xcf6   : > { %v3508_v46 = vsel %vm3506_vm7, %v3491_v33, %v3475_v48  ;;  %v3463_v16 = vsub.f32 %v6808_v11, %v3447_v31  ;;  %v3494_v11 = vsel %vm845_vm1, %v6812_v30, %v3462_v28  ;;  %v3433_v31 = vmul.f32 0.6931472, %v4344_v12 }
 0xcf7   : > { %v3507_v8 = vsel %vm3506_vm7, %v3490_v7, %v3474_v14  ;;  %v3118_v36 = vadd.s32 %v6513_v27, %v3115_v32  ;;  %v3525_v38 = vsel %vm3523_vm3, %v3508_v46, 0.0  ;;  %v3133_v27 = vadd.s32 %v6531_v18, %v3130_v10  ;;  %v4346_v46 = vpop.eup %4345 }
 0xcf8   : > { %v3524_v54 = vsel %vm3523_vm3, %v3507_v8, 0.0  ;;  %3541 = vst [vmem:[%s6583_s22 + $0x8] sm:$0xff] %v3525_v38  ;;  %v3144_v4 = vpop.xlane.xlu0 %3143  ;;  %v3159_v45 = vpop.xlane.xlu1 %3158  ;;  %v3464_v18 = vsub.f32 %v6809_v35, %v3448_v63  ;;  %v3467_v38 = vsub.f32 %v6264_v15, %v3451_v58  ;;  %v3453_v29 = vadd.f32 %v3433_v31, %v6290_v42 }
 0xcf9   : > { %3540 = vst [vmem:[%s6583_s22] sm:$0xff] %v3524_v54  ;;  %v3476_v3 = vcvt.s32.f32 %v3118_v36  ;;  %v3477_v25 = vcvt.s32.f32 %v3133_v27  ;;  %v3145_v7 = vcvt.f32.s32 %v3144_v4  ;;  %v3160_v52 = vcvt.f32.s32 %v3159_v45  ;;  %v6814_v36 = vld [vmem:[#allocation12_spill] sm:$0xff]  ;;  %v4348_v37 = vpop.eup %4347 }
 0xcfa   : > { %v3496_v10 = vsel %vm845_vm1, %v6814_v36, %v3464_v18  ;;  %v3497_v4 = vsel %vm845_vm1, %v6815_v2, %v3465_v55  ;;  %v3469_v30 = vsub.f32 %v6290_v42, %v3453_v29  ;;  %v3297_v2 = vshll.u32 %v3296_v9, 16 }
 0xcfb   : > { %v3509_v33 = vsel %vm3506_vm7, %v3492_v23, %v3476_v3  ;;  %v3510_v39 = vsel %vm3506_vm7, %v3493_v41, %v3477_v25  ;;  %v3148_v48 = vadd.s32 %v6533_v47, %v3145_v7  ;;  %v3163_v14 = vadd.s32 %v6535_v0, %v3160_v52  ;;  %v6813_v0 = vld [vmem:[#allocation9_spill] sm:$0xff]  ;;  %v6816_v7 = vld [vmem:[#allocation14_spill] sm:$0xff] }
 0xcfc   : > { %v3526_v56 = vsel %vm3523_vm3, %v3509_v33, 0.0  ;;  %v3431_v23 = vmul.f32 0.6931472, %v4342_v59  ;;  %v3527_v32 = vsel %vm3523_vm3, %v3510_v39, 0.0  ;;  %v3174_v57 = vpop.xlane.xlu0 %3173  ;;  %v3189_v40 = vpop.xlane.xlu1 %3188  ;;  %v3466_v47 = vsub.f32 %v6258_v62, %v3450_v50 }
 0xcfd   : > { %3542 = vst [vmem:[%s6583_s22 + $0x10] sm:$0xff] %v3526_v56  ;;  %3543 = vst [vmem:[%s6583_s22 + $0x18] sm:$0xff] %v3527_v32  ;;  %v3478_v35 = vcvt.s32.f32 %v3148_v48  ;;  %v3479_v63 = vcvt.s32.f32 %v3163_v14  ;;  %v3175_v61 = vcvt.f32.s32 %v3174_v57  ;;  %v3495_v8 = vsel %vm845_vm1, %v6813_v0, %v3463_v16  ;;  %v4350_v59 = vpop.eup %4349  ;;  %v6817_v56 = vld [vmem:[#allocation13_spill] sm:$0xff] }
 0xcfe   : > { %v3190_v20 = vcvt.f32.s32 %v3189_v40  ;;  %v3452_v41 = vadd.f32 %v3431_v23, %v6286_v43  ;;  %v3435_v33 = vmul.f32 0.6931472, %v4346_v46  ;;  %v3498_v52 = vsel %vm845_vm1, %v6816_v7, %v3466_v47  ;;  %v4352_v39 = vpop.eup %4351 }
 0xcff   : > { %v3511_v54 = vsel %vm3506_vm7, %v3494_v11, %v3478_v35  ;;  %v3512_v26 = vsel %vm3506_vm7, %v3495_v8, %v3479_v63  ;;  %v3178_v3 = vadd.s32 %v6538_v24, %v3175_v61  ;;  %v3499_v58 = vsel %vm845_vm1, %v6817_v56, %v3467_v38  ;;  %v6818_v8 = vld [vmem:[#allocation16_spill] sm:$0xff] }
 0xd00   : > { %v3528_v62 = vsel %vm3523_vm3, %v3511_v54, 0.0  ;;  %v3529_v27 = vsel %vm3523_vm3, %v3512_v26, 0.0  ;;  %v3193_v28 = vadd.s32 %v6540_v19, %v3190_v20  ;;  %v3204_v16 = vpop.xlane.xlu0 %3203  ;;  %v3219_v24 = vpop.xlane.xlu1 %3218  ;;  %v3437_v19 = vmul.f32 0.6931472, %v4348_v37  ;;  %v6819_v26 = vld [vmem:[#allocation15_spill] sm:$0xff] }
 0xd01   : > { %3544 = vst [vmem:[%s6583_s22 + $0x20] sm:$0xff] %v3528_v62  ;;  %3545 = vst [vmem:[%s6583_s22 + $0x28] sm:$0xff] %v3529_v27  ;;  %v3480_v15 = vcvt.s32.f32 %v3178_v3  ;;  %v3205_v45 = vcvt.f32.s32 %v3204_v16  ;;  %v3220_v12 = vcvt.f32.s32 %v3219_v24  ;;  %v3468_v48 = vsub.f32 %v6286_v43, %v3452_v41 }
 0xd02   : > { %v3481_v25 = vcvt.s32.f32 %v3193_v28  ;;  %v3454_v35 = vadd.f32 %v3435_v33, %v6314_v5  ;;  %v3439_v63 = vmul.f32 0.6931472, %v4350_v59  ;;  %v3455_v40 = vadd.f32 %v3437_v19, %v6318_v60 }
 0xd03   : > { %v3513_v18 = vsel %vm3506_vm7, %v3496_v10, %v3480_v15  ;;  %v3208_v50 = vadd.s32 %v6542_v34, %v3205_v45  ;;  %v3223_v23 = vadd.s32 %v6545_v21, %v3220_v12  ;;  %v3441_v46 = vmul.f32 0.6931472, %v4352_v39  ;;  %v6821_v12 = vld [vmem:[#allocation17_spill] sm:$0xff]  ;;  %v6822_v39 = vld [vmem:[#allocation20_spill] sm:$0xff] }
 0xd04   : > { %v3530_v14 = vsel %vm3523_vm3, %v3513_v18, 0.0  ;;  %v3514_v55 = vsel %vm3506_vm7, %v3497_v4, %v3481_v25  ;;  %v3234_v32 = vpop.xlane.xlu0 %3233  ;;  %v3249_v31 = vpop.xlane.xlu1 %3248  ;;  %v3500_v36 = vsel %vm845_vm1, %v6818_v8, %v3468_v48  ;;  %v3501_v3 = vsel %vm845_vm1, %v6819_v26, %v3469_v30  ;;  %v6820_v25 = vld [vmem:[#allocation18_spill] sm:$0xff] }
 0xd05   : > { %3546 = vst [vmem:[%s6583_s22 + $0x30] sm:$0xff] %v3530_v14  ;;  %v3531_v11 = vsel %vm3523_vm3, %v3514_v55, 0.0  ;;  %v3482_v34 = vcvt.s32.f32 %v3208_v50  ;;  %v3235_v57 = vcvt.f32.s32 %v3234_v32  ;;  %v3483_v43 = vcvt.s32.f32 %v3223_v23  ;;  %v6823_v23 = vld [vmem:[#allocation19_spill] sm:$0xff] }
 0xd06   : > { %3547 = vst [vmem:[%s6583_s22 + $0x38] sm:$0xff] %v3531_v11  ;;  %v3250_v61 = vcvt.f32.s32 %v3249_v31  ;;  %v3456_v62 = vadd.f32 %v3439_v63, %v6342_v53  ;;  %v3457_v16 = vadd.f32 %v3441_v46, %v6346_v51 }
 0xd07   : > { %v3515_v21 = vsel %vm3506_vm7, %v3498_v52, %v3482_v34  ;;  %v3238_v42 = vadd.s32 %v6547_v13, %v3235_v57  ;;  %v3516_v0 = vsel %vm3506_vm7, %v3499_v58, %v3483_v43  ;;  %v3470_v13 = vsub.f32 %v6314_v5, %v3454_v35 }
 0xd08   : > { %v3532_v47 = vsel %vm3523_vm3, %v3515_v21, 0.0  ;;  %v3253_v10 = vadd.s32 %v6549_v17, %v3250_v61  ;;  %v3264_v20 = vpop.xlane.xlu0 %3263  ;;  %v3533_v38 = vsel %vm3523_vm3, %v3516_v0, 0.0  ;;  %v3279_v41 = vpop.xlane.xlu1 %3278  ;;  %v3471_v17 = vsub.f32 %v6318_v60, %v3455_v40 }
 0xd09   : > { %3548 = vst [vmem:[%s6583_s22 + $0x40] sm:$0xff] %v3532_v47  ;;  %v3484_v54 = vcvt.s32.f32 %v3238_v42  ;;  %v3265_v37 = vcvt.f32.s32 %v3264_v20  ;;  %3549 = vst [vmem:[%s6583_s22 + $0x48] sm:$0xff] %v3533_v38  ;;  %v3280_v28 = vcvt.f32.s32 %v3279_v41  ;;  %v3312_v60 = vshll.u32 %v3311_v6, 16 }
 0xd0a   : > { %v3485_v27 = vcvt.s32.f32 %v3253_v10  ;;  %v3472_v9 = vsub.f32 %v6342_v53, %v3456_v62  ;;  %v3473_v1 = vsub.f32 %v6346_v51, %v3457_v16  ;;  %v3503_v19 = vsel %vm845_vm1, %v6821_v12, %v3471_v17 }
 0xd0b   : > { %v3517_v29 = vsel %vm3506_vm7, %v3500_v36, %v3484_v54  ;;  %v3268_v15 = vadd.s32 %v6551_v44, %v3265_v37  ;;  %v3283_v45 = vadd.s32 %v6559_v49, %v3280_v28  ;;  %v3502_v49 = vsel %vm845_vm1, %v6820_v25, %v3470_v13 }
 0xd0c   : > { %v3534_v4 = vsel %vm3523_vm3, %v3517_v29, 0.0  ;;  %v3518_v5 = vsel %vm3506_vm7, %v3501_v3, %v3485_v27  ;;  %v3294_v24 = vpop.xlane.xlu0 %3293  ;;  %v3309_v22 = vpop.xlane.xlu1 %3308  ;;  %v3504_v48 = vsel %vm845_vm1, %v6822_v39, %v3472_v9  ;;  %v3505_v32 = vsel %vm845_vm1, %v6823_v23, %v3473_v1 }
 0xd0d   : > { %3550 = vst [vmem:[%s6583_s22 + $0x50] sm:$0xff] %v3534_v4  ;;  %v3535_v59 = vsel %vm3523_vm3, %v3518_v5, 0.0  ;;  %v3486_v33 = vcvt.s32.f32 %v3268_v15  ;;  %v3295_v44 = vcvt.f32.s32 %v3294_v24  ;;  %v3487_v7 = vcvt.s32.f32 %v3283_v45 }
 0xd0e   : > { %3551 = vst [vmem:[%s6583_s22 + $0x58] sm:$0xff] %v3535_v59  ;;  %v3310_v52 = vcvt.f32.s32 %v3309_v22 }
 0xd0f   : > { %v3519_v6 = vsel %vm3506_vm7, %v3502_v49, %v3486_v33  ;;  %v3298_v18 = vadd.s32 %v3297_v2, %v3295_v44  ;;  %v3520_v56 = vsel %vm3506_vm7, %v3503_v19, %v3487_v7 }
 0xd10   : > { %v3536_v50 = vsel %vm3523_vm3, %v3519_v6, 0.0  ;;  %v3313_v53 = vadd.s32 %v3312_v60, %v3310_v52  ;;  %v3537_v58 = vsel %vm3523_vm3, %v3520_v56, 0.0 }
 0xd11   : > { %3552 = vst [vmem:[%s6583_s22 + $0x60] sm:$0xff] %v3536_v50  ;;  %v3488_v51 = vcvt.s32.f32 %v3298_v18  ;;  %3553 = vst [vmem:[%s6583_s22 + $0x68] sm:$0xff] %v3537_v58 }
 0xd12   : > { %v3489_v14 = vcvt.s32.f32 %v3313_v53 }
 0xd13   : > { %v3521_v55 = vsel %vm3506_vm7, %v3504_v48, %v3488_v51 }
 0xd14   : > { %v3538_v30 = vsel %vm3523_vm3, %v3521_v55, 0.0  ;;  %v3522_v11 = vsel %vm3506_vm7, %v3505_v32, %v3489_v14 }
 0xd15   : > { %3554 = vst [vmem:[%s6583_s22 + $0x70] sm:$0xff] %v3538_v30  ;;  %v3539_v34 = vsel %vm3523_vm3, %v3522_v11, 0.0 }
 0xd16   : > { %3555 = vst [vmem:[%s6583_s22 + $0x78] sm:$0xff] %v3539_v34 }
 0xd17   : > { %4366 = shalt.err (!%p4363_p3)
}
 0xd18   : > { %s4367_s17 = scalar_lea.hbm %s6693_s25, 2048  ;;  %s4371_s22 = scalar_lea.hbm %s6753_s8, 4096 }
 0xd19   : > { %p4368_p4 = scmp.ne.s32.totalorder %s6693_s25, %s4367_s17  ;;  %p4372_p9 = scmp.lt.u32.totalorder %s6693_s25, %s6753_s8 }
 0xd1a   : > { %p4373_p10 = scmp.lt.u32.totalorder %s4371_s22, %s4367_s17  ;;  %p4375_p12 = scmp.lt.u32.totalorder %s4367_s17, %s6693_s25 }
 0xd1b   : > { %p4369_p7 = pnand %p4368_p4, %p4507_p5 }
 0xd1c   : > { %p4374_p11 = por %p4373_p10, %p4372_p9 }
 0xd1d   : > { %p4370_p8 = pneg %p4369_p7 }
 0xd1e   : > { %p4376_p13 = por %p4375_p12, %p4374_p11 }
 0xd20   : > { %p4377_p0 = pnand %p4376_p13, %p4370_p8 }
 0xd22   : > { %4380 = shalt.err (!%p4377_p0)
}
 0xd23   : > { %s4422_s9 = smov 128   ;;  %s4423_s12 = smov 8  }
 0xd24   : > { %4018 = dma.vmem_to_hbm [thread:$0]  (%p4507_p5), %s6695_s23, 2048, %s6693_s25, %s6704_s26, %s4422_s9, %s4422_s9, %s4423_s12  }
 0xd25 PF: > { %p4024_p1 = scmp.ge.s32.totalorder %s4415_s30, 2  ;;  %s3585_s13 = sand.u32 1, %s4403_s27  }
 0xd26   : > { %s3586_s19 = scalar_lea.sflag [#allocation3], %s3585_s13 }
 0xd27   : > { %p4021_p2 = pnand %p4024_p1, %p4511_p6 }
 0xd29   : > { %4398 = dma.done.wait (!%p4021_p2), %s3586_s19, 2048  }
 0xd2a   : > { %4400 = vsyncadd (!%p4021_p2), %s3586_s19, 4294965248  ;;  %p18_p3 = scmp.ge.s32.totalorder %s4494_s11, 4   ;;  %s6824_s27 = smov %s4407_s28 }
 0xd2b   : > { %s6825_s28 = smov %s4411_s29  ;;  %s6826_s29 = smov %s4505_s14 }
 0xd2c   : > { %s6827_s30 = smov %s4494_s11  ;;  %20 = sbr.rel (!%p18_p3) target bundleno = 3 (0x3), region = 93 }
 0xd33   :  { %3591 = vsyncpa [#allocation3], 1 }
 0xd34   :  { %3593 = vsyncpa [#allocation3 + $0x1], 1 }

</bundles_post_ra>
